<compile_context>
chip_gen: v7x
topology: tpu7x:2x2x1
jax: 0.10.0
libtpu: 0.0.40
codegen_flags: <defaults>
</compile_context>

<pallas_src>
import numpy as np

import jax
import jax.numpy as jnp
from jax import lax
from jax.experimental import pallas as pl
from jax.experimental.pallas import tpu as pltpu

# ---------------- synthetic configuration (small shapes) ----------------
N_ATOMS = 16        # nodes in the atomic graph
N_EDGES = 48        # directed edges
N_SPECIES = 3       # num_chem_elements
H = 8               # num_hidden_channels
H_MLP = 16          # hidden width of edge / velocity MLPs
R_EDGE = 8          # num_edge_rbf
R_VEL = 8           # num_vel_rbf
LMAX = 1            # max_rotation_order
R_MAX = 5.0         # edge_cutoff
P_CUT = 6           # num_edge_poly_cutoff
VEL_MAX = 0.1       # vel_max
AVG_NEIGH = 4.0     # avg_num_neighbors
NUM_MP_LAYERS = 2   # num_mp_layers
HC = H // 4         # compressed channels (LinearCompression)
RMS_DISP = 1.0      # rms_targets[DISPLACEMENTS]
RMS_VEL = 1.0       # rms_targets[UPDATE_VELOCITIES]

F_NODE = 8 * H      # Hx0o + Hx0e + Hx1o + Hx1e
F_PRE = 10 * H      # [0o | 0e | 1o(3H) | 1e(3H) | 2H gate scalars]
OUT_LANES = 128     # lane-dense output slab width


def silu(x):
    return x * lax.logistic(x)


# ---------------- the single fused kernel ----------------
def _trajcast_fused_kernel(pos_ref, vel_ref, onehot_ref, mfrac_ref,
                           a_diff_ref, a_send_ref, a_recvT_ref,
                           freq_ref, centers_ref, w_vel_elem_ref, w_type_ref,
                           w1_ref, wm1_ref, bm1_ref, wm2_ref, bm2_ref, w2_ref, wsc_ref,
                           w_out_ref, d_s_ref, e_xyz_ref, c_mat_ref, e3_ref,
                           out_ref):
    f32 = jnp.float32
    pos = pos_ref[...]
    vel = vel_ref[...]
    onehot = onehot_ref[...]
    a_send = a_send_ref[...]
    a_recvT = a_recvT_ref[...]
    d_s = d_s_ref[...]        # scalar -> vector-slot spread    [8H, 8H]
    e_xyz = e_xyz_ref[...]    # y components -> block expansion [3, 8H]
    c_mat = c_mat_ref[...]    # vector . y block contraction    [8H, 8H]
    e3g = e3_ref[...]         # gate triplication               [10H, 8H]

    # ---- compute_edge_vectors + EdgeLengthEncoding (trainable Bessel * poly cutoff) + SH(edge) ----
    vec = jnp.dot(a_diff_ref[...], pos, preferred_element_type=f32)          # [E,3]
    r2 = jnp.maximum(jnp.sum(vec * vec, axis=1, keepdims=True), 1e-12)
    inv_r = lax.rsqrt(r2)                                                    # EUP
    r = r2 * inv_r
    u = r * (1.0 / R_MAX)
    bessel = ((2.0 / R_MAX) ** 0.5) * jnp.sin(r * (freq_ref[...] * (1.0 / R_MAX))) * inv_r
    p = float(P_CUT)
    u2 = u * u
    u3 = u2 * u
    u6 = u3 * u3
    u7 = u6 * u
    u8 = u7 * u
    fc = (1.0
          - (p + 1.0) * (p + 2.0) / 2.0 * u6
          + p * (p + 2.0) * u7
          - p * (p + 1.0) / 2.0 * u8)
    fc = jnp.where(u < 1.0, fc, 0.0)
    rbf_e = bessel * fc                                                      # [E,R_EDGE]
    y_e = (3.0 ** 0.5) * (vec * inv_r)                                       # l=1 SH, edges [E,3]

    # ---- ElementBasedNormEncoding(|v|) + SH(velocities) ----
    n2 = jnp.maximum(jnp.sum(vel * vel, axis=1, keepdims=True), 1e-12)
    inv_n = lax.rsqrt(n2)
    n = n2 * inv_n
    d = (n - centers_ref[...]) * (R_VEL / VEL_MAX)
    gauss = jnp.exp(-0.5 * d * d)
    # TODO(synk): per-element basis mixing of ElementBasedNormEncoding approximated as an
    # element-conditioned per-basis modulation.
    scale_v = jnp.dot(onehot, w_vel_elem_ref[...], preferred_element_type=f32)
    rbf_v = gauss * scale_v                                                  # [N,R_VEL]
    y_v = (3.0 ** 0.5) * (vel * inv_n)                                       # l=1 SH, nodes [N,3]

    # ---- layer-invariant edge/velocity MLPs for ALL layers (hoisted out of the MP loop) ----
    emb_comb = jnp.concatenate(
        [jnp.concatenate([rbf_e, jnp.zeros((N_EDGES, R_VEL), f32)], axis=1),
         jnp.concatenate([jnp.zeros((N_ATOMS, R_EDGE), f32), rbf_v], axis=1)],
        axis=0)                                                              # [E+N, 2R]
    h_all = silu(jnp.dot(emb_comb, wm1_ref[...], preferred_element_type=f32) + bm1_ref[...])
    w_all = jnp.dot(h_all, wm2_ref[...], preferred_element_type=f32) + bm2_ref[...]  # [E+N, L*32H]

    # ---- LinearTypeEncoding: one-hot -> Hx0e embedded in the full 8H layout ----
    x = jnp.dot(onehot, w_type_ref[...], preferred_element_type=f32)         # [N,8H]

    def tp(feat, yvec, w_a, w_b):
        # "uvu" tensor product of (Hx0o+Hx0e+Hx1o+Hx1e) with Y = 1x0e + 1x1o, outputs kept to l<=1.
        # Full-width formulation: w_a/w_b are already permuted/duplicated to the output-block
        # layout, y expansion / scalar spread / vector contraction go through the MXU.
        # TODO(synk): l=2 outputs and the antisymmetric 1x1 (cross-product) paths are truncated.
        y_full = jnp.dot(yvec, e_xyz, preferred_element_type=f32)            # [*, 8H]
        ss = jnp.dot(feat, d_s, preferred_element_type=f32)                  # scalars into 1o/1e slots
        cross = ss * y_full + jnp.dot(feat * y_full, c_mat, preferred_element_type=f32)
        return w_a * feat + w_b * cross                                      # y0 == 1 (component norm)

    lane = lax.broadcasted_iota(jnp.int32, (N_ATOMS, F_NODE), 1)

    # ---- message-passing stack (layer 0 plain, later layers residual) ----
    for l in range(NUM_MP_LAYERS):
        base = l * 4 * F_NODE
        w_a_e = w_all[0:N_EDGES, base:base + F_NODE]
        w_b_e = w_all[0:N_EDGES, base + F_NODE:base + 2 * F_NODE]
        w_a_v = w_all[N_EDGES:N_EDGES + N_ATOMS, base + 2 * F_NODE:base + 3 * F_NODE]
        w_b_v = w_all[N_EDGES:N_EDGES + N_ATOMS, base + 3 * F_NODE:base + 4 * F_NODE]

        x1 = jnp.dot(x, w1_ref[l], preferred_element_type=f32)               # irrep linear_1

        # edge messages: gather sender features, tensor product with edge SH, aggregate
        xj = jnp.dot(a_send, x1, preferred_element_type=f32)                 # [E,8H]
        msg = tp(xj, y_e, w_a_e, w_b_e)                                      # [E,8H]
        agg = jnp.dot(a_recvT, msg, preferred_element_type=f32) * (1.0 / AVG_NEIGH)

        # velocity conditioning (own features x Y(velocity))
        total = agg + tp(x1, y_v, w_a_v, w_b_v)

        # irrep linear_2 -> [0o | 0e | 1o | 1e | gates], then gate nonlinearity (full width)
        pre = jnp.dot(total, w2_ref[l], preferred_element_type=f32)          # [N,10H]
        t = jnp.tanh(pre)                                                    # EUP, full width
        s = silu(pre)                                                        # EUP, full width
        gate = jnp.dot(s, e3g, preferred_element_type=f32)                   # [N,8H] gates triplicated
        scal = jnp.where(lane < H, t[:, 0:F_NODE], s[:, 0:F_NODE])
        out = jnp.where(lane < 2 * H, scal, pre[:, 0:F_NODE] * gate)

        if l > 0:
            # TODO(synk): species-conditioned self-connection simplified to a per-channel,
            # per-irrep scaling of the input features (NequIP-style skip); scale pre-expanded
            # to 8H offline so this is one matmul + one FMA.
            out = out + x * jnp.dot(onehot, wsc_ref[l], preferred_element_type=f32)
        x = out

    # ---- LinearCompression @ LinearReadOut (+ RMS de-normalisation) folded into one matrix ----
    target = jnp.dot(x, w_out_ref[...], preferred_element_type=f32)          # [N,6] = [disp | dvel]

    # ---- ConservationLayer: zero net (mass-weighted) displacement / linear momentum ----
    # TODO(synk): conserve_angular=False and unit-system handling omitted.
    mom = jnp.sum(mfrac_ref[...] * target, axis=0, keepdims=True)            # exact (m_i / M_tot)
    target = target - mom

    # lane-dense output slab: cols 0:3 = disp, 3:6 = dvel, rest zero
    pad = jnp.zeros((N_ATOMS, OUT_LANES - 6), jnp.float32)
    out_ref[...] = jnp.concatenate([target, pad], axis=1)


# ---------------- Pallas plumbing ----------------
def _full_spec(shape):
    return pl.BlockSpec(shape, lambda i, _n=len(shape): (0,) * _n)


def trajcast_forward(params, pos, vel, species, edge_index):
    onehot = jax.nn.one_hot(species, N_SPECIES, dtype=jnp.float32)           # OneHotAtomTypeEncoding
    senders, receivers = edge_index[0], edge_index[1]
    a_send = jax.nn.one_hot(senders, N_ATOMS, dtype=jnp.float32)             # [E,N] gather matrix
    a_recv = jax.nn.one_hot(receivers, N_ATOMS, dtype=jnp.float32)           # [E,N]
    a_diff = a_recv - a_send                                                 # edge-vector matrix
    a_recvT = a_recv.T                                                       # [N,E] scatter matrix
    # TODO(synk): replace the dense one-hot adjacency with scalar-prefetched index gathers /
    # segment sums (PrefetchScalarGridSpec) before scaling past toy sizes.

    # ConservationLayer mass fractions computed exactly here (species-only dependence).
    masses = jnp.sum(onehot * params["mass_row"], axis=1, keepdims=True)     # [N,1]
    mass_frac = masses / jnp.sum(masses)

    # TODO(synk): NormalizationLayer only rescales training targets on the graph; no-op at inference.

    inputs = [pos, vel, onehot, mass_frac,
              a_diff, a_send, a_recvT,
              params["bessel_freqs"], params["vel_centers"],
              params["w_vel_elem"], params["w_type_embed"],
              params["w1"], params["wm1"], params["bm1"], params["wm2"], params["bm2"],
              params["w2"], params["wsc"],
              params["w_out"], params["d_s"], params["e_xyz"], params["c_mat"], params["e3_gate"]]

    bytes_accessed = sum(int(a.size) * 4 for a in inputs) + N_ATOMS * OUT_LANES * 4
    flops = 2 * (
        N_EDGES * N_ATOMS * 3
        + (N_EDGES + N_ATOMS) * (2 * R_EDGE) * (NUM_MP_LAYERS * 2 * H_MLP)
        + (N_EDGES + N_ATOMS) * (NUM_MP_LAYERS * 2 * H_MLP) * (NUM_MP_LAYERS * 4 * F_NODE)
        + NUM_MP_LAYERS * (
            N_ATOMS * F_NODE * F_NODE
            + 2 * N_EDGES * N_ATOMS * F_NODE
            + (N_EDGES + N_ATOMS) * (3 * F_NODE + 2 * F_NODE * F_NODE)
            + N_ATOMS * F_NODE * F_PRE
            + N_ATOMS * F_PRE * F_NODE
            + N_ATOMS * N_SPECIES * F_NODE)
        + N_ATOMS * F_NODE * 6)
    transcendentals = (N_EDGES * R_EDGE + N_ATOMS * R_VEL
                       + (N_EDGES + N_ATOMS) * NUM_MP_LAYERS * 2 * H_MLP
                       + NUM_MP_LAYERS * N_ATOMS * 2 * F_PRE)

    slab = pl.pallas_call(
        _trajcast_fused_kernel,
        grid=(1,),
        in_specs=[_full_spec(tuple(a.shape)) for a in inputs],
        out_specs=_full_spec((N_ATOMS, OUT_LANES)),
        out_shape=jax.ShapeDtypeStruct((N_ATOMS, OUT_LANES), jnp.float32),
        compiler_params=pltpu.CompilerParams(
            dimension_semantics=("arbitrary",)),
        cost_estimate=pl.CostEstimate(flops=flops, transcendentals=transcendentals,
                                      bytes_accessed=bytes_accessed),
    )(*inputs)

    return slab[:, 0:3], slab[:, 3:6]


# ---------------- constant structure matrices (baked offline) ----------------
def _block_perm(pairs, n_row_blocks, n_col_blocks):
    M = np.zeros((n_row_blocks * H, n_col_blocks * H), np.float32)
    eye = np.eye(H, dtype=np.float32)
    for rb, cb in pairs:
        M[rb * H:(rb + 1) * H, cb * H:(cb + 1) * H] = eye
    return jnp.asarray(M)


def _tp_weight_expand():
    # [w1..w8] (8 blocks) -> [wA | wB] (16 blocks) aligned with output blocks:
    # wA = [w1, w2, w3, w3, w3, w4, w4, w4]; wB = [w8, w7, w6, w6, w6, w5, w5, w5]
    pairs = [(0, 0), (1, 1), (2, 2), (2, 3), (2, 4), (3, 5), (3, 6), (3, 7),
             (7, 8), (6, 9), (5, 10), (5, 11), (5, 12), (4, 13), (4, 14), (4, 15)]
    return _block_perm(pairs, 8, 16)


def _tp_scalar_swap():
    # se -> 1o output slots, so -> 1e output slots
    return _block_perm([(1, 2), (1, 3), (1, 4), (0, 5), (0, 6), (0, 7)], 8, 8)


def _tp_vector_contract():
    # (1e components * y) summed into 0o slot, (1o components * y) summed into 0e slot
    return _block_perm([(2, 1), (3, 1), (4, 1), (5, 0), (6, 0), (7, 0)], 8, 8)


def _tp_y_expand():
    # y components (x,y,z) broadcast into the 1o and 1e component blocks
    M = np.zeros((3, F_NODE), np.float32)
    for c in range(3):
        M[c, (2 + c) * H:(3 + c) * H] = 1.0
        M[c, (5 + c) * H:(6 + c) * H] = 1.0
    return jnp.asarray(M)


def _gate_expand():
    # silu(gate scalars) at cols 8H:10H triplicated onto the 1o / 1e component blocks
    M = np.zeros((F_PRE, F_NODE), np.float32)
    for i in range(H):
        for c in range(3):
            M[8 * H + i, (2 + c) * H + i] = 1.0
            M[9 * H + i, (5 + c) * H + i] = 1.0
    return jnp.asarray(M)


# ---------------- parameter construction (deterministic, synthetic) ----------------
def dense_init(key, shape, scale=None):
    if scale is None:
        scale = 1.0 / float(shape[0]) ** 0.5
    return scale * jax.random.normal(key, shape, dtype=jnp.float32)


def _kron3(w):
    return jnp.kron(jnp.eye(3, dtype=jnp.float32), w)


def block_diag_irrep_linear(w_so, w_se, w_vo, w_ve):
    W = jnp.zeros((F_NODE, F_NODE), jnp.float32)
    W = W.at[0:H, 0:H].set(w_so)
    W = W.at[H:2 * H, H:2 * H].set(w_se)
    W = W.at[2 * H:5 * H, 2 * H:5 * H].set(_kron3(w_vo))
    W = W.at[5 * H:8 * H, 5 * H:8 * H].set(_kron3(w_ve))
    return W


def build_w2(w_so, w_se, w_g, w_vo, w_ve):
    # column layout: [0o(H) | 0e(H) | 1o(3H) | 1e(3H) | gates(2H)]
    W = jnp.zeros((F_NODE, F_PRE), jnp.float32)
    W = W.at[0:H, 0:H].set(w_so)                           # 0o -> 0o
    W = W.at[H:2 * H, H:2 * H].set(w_se)                   # 0e -> 0e
    W = W.at[2 * H:5 * H, 2 * H:5 * H].set(_kron3(w_vo))   # 1o -> 1o
    W = W.at[5 * H:8 * H, 5 * H:8 * H].set(_kron3(w_ve))   # 1e -> 1e
    W = W.at[H:2 * H, 8 * H:10 * H].set(w_g)               # 0e -> gate scalars (2Hx0e)
    return W


def build_readout(w_r):
    # (HCx0e + HCx1o) -> 2x1o target (disp x,y,z | dvel x,y,z); scalars drop by parity.
    W = jnp.zeros((4 * HC, 6), jnp.float32)
    for c in range(3):
        W = W.at[HC + c * HC:HC + (c + 1) * HC, c].set(w_r[:, 0])
        W = W.at[HC + c * HC:HC + (c + 1) * HC, 3 + c].set(w_r[:, 1])
    return W


def block_diag2(a, b):
    ra, ca = a.shape
    rb, cb = b.shape
    W = jnp.zeros((ra + rb, ca + cb), jnp.float32)
    W = W.at[0:ra, 0:ca].set(a)
    W = W.at[ra:, ca:].set(b)
    return W


def block_diag_list(mats):
    rows = sum(m.shape[0] for m in mats)
    cols = sum(m.shape[1] for m in mats)
    W = jnp.zeros((rows, cols), jnp.float32)
    r = c = 0
    for m in mats:
        W = W.at[r:r + m.shape[0], c:c + m.shape[1]].set(m)
        r += m.shape[0]
        c += m.shape[1]
    return W


def init_params(key):
    keys = jax.random.split(key, 64)
    it = iter(keys)
    nk = lambda: next(it)
    params = {}
    params["bessel_freqs"] = (jnp.pi * jnp.arange(1, R_EDGE + 1, dtype=jnp.float32)).reshape(1, R_EDGE)
    params["vel_centers"] = jnp.linspace(0.0, VEL_MAX, R_VEL, dtype=jnp.float32).reshape(1, R_VEL)
    params["w_vel_elem"] = 1.0 + 0.1 * jax.random.normal(nk(), (N_SPECIES, R_VEL), dtype=jnp.float32)
    w_type = jnp.zeros((N_SPECIES, F_NODE), jnp.float32)
    params["w_type_embed"] = w_type.at[:, H:2 * H].set(dense_init(nk(), (N_SPECIES, H)))

    expand = _tp_weight_expand()                                   # (8H, 16H)

    w1_l, wm1_l, bm1_l, wm2_l, bm2_l, w2_l, wsc_l = [], [], [], [], [], [], []
    for _ in range(NUM_MP_LAYERS):
        w1_l.append(block_diag_irrep_linear(dense_init(nk(), (H, H)), dense_init(nk(), (H, H)),
                                            dense_init(nk(), (H, H)), dense_init(nk(), (H, H))))
        we1 = dense_init(nk(), (R_EDGE, H_MLP))
        be1 = 0.01 * jax.random.normal(nk(), (1, H_MLP), dtype=jnp.float32)
        we2 = dense_init(nk(), (H_MLP, 8 * H))
        be2 = 0.01 * jax.random.normal(nk(), (1, 8 * H), dtype=jnp.float32)
        wv1 = dense_init(nk(), (R_VEL, H_MLP))
        bv1 = 0.01 * jax.random.normal(nk(), (1, H_MLP), dtype=jnp.float32)
        wv2 = dense_init(nk(), (H_MLP, 8 * H))
        bv2 = 0.01 * jax.random.normal(nk(), (1, 8 * H), dtype=jnp.float32)
        # bake the tensor-product block permutation/duplication into the MLP output weights
        we2e, be2e = we2 @ expand, be2 @ expand                    # (H_MLP, 16H), (1, 16H)
        wv2e, bv2e = wv2 @ expand, bv2 @ expand
        # merged edge/velocity MLP weights (block-diagonal over paths)
        wm1_l.append(block_diag2(we1, wv1))                        # (2R, 2*H_MLP)
        bm1_l.append(jnp.concatenate([be1, bv1], axis=1))          # (1, 2*H_MLP)
        wm2_l.append(block_diag2(we2e, wv2e))                      # (2*H_MLP, 32H)
        bm2_l.append(jnp.concatenate([be2e, bv2e], axis=1))        # (1, 32H)
        w2_l.append(build_w2(dense_init(nk(), (H, H)), dense_init(nk(), (H, H)),
                             dense_init(nk(), (H, 2 * H)), dense_init(nk(), (H, H)),
                             dense_init(nk(), (H, H))))
        sc = dense_init(nk(), (N_SPECIES, 4 * H), scale=1.0)
        # pre-expand self-connection scales to the full 8H layout (1o/1e duplicated 3x)
        wsc_l.append(jnp.concatenate([sc[:, 0:H], sc[:, H:2 * H],
                                      jnp.tile(sc[:, 2 * H:3 * H], (1, 3)),
                                      jnp.tile(sc[:, 3 * H:4 * H], (1, 3))], axis=1))

    params["w1"] = jnp.stack(w1_l)                        # (L, 8H, 8H)
    params["wm1"] = jnp.concatenate(wm1_l, axis=1)        # (2R, L*2*H_MLP)    - layer-stacked
    params["bm1"] = jnp.concatenate(bm1_l, axis=1)        # (1, L*2*H_MLP)
    params["wm2"] = block_diag_list(wm2_l)                # (L*2*H_MLP, L*32H) - layer block-diag
    params["bm2"] = jnp.concatenate(bm2_l, axis=1)        # (1, L*32H)
    params["w2"] = jnp.stack(w2_l)                        # (L, 8H, 10H)
    params["wsc"] = jnp.stack(wsc_l)                      # (L, S, 8H)

    # LinearCompression @ LinearReadOut folded into one matrix, RMS de-normalisation baked in.
    W_c = jnp.zeros((F_NODE, 4 * HC), jnp.float32)
    W_c = W_c.at[H:2 * H, 0:HC].set(dense_init(nk(), (H, HC)))
    W_c = W_c.at[2 * H:5 * H, HC:4 * HC].set(_kron3(dense_init(nk(), (H, HC))))
    W_r = build_readout(dense_init(nk(), (HC, 2)))
    rms = jnp.array([RMS_DISP] * 3 + [RMS_VEL] * 3, jnp.float32)
    params["w_out"] = (W_c @ W_r) * rms[None, :]          # (8H, 6)

    # constant structure matrices used by the full-width tensor product / gate assembly
    params["d_s"] = _tp_scalar_swap()                     # (8H, 8H)
    params["e_xyz"] = _tp_y_expand()                      # (3, 8H)
    params["c_mat"] = _tp_vector_contract()               # (8H, 8H)
    params["e3_gate"] = _gate_expand()                    # (10H, 8H)

    params["mass_row"] = jnp.array([[1.008, 12.011, 15.999]], dtype=jnp.float32)
    return params


if __name__ == "__main__":
    key = jax.random.PRNGKey(0)
    kp, kpos, kvel, ksp, ke1, ke2 = jax.random.split(key, 6)
    params = init_params(kp)

    pos = 3.0 * jax.random.uniform(kpos, (N_ATOMS, 3), dtype=jnp.float32)
    vel = 0.03 * jax.random.normal(kvel, (N_ATOMS, 3), dtype=jnp.float32)
    species = jax.random.randint(ksp, (N_ATOMS,), 0, N_SPECIES)
    senders = jax.random.randint(ke1, (N_EDGES,), 0, N_ATOMS)
    offs = jax.random.randint(ke2, (N_EDGES,), 1, N_ATOMS)
    receivers = (senders + offs) % N_ATOMS
    edge_index = jnp.stack([senders, receivers])

    disp, dvel = trajcast_forward(params, pos, vel, species, edge_index)
    jax.block_until_ready((disp, dvel))

    assert disp.shape == (N_ATOMS, 3) and dvel.shape == (N_ATOMS, 3)
    assert bool(jnp.all(jnp.isfinite(disp))) and bool(jnp.all(jnp.isfinite(dvel)))
    print("KERNEL_OK")
</pallas_src>

<mosaic_0001>
module attributes {stable_mosaic.version = 11 : i64} {
  func.func @_trajcast_fused_kernel(%arg0: i32, %arg1: memref<16x3xf32, #tpu.memory_space<vmem>>, %arg2: memref<16x3xf32, #tpu.memory_space<vmem>>, %arg3: memref<16x3xf32, #tpu.memory_space<vmem>>, %arg4: memref<16x1xf32, #tpu.memory_space<vmem>>, %arg5: memref<48x16xf32, #tpu.memory_space<vmem>>, %arg6: memref<48x16xf32, #tpu.memory_space<vmem>>, %arg7: memref<16x48xf32, #tpu.memory_space<vmem>>, %arg8: memref<1x8xf32, #tpu.memory_space<vmem>>, %arg9: memref<1x8xf32, #tpu.memory_space<vmem>>, %arg10: memref<3x8xf32, #tpu.memory_space<vmem>>, %arg11: memref<3x64xf32, #tpu.memory_space<vmem>>, %arg12: memref<2x64x64xf32, #tpu.memory_space<vmem>>, %arg13: memref<16x64xf32, #tpu.memory_space<vmem>>, %arg14: memref<1x64xf32, #tpu.memory_space<vmem>>, %arg15: memref<64x512xf32, #tpu.memory_space<vmem>>, %arg16: memref<1x512xf32, #tpu.memory_space<vmem>>, %arg17: memref<2x64x80xf32, #tpu.memory_space<vmem>>, %arg18: memref<2x3x64xf32, #tpu.memory_space<vmem>>, %arg19: memref<64x6xf32, #tpu.memory_space<vmem>>, %arg20: memref<64x64xf32, #tpu.memory_space<vmem>>, %arg21: memref<3x64xf32, #tpu.memory_space<vmem>>, %arg22: memref<64x64xf32, #tpu.memory_space<vmem>>, %arg23: memref<80x64xf32, #tpu.memory_space<vmem>>, %arg24: memref<16x128xf32, #tpu.memory_space<vmem>>) attributes {dimension_semantics = [#tpu.dimension_semantics<arbitrary>], iteration_bounds = array<i64: 1>, scalar_prefetch = 0 : i64, scratch_operands = 0 : i64, tpu.core_type = #tpu.core_type<tc>, window_params = [{pipeline_mode = #tpu.pipeline_mode<synchronous>, transform_indices = @transform_0, window_bounds = array<i64: 16, 3>}, {pipeline_mode = #tpu.pipeline_mode<synchronous>, transform_indices = @transform_1, window_bounds = array<i64: 16, 3>}, {pipeline_mode = #tpu.pipeline_mode<synchronous>, transform_indices = @transform_2, window_bounds = array<i64: 16, 3>}, {pipeline_mode = #tpu.pipeline_mode<synchronous>, transform_indices = @transform_3, window_bounds = array<i64: 16, 1>}, {pipeline_mode = #tpu.pipeline_mode<synchronous>, transform_indices = @transform_4, window_bounds = array<i64: 48, 16>}, {pipeline_mode = #tpu.pipeline_mode<synchronous>, transform_indices = @transform_5, window_bounds = array<i64: 48, 16>}, {pipeline_mode = #tpu.pipeline_mode<synchronous>, transform_indices = @transform_6, window_bounds = array<i64: 16, 48>}, {pipeline_mode = #tpu.pipeline_mode<synchronous>, transform_indices = @transform_7, window_bounds = array<i64: 1, 8>}, {pipeline_mode = #tpu.pipeline_mode<synchronous>, transform_indices = @transform_8, window_bounds = array<i64: 1, 8>}, {pipeline_mode = #tpu.pipeline_mode<synchronous>, transform_indices = @transform_9, window_bounds = array<i64: 3, 8>}, {pipeline_mode = #tpu.pipeline_mode<synchronous>, transform_indices = @transform_10, window_bounds = array<i64: 3, 64>}, {pipeline_mode = #tpu.pipeline_mode<synchronous>, transform_indices = @transform_11, window_bounds = array<i64: 2, 64, 64>}, {pipeline_mode = #tpu.pipeline_mode<synchronous>, transform_indices = @transform_12, window_bounds = array<i64: 16, 64>}, {pipeline_mode = #tpu.pipeline_mode<synchronous>, transform_indices = @transform_13, window_bounds = array<i64: 1, 64>}, {pipeline_mode = #tpu.pipeline_mode<synchronous>, transform_indices = @transform_14, window_bounds = array<i64: 64, 512>}, {pipeline_mode = #tpu.pipeline_mode<synchronous>, transform_indices = @transform_15, window_bounds = array<i64: 1, 512>}, {pipeline_mode = #tpu.pipeline_mode<synchronous>, transform_indices = @transform_16, window_bounds = array<i64: 2, 64, 80>}, {pipeline_mode = #tpu.pipeline_mode<synchronous>, transform_indices = @transform_17, window_bounds = array<i64: 2, 3, 64>}, {pipeline_mode = #tpu.pipeline_mode<synchronous>, transform_indices = @transform_18, window_bounds = array<i64: 64, 6>}, {pipeline_mode = #tpu.pipeline_mode<synchronous>, transform_indices = @transform_19, window_bounds = array<i64: 64, 64>}, {pipeline_mode = #tpu.pipeline_mode<synchronous>, transform_indices = @transform_20, window_bounds = array<i64: 3, 64>}, {pipeline_mode = #tpu.pipeline_mode<synchronous>, transform_indices = @transform_21, window_bounds = array<i64: 64, 64>}, {pipeline_mode = #tpu.pipeline_mode<synchronous>, transform_indices = @transform_22, window_bounds = array<i64: 80, 64>}, {pipeline_mode = #tpu.pipeline_mode<synchronous>, transform_indices = @transform_23, window_bounds = array<i64: 16, 128>}]} {
    %c0 = arith.constant 0 : index
    %c0_0 = arith.constant 0 : index
    %0 = vector.load %arg1[%c0, %c0_0] : memref<16x3xf32, #tpu.memory_space<vmem>>, vector<16x3xf32>
    %c0_1 = arith.constant 0 : index
    %c0_2 = arith.constant 0 : index
    %1 = vector.load %arg2[%c0_1, %c0_2] : memref<16x3xf32, #tpu.memory_space<vmem>>, vector<16x3xf32>
    %c0_3 = arith.constant 0 : index
    %c0_4 = arith.constant 0 : index
    %2 = vector.load %arg3[%c0_3, %c0_4] : memref<16x3xf32, #tpu.memory_space<vmem>>, vector<16x3xf32>
    %c0_5 = arith.constant 0 : index
    %c0_6 = arith.constant 0 : index
    %3 = vector.load %arg6[%c0_5, %c0_6] : memref<48x16xf32, #tpu.memory_space<vmem>>, vector<48x16xf32>
    %c0_7 = arith.constant 0 : index
    %c0_8 = arith.constant 0 : index
    %4 = vector.load %arg7[%c0_7, %c0_8] : memref<16x48xf32, #tpu.memory_space<vmem>>, vector<16x48xf32>
    %c0_9 = arith.constant 0 : index
    %c0_10 = arith.constant 0 : index
    %5 = vector.load %arg20[%c0_9, %c0_10] : memref<64x64xf32, #tpu.memory_space<vmem>>, vector<64x64xf32>
    %c0_11 = arith.constant 0 : index
    %c0_12 = arith.constant 0 : index
    %6 = vector.load %arg21[%c0_11, %c0_12] : memref<3x64xf32, #tpu.memory_space<vmem>>, vector<3x64xf32>
    %c0_13 = arith.constant 0 : index
    %c0_14 = arith.constant 0 : index
    %7 = vector.load %arg22[%c0_13, %c0_14] : memref<64x64xf32, #tpu.memory_space<vmem>>, vector<64x64xf32>
    %c0_15 = arith.constant 0 : index
    %c0_16 = arith.constant 0 : index
    %8 = vector.load %arg23[%c0_15, %c0_16] : memref<80x64xf32, #tpu.memory_space<vmem>>, vector<80x64xf32>
    %c0_17 = arith.constant 0 : index
    %c0_18 = arith.constant 0 : index
    %9 = vector.load %arg5[%c0_17, %c0_18] : memref<48x16xf32, #tpu.memory_space<vmem>>, vector<48x16xf32>
    %cst = arith.constant dense<0.000000e+00> : vector<48x3xf32>
    %10 = tpu.matmul %9, %0, %cst {dimension_numbers = #tpu.dot_dimension_numbers<[1], [0], [0], [1], [0, 0, 1, 1], [], []>} : vector<48x16xf32>, vector<16x3xf32>, vector<48x3xf32> -> vector<48x3xf32>
    %11 = arith.mulf %10, %10 : vector<48x3xf32>
    %cst_19 = arith.constant dense<0.000000e+00> : vector<48xf32>
    %12 = vector.multi_reduction <add>, %11, %cst_19 [1] : vector<48x3xf32> to vector<48xf32>
    %13 = vector.shape_cast %12 : vector<48xf32> to vector<48x1xf32>
    %cst_20 = arith.constant 9.99999996E-13 : f32
    %14 = vector.broadcast %cst_20 : f32 to vector<48x1xf32>
    %15 = arith.maximumf %13, %14 : vector<48x1xf32>
    %16 = math.rsqrt %15 : vector<48x1xf32>
    %17 = arith.mulf %15, %16 : vector<48x1xf32>
    %cst_21 = arith.constant 2.000000e-01 : f32
    %18 = vector.broadcast %cst_21 : f32 to vector<48x1xf32>
    %19 = arith.mulf %17, %18 : vector<48x1xf32>
    %c0_22 = arith.constant 0 : index
    %c0_23 = arith.constant 0 : index
    %20 = vector.load %arg8[%c0_22, %c0_23] : memref<1x8xf32, #tpu.memory_space<vmem>>, vector<1x8xf32>
    %cst_24 = arith.constant 2.000000e-01 : f32
    %21 = vector.broadcast %cst_24 : f32 to vector<1x8xf32>
    %22 = arith.mulf %20, %21 : vector<1x8xf32>
    %23 = vector.broadcast %17 : vector<48x1xf32> to vector<48x8xf32>
    %24 = vector.broadcast %22 : vector<1x8xf32> to vector<48x8xf32>
    %25 = arith.mulf %23, %24 : vector<48x8xf32>
    %26 = math.sin %25 : vector<48x8xf32>
    %cst_25 = arith.constant 0.632455527 : f32
    %27 = vector.broadcast %cst_25 : f32 to vector<48x8xf32>
    %28 = arith.mulf %27, %26 : vector<48x8xf32>
    %29 = vector.broadcast %16 : vector<48x1xf32> to vector<48x8xf32>
    %30 = arith.mulf %28, %29 : vector<48x8xf32>
    %31 = arith.mulf %19, %19 : vector<48x1xf32>
    %32 = arith.mulf %31, %19 : vector<48x1xf32>
    %33 = arith.mulf %32, %32 : vector<48x1xf32>
    %34 = arith.mulf %33, %19 : vector<48x1xf32>
    %35 = arith.mulf %34, %19 : vector<48x1xf32>
    %cst_26 = arith.constant 2.800000e+01 : f32
    %36 = vector.broadcast %cst_26 : f32 to vector<48x1xf32>
    %37 = arith.mulf %36, %33 : vector<48x1xf32>
    %cst_27 = arith.constant 1.000000e+00 : f32
    %38 = vector.broadcast %cst_27 : f32 to vector<48x1xf32>
    %39 = arith.subf %38, %37 : vector<48x1xf32>
    %cst_28 = arith.constant 4.800000e+01 : f32
    %40 = vector.broadcast %cst_28 : f32 to vector<48x1xf32>
    %41 = arith.mulf %40, %34 : vector<48x1xf32>
    %42 = arith.addf %39, %41 : vector<48x1xf32>
    %cst_29 = arith.constant 2.100000e+01 : f32
    %43 = vector.broadcast %cst_29 : f32 to vector<48x1xf32>
    %44 = arith.mulf %43, %35 : vector<48x1xf32>
    %45 = arith.subf %42, %44 : vector<48x1xf32>
    %cst_30 = arith.constant 1.000000e+00 : f32
    %46 = vector.broadcast %cst_30 : f32 to vector<48x1xf32>
    %47 = arith.cmpf olt, %19, %46 : vector<48x1xf32>
    %cst_31 = arith.constant 0.000000e+00 : f32
    %48 = vector.broadcast %cst_31 : f32 to vector<48x1xf32>
    %49 = arith.select %47, %45, %48 : vector<48x1xi1>, vector<48x1xf32>
    %50 = vector.broadcast %49 : vector<48x1xf32> to vector<48x8xf32>
    %51 = arith.mulf %30, %50 : vector<48x8xf32>
    %52 = vector.broadcast %16 : vector<48x1xf32> to vector<48x3xf32>
    %53 = arith.mulf %10, %52 : vector<48x3xf32>
    %cst_32 = arith.constant 1.73205078 : f32
    %54 = vector.broadcast %cst_32 : f32 to vector<48x3xf32>
    %55 = arith.mulf %54, %53 : vector<48x3xf32>
    %56 = arith.mulf %1, %1 : vector<16x3xf32>
    %cst_33 = arith.constant dense<0.000000e+00> : vector<16xf32>
    %57 = vector.multi_reduction <add>, %56, %cst_33 [1] : vector<16x3xf32> to vector<16xf32>
    %58 = vector.shape_cast %57 : vector<16xf32> to vector<16x1xf32>
    %cst_34 = arith.constant 9.99999996E-13 : f32
    %59 = vector.broadcast %cst_34 : f32 to vector<16x1xf32>
    %60 = arith.maximumf %58, %59 : vector<16x1xf32>
    %61 = math.rsqrt %60 : vector<16x1xf32>
    %62 = arith.mulf %60, %61 : vector<16x1xf32>
    %c0_35 = arith.constant 0 : index
    %c0_36 = arith.constant 0 : index
    %63 = vector.load %arg9[%c0_35, %c0_36] : memref<1x8xf32, #tpu.memory_space<vmem>>, vector<1x8xf32>
    %64 = vector.broadcast %62 : vector<16x1xf32> to vector<16x8xf32>
    %65 = vector.broadcast %63 : vector<1x8xf32> to vector<16x8xf32>
    %66 = arith.subf %64, %65 : vector<16x8xf32>
    %cst_37 = arith.constant 8.000000e+01 : f32
    %67 = vector.broadcast %cst_37 : f32 to vector<16x8xf32>
    %68 = arith.mulf %66, %67 : vector<16x8xf32>
    %cst_38 = arith.constant -5.000000e-01 : f32
    %69 = vector.broadcast %cst_38 : f32 to vector<16x8xf32>
    %70 = arith.mulf %69, %68 : vector<16x8xf32>
    %71 = arith.mulf %70, %68 : vector<16x8xf32>
    %72 = math.exp %71 : vector<16x8xf32>
    %c0_39 = arith.constant 0 : index
    %c0_40 = arith.constant 0 : index
    %73 = vector.load %arg10[%c0_39, %c0_40] : memref<3x8xf32, #tpu.memory_space<vmem>>, vector<3x8xf32>
    %cst_41 = arith.constant dense<0.000000e+00> : vector<16x8xf32>
    %74 = tpu.matmul %2, %73, %cst_41 {dimension_numbers = #tpu.dot_dimension_numbers<[1], [0], [0], [1], [0, 0, 1, 1], [], []>} : vector<16x3xf32>, vector<3x8xf32>, vector<16x8xf32> -> vector<16x8xf32>
    %75 = arith.mulf %72, %74 : vector<16x8xf32>
    %76 = vector.broadcast %61 : vector<16x1xf32> to vector<16x3xf32>
    %77 = arith.mulf %1, %76 : vector<16x3xf32>
    %cst_42 = arith.constant 1.73205078 : f32
    %78 = vector.broadcast %cst_42 : f32 to vector<16x3xf32>
    %79 = arith.mulf %78, %77 : vector<16x3xf32>
    %cst_43 = arith.constant 0.000000e+00 : f32
    %80 = vector.broadcast %cst_43 : f32 to vector<48x8xf32>
    %81 = tpu.concatenate %51, %80 in 1 : vector<48x8xf32>, vector<48x8xf32> -> vector<48x16xf32>
    %cst_44 = arith.constant 0.000000e+00 : f32
    %82 = vector.broadcast %cst_44 : f32 to vector<16x8xf32>
    %83 = tpu.concatenate %82, %75 in 1 : vector<16x8xf32>, vector<16x8xf32> -> vector<16x16xf32>
    %84 = tpu.concatenate %81, %83 in 0 : vector<48x16xf32>, vector<16x16xf32> -> vector<64x16xf32>
    %c0_45 = arith.constant 0 : index
    %c0_46 = arith.constant 0 : index
    %85 = vector.load %arg13[%c0_45, %c0_46] : memref<16x64xf32, #tpu.memory_space<vmem>>, vector<16x64xf32>
    %cst_47 = arith.constant dense<0.000000e+00> : vector<64x64xf32>
    %86 = tpu.matmul %84, %85, %cst_47 {dimension_numbers = #tpu.dot_dimension_numbers<[1], [0], [0], [1], [0, 0, 1, 1], [], []>} : vector<64x16xf32>, vector<16x64xf32>, vector<64x64xf32> -> vector<64x64xf32>
    %c0_48 = arith.constant 0 : index
    %c0_49 = arith.constant 0 : index
    %87 = vector.load %arg14[%c0_48, %c0_49] : memref<1x64xf32, #tpu.memory_space<vmem>>, vector<1x64xf32>
    %88 = vector.broadcast %87 : vector<1x64xf32> to vector<64x64xf32>
    %89 = arith.addf %86, %88 : vector<64x64xf32>
    %90 = arith.negf %89 : vector<64x64xf32>
    %91 = math.exp %90 : vector<64x64xf32>
    %cst_50 = arith.constant 1.000000e+00 : f32
    %92 = vector.broadcast %cst_50 : f32 to vector<64x64xf32>
    %93 = arith.addf %92, %91 : vector<64x64xf32>
    %94 = arith.divf %92, %93 : vector<64x64xf32>
    %95 = arith.mulf %89, %94 : vector<64x64xf32>
    %c0_51 = arith.constant 0 : index
    %c0_52 = arith.constant 0 : index
    %96 = vector.load %arg15[%c0_51, %c0_52] : memref<64x512xf32, #tpu.memory_space<vmem>>, vector<64x512xf32>
    %cst_53 = arith.constant dense<0.000000e+00> : vector<64x512xf32>
    %97 = tpu.matmul %95, %96, %cst_53 {dimension_numbers = #tpu.dot_dimension_numbers<[1], [0], [0], [1], [0, 0, 1, 1], [], []>} : vector<64x64xf32>, vector<64x512xf32>, vector<64x512xf32> -> vector<64x512xf32>
    %c0_54 = arith.constant 0 : index
    %c0_55 = arith.constant 0 : index
    %98 = vector.load %arg16[%c0_54, %c0_55] : memref<1x512xf32, #tpu.memory_space<vmem>>, vector<1x512xf32>
    %99 = vector.broadcast %98 : vector<1x512xf32> to vector<64x512xf32>
    %100 = arith.addf %97, %99 : vector<64x512xf32>
    %c0_56 = arith.constant 0 : index
    %c0_57 = arith.constant 0 : index
    %101 = vector.load %arg11[%c0_56, %c0_57] : memref<3x64xf32, #tpu.memory_space<vmem>>, vector<3x64xf32>
    %cst_58 = arith.constant dense<0.000000e+00> : vector<16x64xf32>
    %102 = tpu.matmul %2, %101, %cst_58 {dimension_numbers = #tpu.dot_dimension_numbers<[1], [0], [0], [1], [0, 0, 1, 1], [], []>} : vector<16x3xf32>, vector<3x64xf32>, vector<16x64xf32> -> vector<16x64xf32>
    %103 = tpu.iota {dimensions = array<i32: 1>} : vector<16x64xi32>
    %104 = vector.extract_strided_slice %100 {offsets = [0, 0], sizes = [48, 64], strides = [1, 1]} : vector<64x512xf32> to vector<48x64xf32>
    %105 = vector.extract_strided_slice %100 {offsets = [0, 64], sizes = [48, 64], strides = [1, 1]} : vector<64x512xf32> to vector<48x64xf32>
    %106 = vector.extract_strided_slice %100 {offsets = [48, 128], sizes = [16, 64], strides = [1, 1]} : vector<64x512xf32> to vector<16x64xf32>
    %107 = vector.extract_strided_slice %100 {offsets = [48, 192], sizes = [16, 64], strides = [1, 1]} : vector<64x512xf32> to vector<16x64xf32>
    %c0_59 = arith.constant 0 : index
    %c0_60 = arith.constant 0 : index
    %c0_61 = arith.constant 0 : index
    %108 = vector.load %arg12[%c0_59, %c0_60, %c0_61] : memref<2x64x64xf32, #tpu.memory_space<vmem>>, vector<1x64x64xf32>
    %109 = vector.shape_cast %108 : vector<1x64x64xf32> to vector<64x64xf32>
    %cst_62 = arith.constant dense<0.000000e+00> : vector<16x64xf32>
    %110 = tpu.matmul %102, %109, %cst_62 {dimension_numbers = #tpu.dot_dimension_numbers<[1], [0], [0], [1], [0, 0, 1, 1], [], []>} : vector<16x64xf32>, vector<64x64xf32>, vector<16x64xf32> -> vector<16x64xf32>
    %cst_63 = arith.constant dense<0.000000e+00> : vector<48x64xf32>
    %111 = tpu.matmul %3, %110, %cst_63 {dimension_numbers = #tpu.dot_dimension_numbers<[1], [0], [0], [1], [0, 0, 1, 1], [], []>} : vector<48x16xf32>, vector<16x64xf32>, vector<48x64xf32> -> vector<48x64xf32>
    %cst_64 = arith.constant dense<0.000000e+00> : vector<48x64xf32>
    %112 = tpu.matmul %55, %6, %cst_64 {dimension_numbers = #tpu.dot_dimension_numbers<[1], [0], [0], [1], [0, 0, 1, 1], [], []>} : vector<48x3xf32>, vector<3x64xf32>, vector<48x64xf32> -> vector<48x64xf32>
    %cst_65 = arith.constant dense<0.000000e+00> : vector<48x64xf32>
    %113 = tpu.matmul %111, %5, %cst_65 {dimension_numbers = #tpu.dot_dimension_numbers<[1], [0], [0], [1], [0, 0, 1, 1], [], []>} : vector<48x64xf32>, vector<64x64xf32>, vector<48x64xf32> -> vector<48x64xf32>
    %114 = arith.mulf %113, %112 : vector<48x64xf32>
    %115 = arith.mulf %111, %112 : vector<48x64xf32>
    %cst_66 = arith.constant dense<0.000000e+00> : vector<48x64xf32>
    %116 = tpu.matmul %115, %7, %cst_66 {dimension_numbers = #tpu.dot_dimension_numbers<[1], [0], [0], [1], [0, 0, 1, 1], [], []>} : vector<48x64xf32>, vector<64x64xf32>, vector<48x64xf32> -> vector<48x64xf32>
    %117 = arith.addf %114, %116 : vector<48x64xf32>
    %118 = arith.mulf %104, %111 : vector<48x64xf32>
    %119 = arith.mulf %105, %117 : vector<48x64xf32>
    %120 = arith.addf %118, %119 : vector<48x64xf32>
    %cst_67 = arith.constant dense<0.000000e+00> : vector<16x64xf32>
    %121 = tpu.matmul %4, %120, %cst_67 {dimension_numbers = #tpu.dot_dimension_numbers<[1], [0], [0], [1], [0, 0, 1, 1], [], []>} : vector<16x48xf32>, vector<48x64xf32>, vector<16x64xf32> -> vector<16x64xf32>
    %cst_68 = arith.constant 2.500000e-01 : f32
    %122 = vector.broadcast %cst_68 : f32 to vector<16x64xf32>
    %123 = arith.mulf %121, %122 : vector<16x64xf32>
    %cst_69 = arith.constant dense<0.000000e+00> : vector<16x64xf32>
    %124 = tpu.matmul %79, %6, %cst_69 {dimension_numbers = #tpu.dot_dimension_numbers<[1], [0], [0], [1], [0, 0, 1, 1], [], []>} : vector<16x3xf32>, vector<3x64xf32>, vector<16x64xf32> -> vector<16x64xf32>
    %cst_70 = arith.constant dense<0.000000e+00> : vector<16x64xf32>
    %125 = tpu.matmul %110, %5, %cst_70 {dimension_numbers = #tpu.dot_dimension_numbers<[1], [0], [0], [1], [0, 0, 1, 1], [], []>} : vector<16x64xf32>, vector<64x64xf32>, vector<16x64xf32> -> vector<16x64xf32>
    %126 = arith.mulf %125, %124 : vector<16x64xf32>
    %127 = arith.mulf %110, %124 : vector<16x64xf32>
    %cst_71 = arith.constant dense<0.000000e+00> : vector<16x64xf32>
    %128 = tpu.matmul %127, %7, %cst_71 {dimension_numbers = #tpu.dot_dimension_numbers<[1], [0], [0], [1], [0, 0, 1, 1], [], []>} : vector<16x64xf32>, vector<64x64xf32>, vector<16x64xf32> -> vector<16x64xf32>
    %129 = arith.addf %126, %128 : vector<16x64xf32>
    %130 = arith.mulf %106, %110 : vector<16x64xf32>
    %131 = arith.mulf %107, %129 : vector<16x64xf32>
    %132 = arith.addf %130, %131 : vector<16x64xf32>
    %133 = arith.addf %123, %132 : vector<16x64xf32>
    %c0_72 = arith.constant 0 : index
    %c0_73 = arith.constant 0 : index
    %c0_74 = arith.constant 0 : index
    %134 = vector.load %arg17[%c0_72, %c0_73, %c0_74] : memref<2x64x80xf32, #tpu.memory_space<vmem>>, vector<1x64x80xf32>
    %135 = vector.shape_cast %134 : vector<1x64x80xf32> to vector<64x80xf32>
    %cst_75 = arith.constant dense<0.000000e+00> : vector<16x80xf32>
    %136 = tpu.matmul %133, %135, %cst_75 {dimension_numbers = #tpu.dot_dimension_numbers<[1], [0], [0], [1], [0, 0, 1, 1], [], []>} : vector<16x64xf32>, vector<64x80xf32>, vector<16x80xf32> -> vector<16x80xf32>
    %137 = math.tanh %136 : vector<16x80xf32>
    %138 = arith.negf %136 : vector<16x80xf32>
    %139 = math.exp %138 : vector<16x80xf32>
    %cst_76 = arith.constant 1.000000e+00 : f32
    %140 = vector.broadcast %cst_76 : f32 to vector<16x80xf32>
    %141 = arith.addf %140, %139 : vector<16x80xf32>
    %142 = arith.divf %140, %141 : vector<16x80xf32>
    %143 = arith.mulf %136, %142 : vector<16x80xf32>
    %cst_77 = arith.constant dense<0.000000e+00> : vector<16x64xf32>
    %144 = tpu.matmul %143, %8, %cst_77 {dimension_numbers = #tpu.dot_dimension_numbers<[1], [0], [0], [1], [0, 0, 1, 1], [], []>} : vector<16x80xf32>, vector<80x64xf32>, vector<16x64xf32> -> vector<16x64xf32>
    %c8_i32 = arith.constant 8 : i32
    %145 = vector.broadcast %c8_i32 : i32 to vector<16x64xi32>
    %146 = arith.cmpi slt, %103, %145 : vector<16x64xi32>
    %147 = vector.extract_strided_slice %137 {offsets = [0, 0], sizes = [16, 64], strides = [1, 1]} : vector<16x80xf32> to vector<16x64xf32>
    %148 = vector.extract_strided_slice %143 {offsets = [0, 0], sizes = [16, 64], strides = [1, 1]} : vector<16x80xf32> to vector<16x64xf32>
    %149 = arith.select %146, %147, %148 : vector<16x64xi1>, vector<16x64xf32>
    %c16_i32 = arith.constant 16 : i32
    %150 = vector.broadcast %c16_i32 : i32 to vector<16x64xi32>
    %151 = arith.cmpi slt, %103, %150 : vector<16x64xi32>
    %152 = vector.extract_strided_slice %136 {offsets = [0, 0], sizes = [16, 64], strides = [1, 1]} : vector<16x80xf32> to vector<16x64xf32>
    %153 = arith.mulf %152, %144 : vector<16x64xf32>
    %154 = arith.select %151, %149, %153 : vector<16x64xi1>, vector<16x64xf32>
    %155 = vector.extract_strided_slice %100 {offsets = [0, 256], sizes = [48, 64], strides = [1, 1]} : vector<64x512xf32> to vector<48x64xf32>
    %156 = vector.extract_strided_slice %100 {offsets = [0, 320], sizes = [48, 64], strides = [1, 1]} : vector<64x512xf32> to vector<48x64xf32>
    %157 = vector.extract_strided_slice %100 {offsets = [48, 384], sizes = [16, 64], strides = [1, 1]} : vector<64x512xf32> to vector<16x64xf32>
    %158 = vector.extract_strided_slice %100 {offsets = [48, 448], sizes = [16, 64], strides = [1, 1]} : vector<64x512xf32> to vector<16x64xf32>
    %c1 = arith.constant 1 : index
    %c0_78 = arith.constant 0 : index
    %c0_79 = arith.constant 0 : index
    %159 = vector.load %arg12[%c1, %c0_78, %c0_79] : memref<2x64x64xf32, #tpu.memory_space<vmem>>, vector<1x64x64xf32>
    %160 = vector.shape_cast %159 : vector<1x64x64xf32> to vector<64x64xf32>
    %cst_80 = arith.constant dense<0.000000e+00> : vector<16x64xf32>
    %161 = tpu.matmul %154, %160, %cst_80 {dimension_numbers = #tpu.dot_dimension_numbers<[1], [0], [0], [1], [0, 0, 1, 1], [], []>} : vector<16x64xf32>, vector<64x64xf32>, vector<16x64xf32> -> vector<16x64xf32>
    %cst_81 = arith.constant dense<0.000000e+00> : vector<48x64xf32>
    %162 = tpu.matmul %3, %161, %cst_81 {dimension_numbers = #tpu.dot_dimension_numbers<[1], [0], [0], [1], [0, 0, 1, 1], [], []>} : vector<48x16xf32>, vector<16x64xf32>, vector<48x64xf32> -> vector<48x64xf32>
    %cst_82 = arith.constant dense<0.000000e+00> : vector<48x64xf32>
    %163 = tpu.matmul %55, %6, %cst_82 {dimension_numbers = #tpu.dot_dimension_numbers<[1], [0], [0], [1], [0, 0, 1, 1], [], []>} : vector<48x3xf32>, vector<3x64xf32>, vector<48x64xf32> -> vector<48x64xf32>
    %cst_83 = arith.constant dense<0.000000e+00> : vector<48x64xf32>
    %164 = tpu.matmul %162, %5, %cst_83 {dimension_numbers = #tpu.dot_dimension_numbers<[1], [0], [0], [1], [0, 0, 1, 1], [], []>} : vector<48x64xf32>, vector<64x64xf32>, vector<48x64xf32> -> vector<48x64xf32>
    %165 = arith.mulf %164, %163 : vector<48x64xf32>
    %166 = arith.mulf %162, %163 : vector<48x64xf32>
    %cst_84 = arith.constant dense<0.000000e+00> : vector<48x64xf32>
    %167 = tpu.matmul %166, %7, %cst_84 {dimension_numbers = #tpu.dot_dimension_numbers<[1], [0], [0], [1], [0, 0, 1, 1], [], []>} : vector<48x64xf32>, vector<64x64xf32>, vector<48x64xf32> -> vector<48x64xf32>
    %168 = arith.addf %165, %167 : vector<48x64xf32>
    %169 = arith.mulf %155, %162 : vector<48x64xf32>
    %170 = arith.mulf %156, %168 : vector<48x64xf32>
    %171 = arith.addf %169, %170 : vector<48x64xf32>
    %cst_85 = arith.constant dense<0.000000e+00> : vector<16x64xf32>
    %172 = tpu.matmul %4, %171, %cst_85 {dimension_numbers = #tpu.dot_dimension_numbers<[1], [0], [0], [1], [0, 0, 1, 1], [], []>} : vector<16x48xf32>, vector<48x64xf32>, vector<16x64xf32> -> vector<16x64xf32>
    %cst_86 = arith.constant 2.500000e-01 : f32
    %173 = vector.broadcast %cst_86 : f32 to vector<16x64xf32>
    %174 = arith.mulf %172, %173 : vector<16x64xf32>
    %cst_87 = arith.constant dense<0.000000e+00> : vector<16x64xf32>
    %175 = tpu.matmul %79, %6, %cst_87 {dimension_numbers = #tpu.dot_dimension_numbers<[1], [0], [0], [1], [0, 0, 1, 1], [], []>} : vector<16x3xf32>, vector<3x64xf32>, vector<16x64xf32> -> vector<16x64xf32>
    %cst_88 = arith.constant dense<0.000000e+00> : vector<16x64xf32>
    %176 = tpu.matmul %161, %5, %cst_88 {dimension_numbers = #tpu.dot_dimension_numbers<[1], [0], [0], [1], [0, 0, 1, 1], [], []>} : vector<16x64xf32>, vector<64x64xf32>, vector<16x64xf32> -> vector<16x64xf32>
    %177 = arith.mulf %176, %175 : vector<16x64xf32>
    %178 = arith.mulf %161, %175 : vector<16x64xf32>
    %cst_89 = arith.constant dense<0.000000e+00> : vector<16x64xf32>
    %179 = tpu.matmul %178, %7, %cst_89 {dimension_numbers = #tpu.dot_dimension_numbers<[1], [0], [0], [1], [0, 0, 1, 1], [], []>} : vector<16x64xf32>, vector<64x64xf32>, vector<16x64xf32> -> vector<16x64xf32>
    %180 = arith.addf %177, %179 : vector<16x64xf32>
    %181 = arith.mulf %157, %161 : vector<16x64xf32>
    %182 = arith.mulf %158, %180 : vector<16x64xf32>
    %183 = arith.addf %181, %182 : vector<16x64xf32>
    %184 = arith.addf %174, %183 : vector<16x64xf32>
    %c1_90 = arith.constant 1 : index
    %c0_91 = arith.constant 0 : index
    %c0_92 = arith.constant 0 : index
    %185 = vector.load %arg17[%c1_90, %c0_91, %c0_92] : memref<2x64x80xf32, #tpu.memory_space<vmem>>, vector<1x64x80xf32>
    %186 = vector.shape_cast %185 : vector<1x64x80xf32> to vector<64x80xf32>
    %cst_93 = arith.constant dense<0.000000e+00> : vector<16x80xf32>
    %187 = tpu.matmul %184, %186, %cst_93 {dimension_numbers = #tpu.dot_dimension_numbers<[1], [0], [0], [1], [0, 0, 1, 1], [], []>} : vector<16x64xf32>, vector<64x80xf32>, vector<16x80xf32> -> vector<16x80xf32>
    %188 = math.tanh %187 : vector<16x80xf32>
    %189 = arith.negf %187 : vector<16x80xf32>
    %190 = math.exp %189 : vector<16x80xf32>
    %cst_94 = arith.constant 1.000000e+00 : f32
    %191 = vector.broadcast %cst_94 : f32 to vector<16x80xf32>
    %192 = arith.addf %191, %190 : vector<16x80xf32>
    %193 = arith.divf %191, %192 : vector<16x80xf32>
    %194 = arith.mulf %187, %193 : vector<16x80xf32>
    %cst_95 = arith.constant dense<0.000000e+00> : vector<16x64xf32>
    %195 = tpu.matmul %194, %8, %cst_95 {dimension_numbers = #tpu.dot_dimension_numbers<[1], [0], [0], [1], [0, 0, 1, 1], [], []>} : vector<16x80xf32>, vector<80x64xf32>, vector<16x64xf32> -> vector<16x64xf32>
    %c8_i32_96 = arith.constant 8 : i32
    %196 = vector.broadcast %c8_i32_96 : i32 to vector<16x64xi32>
    %197 = arith.cmpi slt, %103, %196 : vector<16x64xi32>
    %198 = vector.extract_strided_slice %188 {offsets = [0, 0], sizes = [16, 64], strides = [1, 1]} : vector<16x80xf32> to vector<16x64xf32>
    %199 = vector.extract_strided_slice %194 {offsets = [0, 0], sizes = [16, 64], strides = [1, 1]} : vector<16x80xf32> to vector<16x64xf32>
    %200 = arith.select %197, %198, %199 : vector<16x64xi1>, vector<16x64xf32>
    %c16_i32_97 = arith.constant 16 : i32
    %201 = vector.broadcast %c16_i32_97 : i32 to vector<16x64xi32>
    %202 = arith.cmpi slt, %103, %201 : vector<16x64xi32>
    %203 = vector.extract_strided_slice %187 {offsets = [0, 0], sizes = [16, 64], strides = [1, 1]} : vector<16x80xf32> to vector<16x64xf32>
    %204 = arith.mulf %203, %195 : vector<16x64xf32>
    %205 = arith.select %202, %200, %204 : vector<16x64xi1>, vector<16x64xf32>
    %c1_98 = arith.constant 1 : index
    %c0_99 = arith.constant 0 : index
    %c0_100 = arith.constant 0 : index
    %206 = vector.load %arg18[%c1_98, %c0_99, %c0_100] : memref<2x3x64xf32, #tpu.memory_space<vmem>>, vector<1x3x64xf32>
    %207 = vector.shape_cast %206 : vector<1x3x64xf32> to vector<3x64xf32>
    %cst_101 = arith.constant dense<0.000000e+00> : vector<16x64xf32>
    %208 = tpu.matmul %2, %207, %cst_101 {dimension_numbers = #tpu.dot_dimension_numbers<[1], [0], [0], [1], [0, 0, 1, 1], [], []>} : vector<16x3xf32>, vector<3x64xf32>, vector<16x64xf32> -> vector<16x64xf32>
    %209 = arith.mulf %154, %208 : vector<16x64xf32>
    %210 = arith.addf %205, %209 : vector<16x64xf32>
    %c0_102 = arith.constant 0 : index
    %c0_103 = arith.constant 0 : index
    %211 = vector.load %arg19[%c0_102, %c0_103] : memref<64x6xf32, #tpu.memory_space<vmem>>, vector<64x6xf32>
    %cst_104 = arith.constant dense<0.000000e+00> : vector<16x6xf32>
    %212 = tpu.matmul %210, %211, %cst_104 {dimension_numbers = #tpu.dot_dimension_numbers<[1], [0], [0], [1], [0, 0, 1, 1], [], []>} : vector<16x64xf32>, vector<64x6xf32>, vector<16x6xf32> -> vector<16x6xf32>
    %c0_105 = arith.constant 0 : index
    %c0_106 = arith.constant 0 : index
    %213 = vector.load %arg4[%c0_105, %c0_106] : memref<16x1xf32, #tpu.memory_space<vmem>>, vector<16x1xf32>
    %214 = vector.broadcast %213 : vector<16x1xf32> to vector<16x6xf32>
    %215 = arith.mulf %214, %212 : vector<16x6xf32>
    %cst_107 = arith.constant dense<0.000000e+00> : vector<6xf32>
    %216 = vector.multi_reduction <add>, %215, %cst_107 [0] : vector<16x6xf32> to vector<6xf32>
    %217 = vector.shape_cast %216 : vector<6xf32> to vector<1x6xf32>
    %218 = vector.broadcast %217 : vector<1x6xf32> to vector<16x6xf32>
    %219 = arith.subf %212, %218 : vector<16x6xf32>
    %cst_108 = arith.constant 0.000000e+00 : f32
    %220 = vector.broadcast %cst_108 : f32 to vector<16x122xf32>
    %221 = tpu.concatenate %219, %220 in 1 : vector<16x6xf32>, vector<16x122xf32> -> vector<16x128xf32>
    %c0_109 = arith.constant 0 : index
    %c0_110 = arith.constant 0 : index
    %222 = vector.load %arg24[%c0_109, %c0_110] : memref<16x128xf32, #tpu.memory_space<vmem>>, vector<16x128xf32>
    tpu.vector_store %arg24[%c0_109, %c0_110], %221 {strides = array<i32>} : memref<16x128xf32, #tpu.memory_space<vmem>>, vector<16x128xf32>,
    return
  }
  func.func @transform_0(%arg0: i32) -> (i32, i32) {
    %c0_i32 = arith.constant 0 : i32
    %c0_i32_0 = arith.constant 0 : i32
    %c0_i32_1 = arith.constant 0 : i32
    return %c0_i32, %c0_i32_0 : i32, i32
  }
  func.func @transform_1(%arg0: i32) -> (i32, i32) {
    %c0_i32 = arith.constant 0 : i32
    %c0_i32_0 = arith.constant 0 : i32
    %c0_i32_1 = arith.constant 0 : i32
    return %c0_i32, %c0_i32_0 : i32, i32
  }
  func.func @transform_2(%arg0: i32) -> (i32, i32) {
    %c0_i32 = arith.constant 0 : i32
    %c0_i32_0 = arith.constant 0 : i32
    %c0_i32_1 = arith.constant 0 : i32
    return %c0_i32, %c0_i32_0 : i32, i32
  }
  func.func @transform_3(%arg0: i32) -> (i32, i32) {
    %c0_i32 = arith.constant 0 : i32
    %c0_i32_0 = arith.constant 0 : i32
    %c0_i32_1 = arith.constant 0 : i32
    return %c0_i32, %c0_i32_0 : i32, i32
  }
  func.func @transform_4(%arg0: i32) -> (i32, i32) {
    %c0_i32 = arith.constant 0 : i32
    %c0_i32_0 = arith.constant 0 : i32
    %c0_i32_1 = arith.constant 0 : i32
    return %c0_i32, %c0_i32_0 : i32, i32
  }
  func.func @transform_5(%arg0: i32) -> (i32, i32) {
    %c0_i32 = arith.constant 0 : i32
    %c0_i32_0 = arith.constant 0 : i32
    %c0_i32_1 = arith.constant 0 : i32
    return %c0_i32, %c0_i32_0 : i32, i32
  }
  func.func @transform_6(%arg0: i32) -> (i32, i32) {
    %c0_i32 = arith.constant 0 : i32
    %c0_i32_0 = arith.constant 0 : i32
    %c0_i32_1 = arith.constant 0 : i32
    return %c0_i32, %c0_i32_0 : i32, i32
  }
  func.func @transform_7(%arg0: i32) -> (i32, i32) {
    %c0_i32 = arith.constant 0 : i32
    %c0_i32_0 = arith.constant 0 : i32
    %c0_i32_1 = arith.constant 0 : i32
    return %c0_i32, %c0_i32_0 : i32, i32
  }
  func.func @transform_8(%arg0: i32) -> (i32, i32) {
    %c0_i32 = arith.constant 0 : i32
    %c0_i32_0 = arith.constant 0 : i32
    %c0_i32_1 = arith.constant 0 : i32
    return %c0_i32, %c0_i32_0 : i32, i32
  }
  func.func @transform_9(%arg0: i32) -> (i32, i32) {
    %c0_i32 = arith.constant 0 : i32
    %c0_i32_0 = arith.constant 0 : i32
    %c0_i32_1 = arith.constant 0 : i32
    return %c0_i32, %c0_i32_0 : i32, i32
  }
  func.func @transform_10(%arg0: i32) -> (i32, i32) {
    %c0_i32 = arith.constant 0 : i32
    %c0_i32_0 = arith.constant 0 : i32
    %c0_i32_1 = arith.constant 0 : i32
    return %c0_i32, %c0_i32_0 : i32, i32
  }
  func.func @transform_11(%arg0: i32) -> (i32, i32, i32) {
    %c0_i32 = arith.constant 0 : i32
    %c0_i32_0 = arith.constant 0 : i32
    %c0_i32_1 = arith.constant 0 : i32
    %c0_i32_2 = arith.constant 0 : i32
    return %c0_i32, %c0_i32_0, %c0_i32_1 : i32, i32, i32
  }
  func.func @transform_12(%arg0: i32) -> (i32, i32) {
    %c0_i32 = arith.constant 0 : i32
    %c0_i32_0 = arith.constant 0 : i32
    %c0_i32_1 = arith.constant 0 : i32
    return %c0_i32, %c0_i32_0 : i32, i32
  }
  func.func @transform_13(%arg0: i32) -> (i32, i32) {
    %c0_i32 = arith.constant 0 : i32
    %c0_i32_0 = arith.constant 0 : i32
    %c0_i32_1 = arith.constant 0 : i32
    return %c0_i32, %c0_i32_0 : i32, i32
  }
  func.func @transform_14(%arg0: i32) -> (i32, i32) {
    %c0_i32 = arith.constant 0 : i32
    %c0_i32_0 = arith.constant 0 : i32
    %c0_i32_1 = arith.constant 0 : i32
    return %c0_i32, %c0_i32_0 : i32, i32
  }
  func.func @transform_15(%arg0: i32) -> (i32, i32) {
    %c0_i32 = arith.constant 0 : i32
    %c0_i32_0 = arith.constant 0 : i32
    %c0_i32_1 = arith.constant 0 : i32
    return %c0_i32, %c0_i32_0 : i32, i32
  }
  func.func @transform_16(%arg0: i32) -> (i32, i32, i32) {
    %c0_i32 = arith.constant 0 : i32
    %c0_i32_0 = arith.constant 0 : i32
    %c0_i32_1 = arith.constant 0 : i32
    %c0_i32_2 = arith.constant 0 : i32
    return %c0_i32, %c0_i32_0, %c0_i32_1 : i32, i32, i32
  }
  func.func @transform_17(%arg0: i32) -> (i32, i32, i32) {
    %c0_i32 = arith.constant 0 : i32
    %c0_i32_0 = arith.constant 0 : i32
    %c0_i32_1 = arith.constant 0 : i32
    %c0_i32_2 = arith.constant 0 : i32
    return %c0_i32, %c0_i32_0, %c0_i32_1 : i32, i32, i32
  }
  func.func @transform_18(%arg0: i32) -> (i32, i32) {
    %c0_i32 = arith.constant 0 : i32
    %c0_i32_0 = arith.constant 0 : i32
    %c0_i32_1 = arith.constant 0 : i32
    return %c0_i32, %c0_i32_0 : i32, i32
  }
  func.func @transform_19(%arg0: i32) -> (i32, i32) {
    %c0_i32 = arith.constant 0 : i32
    %c0_i32_0 = arith.constant 0 : i32
    %c0_i32_1 = arith.constant 0 : i32
    return %c0_i32, %c0_i32_0 : i32, i32
  }
  func.func @transform_20(%arg0: i32) -> (i32, i32) {
    %c0_i32 = arith.constant 0 : i32
    %c0_i32_0 = arith.constant 0 : i32
    %c0_i32_1 = arith.constant 0 : i32
    return %c0_i32, %c0_i32_0 : i32, i32
  }
  func.func @transform_21(%arg0: i32) -> (i32, i32) {
    %c0_i32 = arith.constant 0 : i32
    %c0_i32_0 = arith.constant 0 : i32
    %c0_i32_1 = arith.constant 0 : i32
    return %c0_i32, %c0_i32_0 : i32, i32
  }
  func.func @transform_22(%arg0: i32) -> (i32, i32) {
    %c0_i32 = arith.constant 0 : i32
    %c0_i32_0 = arith.constant 0 : i32
    %c0_i32_1 = arith.constant 0 : i32
    return %c0_i32, %c0_i32_0 : i32, i32
  }
  func.func @transform_23(%arg0: i32) -> (i32, i32) {
    %c0_i32 = arith.constant 0 : i32
    %c0_i32_0 = arith.constant 0 : i32
    %c0_i32_1 = arith.constant 0 : i32
    return %c0_i32, %c0_i32_0 : i32, i32
  }
}

</mosaic_0001>

<bundles_post_ra>
// kernel: tpu_custom_call.1
= control target key start
LH: loop header
LB: loop body
LE: loop exit
PB: predicated region body
PF: predicated region fallthrough
CT: control target
= control target key end

     0   :  { %s7635_s0 = inlined_call_operand.vmem [shape: f32[16,3], index: 0, kind: input, shape index: {}]   ;;  %s7636_s1 = inlined_call_operand.vmem [shape: f32[16,3], index: 1, kind: input, shape index: {}]   ;;  %s7637_s2 = inlined_call_operand.vmem [shape: f32[16,3], index: 2, kind: input, shape index: {}]   ;;  %s7638_s3 = inlined_call_operand.vmem [shape: f32[16,1], index: 3, kind: input, shape index: {}]   ;;  %s7639_s4 = inlined_call_operand.vmem [shape: f32[48,16], index: 4, kind: input, shape index: {}]   ;;  %s7640_s5 = inlined_call_operand.vmem [shape: f32[48,16], index: 5, kind: input, shape index: {}]   ;;  %s7641_s6 = inlined_call_operand.hbm [shape: f32[16,48], index: 6, kind: input, shape index: {}]   ;;  %s7642_s7 = inlined_call_operand.vmem [shape: f32[1,8], index: 7, kind: input, shape index: {}]   ;;  %s7643_s8 = inlined_call_operand.vmem [shape: f32[1,8], index: 8, kind: input, shape index: {}]   ;;  %s7644_s9 = inlined_call_operand.hbm [shape: f32[3,8], index: 9, kind: input, shape index: {}]   ;;  %s7645_s10 = inlined_call_operand.hbm [shape: f32[3,64], index: 10, kind: input, shape index: {}]   ;;  %s7646_s11 = inlined_call_operand.vmem [shape: f32[2,64,64], index: 11, kind: input, shape index: {}]   ;;  %s7647_s12 = inlined_call_operand.hbm [shape: f32[16,64], index: 12, kind: input, shape index: {}]   ;;  %s7648_s13 = inlined_call_operand.hbm [shape: f32[1,64], index: 13, kind: input, shape index: {}]   ;;  %s7649_s14 = inlined_call_operand.vmem [shape: f32[64,512], index: 14, kind: input, shape index: {}]   ;;  %s7650_s15 = inlined_call_operand.hbm [shape: f32[1,512], index: 15, kind: input, shape index: {}]   ;;  %s7651_s16 = inlined_call_operand.hbm [shape: f32[2,64,80], index: 16, kind: input, shape index: {}]   ;;  %s7652_s17 = inlined_call_operand.vmem [shape: f32[2,3,64], index: 17, kind: input, shape index: {}]   ;;  %s7653_s18 = inlined_call_operand.vmem [shape: f32[64,6], index: 18, kind: input, shape index: {}]   ;;  %s7654_s19 = inlined_call_operand.vmem [shape: f32[64,64], index: 19, kind: input, shape index: {}]   ;;  %s7655_s20 = inlined_call_operand.hbm [shape: f32[3,64], index: 20, kind: input, shape index: {}]   ;;  %s7656_s21 = inlined_call_operand.hbm [shape: f32[64,64], index: 21, kind: input, shape index: {}]   ;;  %s7657_s22 = inlined_call_operand.vmem [shape: f32[80,64], index: 22, kind: input, shape index: {}]   ;;  %s7658_s23 = inlined_call_operand.hbm [shape: f32[16,128], index: 23, kind: output, shape index: {}]  }
   0x1   :  { %7716 = sst [smem:[#allocation46_spill]] %s7635_s0 }
   0x2   :  { %7717 = sst [smem:[#allocation47_spill]] %s7636_s1 }
   0x3   :  { %7718 = sst [smem:[#allocation48_spill]] %s7637_s2 }
   0x4   :  { %7719 = sst [smem:[#allocation49_spill]] %s7638_s3 }
   0x5   :  { %7720 = sst [smem:[#allocation50_spill]] %s7639_s4 }
   0x6   :  { %7721 = sst [smem:[#allocation51_spill]] %s7640_s5 }
   0x7   :  { %7722 = sst [smem:[#allocation52_spill]] %s7641_s6 }
   0x8   :  { %7723 = sst [smem:[#allocation53_spill]] %s7642_s7 }
   0x9   :  { %28 = vsyncpa [#allocation3], 0 }
   0xa   :  { %29 = vsyncpa [#allocation6], 0 }
   0xb   :  { %30 = vsyncpa [#allocation9], 0 }
   0xc   :  { %31 = vsyncpa [#allocation12], 0 }
   0xd   :  { %32 = vsyncpa [#allocation15], 0 }
   0xe   :  { %33 = vsyncpa [#allocation4], 0  ;;  %s5745_s4 = smov [#allocation5]   ;;  %s5513_s5 = scalar_lea.hbm %s7644_s9, 64 }
   0xf   :  { %s68_s30 = sshll.u32 %s5745_s4, 4  ;;  %p5514_p0 = scmp.ne.s32.totalorder %s7644_s9, %s5513_s5  ;;  %s69_s30 = int_to_ptr.vmem [resolvable:$true] %s68_s30 }
  0x10   :  { %p5517_p1 = scmp.lt.u32.totalorder %s5513_s5, %s7644_s9 }
  0x12   :  { %p5519_p2 = pnand %p5517_p1, %p5514_p0 }
  0x14   :  { %5522 = shalt.err (!%p5519_p2)
}
  0x15   :  { %s5523_s27 = scalar_lea.vmem %s69_s30, 64  ;;  %p5528_p4 = scmp.lt.s32.totalorder %s69_s30, %s69_s30 }
  0x16   :  { %p5524_p3 = scmp.ne.s32.totalorder %s69_s30, %s5523_s27  ;;  %p5529_p5 = scmp.lt.s32.totalorder %s5523_s27, %s5523_s27 }
  0x18   :  { %p5530_p6 = por %p5529_p5, %p5528_p4 }
  0x1a   :  { %p5531_p7 = pnand %p5530_p6, %p5524_p3 }
  0x1c   :  { %5534 = shalt.err (!%p5531_p7)
}
  0x1d   :  { %71 = dma.hbm_to_vmem [thread:$0]  %s7644_s9, 64, %s69_s30, [#allocation6]  }
  0x1e   :  { %s5746_s29 = smov [#allocation8]   ;;  %s5747_s0 = smov [#allocation11]  }
  0x1f   :  { %s89_s3 = sshll.u32 %s5746_s29, 4  ;;  %s114_s4 = sshll.u32 %s5747_s0, 4  ;;  %s90_s3 = int_to_ptr.vmem [resolvable:$true] %s89_s3  ;;  %s115_s4 = int_to_ptr.vmem [resolvable:$true] %s114_s4 }
  0x20   :  { %s5535_s5 = scalar_lea.hbm %s7647_s12, 256 }
  0x21   :  { %p5536_p8 = scmp.ne.s32.totalorder %s7647_s12, %s5535_s5  ;;  %p5539_p9 = scmp.lt.u32.totalorder %s5535_s5, %s7647_s12 }
  0x23   :  { %p5541_p10 = pnand %p5539_p9, %p5536_p8 }
  0x25   :  { %5544 = shalt.err (!%p5541_p10)
}
  0x26   :  { %s5545_s9 = scalar_lea.vmem %s90_s3, 256  ;;  %p5550_p12 = scmp.lt.s32.totalorder %s90_s3, %s90_s3 }
  0x27   :  { %p5546_p11 = scmp.ne.s32.totalorder %s90_s3, %s5545_s9  ;;  %p5551_p13 = scmp.lt.s32.totalorder %s5545_s9, %s5545_s9 }
  0x29   :  { %p5552_p0 = por %p5551_p13, %p5550_p12 }
  0x2b   :  { %p5553_p1 = pnand %p5552_p0, %p5546_p11 }
  0x2d   :  { %5556 = shalt.err (!%p5553_p1)
}
  0x2e   :  { %s5748_s30 = smov 128   ;;  %s5749_s27 = smov 8  }
  0x2f   :  { %95 = dma.hbm_to_vmem [thread:$0]  %s7647_s12, 256, %s90_s3, [#allocation9], %s5748_s30, %s5748_s30, %s5749_s27  }
  0x30   :  { %s5557_s24 = scalar_lea.hbm %s7650_s15, 64 }
  0x31   :  { %p5558_p2 = scmp.ne.s32.totalorder %s7650_s15, %s5557_s24  ;;  %p5561_p3 = scmp.lt.u32.totalorder %s5557_s24, %s7650_s15 }
  0x33   :  { %p5563_p4 = pnand %p5561_p3, %p5558_p2 }
  0x35   :  { %5566 = shalt.err (!%p5563_p4)
}
  0x36   :  { %s5567_s2 = scalar_lea.vmem %s115_s4, 64  ;;  %p5572_p6 = scmp.lt.s32.totalorder %s115_s4, %s115_s4 }
  0x37   :  { %p5568_p5 = scmp.ne.s32.totalorder %s115_s4, %s5567_s2  ;;  %p5573_p7 = scmp.lt.s32.totalorder %s5567_s2, %s5567_s2 }
  0x39   :  { %p5574_p8 = por %p5573_p7, %p5572_p6 }
  0x3b   :  { %p5575_p9 = pnand %p5574_p8, %p5568_p5 }
  0x3d   :  { %5578 = shalt.err (!%p5575_p9)
}
  0x3e   :  { %117 = dma.hbm_to_vmem [thread:$0]  %s7650_s15, 64, %s115_s4, [#allocation12]  }
  0x3f   :  { %s5750_s6 = smov [#allocation14]   ;;  %s5751_s7 = smov [#allocation2]  }
  0x40   :  { %s142_s9 = sshll.u32 %s5750_s6, 4  ;;  %s51_s28 = sshll.u32 %s5751_s7, 4  ;;  %s143_s9 = int_to_ptr.vmem [resolvable:$true] %s142_s9  ;;  %s52_s28 = int_to_ptr.vmem [resolvable:$true] %s51_s28 }
  0x41   :  { %s5579_s24 = scalar_lea.hbm %s7655_s20, 64 }
  0x42   :  { %p5580_p10 = scmp.ne.s32.totalorder %s7655_s20, %s5579_s24  ;;  %p5583_p11 = scmp.lt.u32.totalorder %s5579_s24, %s7655_s20 }
  0x44   :  { %p5585_p12 = pnand %p5583_p11, %p5580_p10 }
  0x46   :  { %5588 = shalt.err (!%p5585_p12)
}
  0x47   :  { %s5589_s15 = scalar_lea.vmem %s143_s9, 64  ;;  %p5594_p0 = scmp.lt.s32.totalorder %s143_s9, %s143_s9 }
  0x48   :  { %p5590_p13 = scmp.ne.s32.totalorder %s143_s9, %s5589_s15  ;;  %p5595_p1 = scmp.lt.s32.totalorder %s5589_s15, %s5589_s15 }
  0x4a   :  { %p5596_p2 = por %p5595_p1, %p5594_p0 }
  0x4c   :  { %p5597_p3 = pnand %p5596_p2, %p5590_p13 }
  0x4e   :  { %5600 = shalt.err (!%p5597_p3)
}
  0x4f   :  { %145 = dma.hbm_to_vmem [thread:$0]  %s7655_s20, 64, %s143_s9, [#allocation15]  }
  0x50   :  { %s7724_s6 = sld [smem:[#allocation52_spill]] }
  0x56   :  { %s5601_s7 = scalar_lea.hbm %s7724_s6, 256 }
  0x57   :  { %p5602_p4 = scmp.ne.s32.totalorder %s7724_s6, %s5601_s7  ;;  %p5605_p5 = scmp.lt.u32.totalorder %s5601_s7, %s7724_s6 }
  0x59   :  { %p5607_p6 = pnand %p5605_p5, %p5602_p4 }
  0x5b   :  { %5610 = shalt.err (!%p5607_p6)
}
  0x5c   :  { %s5611_s5 = scalar_lea.vmem %s52_s28, 256  ;;  %p5616_p8 = scmp.lt.s32.totalorder %s52_s28, %s52_s28 }
  0x5d   :  { %p5612_p7 = scmp.ne.s32.totalorder %s52_s28, %s5611_s5  ;;  %p5617_p9 = scmp.lt.s32.totalorder %s5611_s5, %s5611_s5 }
  0x5f   :  { %p5618_p10 = por %p5617_p9, %p5616_p8 }
  0x61   :  { %p5619_p11 = pnand %p5618_p10, %p5612_p7 }
  0x63   :  { %5622 = shalt.err (!%p5619_p11)
}
  0x64   :  { %57 = dma.hbm_to_vmem [thread:$0]  %s7724_s6, 256, %s52_s28, [#allocation3], %s5748_s30, %s5748_s30, %s5749_s27  }
  0x65   :  { %s5752_s1 = smov [#allocation7]   ;;  %s5753_s15 = smov [#allocation10]  }
  0x66   :  { %s78_s26 = sshll.u32 %s5752_s1, 4  ;;  %s102_s4 = sshll.u32 %s5753_s15, 4  ;;  %s79_s26 = int_to_ptr.vmem [resolvable:$true] %s78_s26  ;;  %s103_s4 = int_to_ptr.vmem [resolvable:$true] %s102_s4 }
  0x67   :  { %s5623_s3 = scalar_lea.hbm %s7645_s10, 64 }
  0x68   :  { %p5624_p12 = scmp.ne.s32.totalorder %s7645_s10, %s5623_s3  ;;  %p5627_p13 = scmp.lt.u32.totalorder %s5623_s3, %s7645_s10 }
  0x6a   :  { %p5629_p0 = pnand %p5627_p13, %p5624_p12 }
  0x6c   :  { %5632 = shalt.err (!%p5629_p0)
}
  0x6d   :  { %s5633_s28 = scalar_lea.vmem %s79_s26, 64  ;;  %p5638_p2 = scmp.lt.s32.totalorder %s79_s26, %s79_s26 }
  0x6e   :  { %p5634_p1 = scmp.ne.s32.totalorder %s79_s26, %s5633_s28  ;;  %p5639_p3 = scmp.lt.s32.totalorder %s5633_s28, %s5633_s28 }
  0x70   :  { %p5640_p4 = por %p5639_p3, %p5638_p2 }
  0x72   :  { %p5641_p5 = pnand %p5640_p4, %p5634_p1 }
  0x74   :  { %5644 = shalt.err (!%p5641_p5)
}
  0x75   :  { %81 = dma.hbm_to_vmem [thread:$0]  %s7645_s10, 64, %s79_s26, [#allocation6]  }
  0x76   :  { %s5645_s9 = scalar_lea.hbm %s7648_s13, 16 }
  0x77   :  { %p5646_p6 = scmp.ne.s32.totalorder %s7648_s13, %s5645_s9  ;;  %p5649_p7 = scmp.lt.u32.totalorder %s5645_s9, %s7648_s13 }
  0x79   :  { %p5651_p8 = pnand %p5649_p7, %p5646_p6 }
  0x7b   :  { %5654 = shalt.err (!%p5651_p8)
}
  0x7c   :  { %s5655_s3 = scalar_lea.vmem %s103_s4, 16  ;;  %s5659_s7 = scalar_lea.vmem %s103_s4, 32 }
  0x7d   :  { %p5656_p9 = scmp.ne.s32.totalorder %s103_s4, %s5655_s3  ;;  %p5660_p10 = scmp.lt.s32.totalorder %s103_s4, %s103_s4 }
  0x7e   :  { %p5661_p11 = scmp.lt.s32.totalorder %s5659_s7, %s5655_s3 }
  0x80   :  { %p5662_p12 = por %p5661_p11, %p5660_p10 }
  0x82   :  { %p5663_p13 = pnand %p5662_p12, %p5656_p9 }
  0x84   :  { %5666 = shalt.err (!%p5663_p13)
}
  0x85   :  { %105 = dma.hbm_to_vmem [thread:$0]  %s7648_s13, 16, %s103_s4, [#allocation9]  }
  0x86   :  { %s5754_s29 = smov [#allocation13]   ;;  %s5755_s24 = smov [#allocation16]  }
  0x87   :  { %s123_s0 = sshll.u32 %s5754_s29, 4  ;;  %s151_s28 = sshll.u32 %s5755_s24, 4  ;;  %s124_s0 = int_to_ptr.vmem [resolvable:$true] %s123_s0  ;;  %s152_s28 = int_to_ptr.vmem [resolvable:$true] %s151_s28 }
  0x88   :  { %s5667_s5 = scalar_lea.hbm %s7651_s16, 2048 }
  0x89   :  { %p5668_p0 = scmp.ne.s32.totalorder %s7651_s16, %s5667_s5  ;;  %p5671_p1 = scmp.lt.u32.totalorder %s5667_s5, %s7651_s16 }
  0x8b   :  { %p5673_p2 = pnand %p5671_p1, %p5668_p0 }
  0x8d   :  { %5676 = shalt.err (!%p5673_p2)
}
  0x8e   :  { %s5677_s13 = scalar_lea.vmem %s124_s0, 2048  ;;  %p5682_p4 = scmp.lt.s32.totalorder %s124_s0, %s124_s0 }
  0x8f   :  { %p5678_p3 = scmp.ne.s32.totalorder %s124_s0, %s5677_s13  ;;  %p5683_p5 = scmp.lt.s32.totalorder %s5677_s13, %s5677_s13 }
  0x91   :  { %p5684_p6 = por %p5683_p5, %p5682_p4 }
  0x93   :  { %p5685_p7 = pnand %p5684_p6, %p5678_p3 }
  0x95   :  { %5688 = shalt.err (!%p5685_p7)
}
  0x96   :  { %129 = dma.hbm_to_vmem [thread:$0]  %s7651_s16, 2048, %s124_s0, [#allocation12], %s5748_s30, %s5748_s30, %s5749_s27  }
  0x97   :  { %s5689_s7 = scalar_lea.hbm %s7656_s21, 1024 }
  0x98   :  { %p5690_p8 = scmp.ne.s32.totalorder %s7656_s21, %s5689_s7  ;;  %p5693_p9 = scmp.lt.u32.totalorder %s5689_s7, %s7656_s21 }
  0x9a   :  { %p5695_p10 = pnand %p5693_p9, %p5690_p8 }
  0x9c   :  { %5698 = shalt.err (!%p5695_p10)
}
  0x9d   :  { %s5699_s6 = scalar_lea.vmem %s152_s28, 1024  ;;  %p5704_p12 = scmp.lt.s32.totalorder %s152_s28, %s152_s28 }
  0x9e   :  { %p5700_p11 = scmp.ne.s32.totalorder %s152_s28, %s5699_s6  ;;  %p5705_p13 = scmp.lt.s32.totalorder %s5699_s6, %s5699_s6 }
  0xa0   :  { %p5706_p0 = por %p5705_p13, %p5704_p12 }
  0xa2   :  { %p5707_p1 = pnand %p5706_p0, %p5700_p11 }
  0xa4   :  { %5710 = shalt.err (!%p5707_p1)
}
  0xa5   :  { %157 = dma.hbm_to_vmem [thread:$0]  %s7656_s21, 1024, %s152_s28, [#allocation15], %s5748_s30, %s5748_s30, %s5749_s27  }
  0xa6   :  { %5733 = dma.done.wait [#allocation3], 256  }
  0xa7   :  { %5734 = vsyncadd [#allocation3], 4294967040 }
  0xa8   :  { %5735 = dma.done.wait [#allocation6], 128  }
  0xa9   :  { %5736 = vsyncadd [#allocation6], 4294967168 }
  0xaa   :  { %5737 = dma.done.wait [#allocation9], 272  }
  0xab   :  { %5738 = vsyncadd [#allocation9], 4294967024 }
  0xac   :  { %5739 = dma.done.wait [#allocation12], 2112  }
  0xad   :  { %5740 = vsyncadd [#allocation12], 4294965184 }
  0xae   :  { %5741 = dma.done.wait [#allocation15], 1088  }
  0xaf   :  { %5742 = vsyncadd [#allocation15], 4294966208  ;;  %vm234_vm0 = vcmask 130048   ;;  %s7725_s20 = sld [smem:[#allocation46_spill]]  ;;  %s7726_s15 = sld [smem:[#allocation50_spill]]  ;;  %vm1183_vm1 = vcmask 1042432   ;;  %v7666_v36 = vlaneseq }
  0xb0   :  { %v1176_v4 = vld [vmem:[#allocation5] sm:$0x7]  ;;  %vm354_vm2 = vcmask 23552   ;;  %s7727_s2 = sld [smem:[#allocation48_spill]]  ;;  %s7732_s1 = sld [smem:[#allocation47_spill]] }
  0xb1   :  { %4620 = vmatprep.subr.msk.mxu1 %vm1183_vm1, %v1176_v4  ;;  %v6085_v39 = vshrl.u32 %v7666_v36, 7  ;;  %s7736_s4 = sld [smem:[#allocation53_spill]]  ;;  %s7805_s29 = sld [smem:[#allocation51_spill]] }
  0xb2   :  { %4621 = vmatpush3.msk.msra.mxu1 %vm1183_vm1, %v1176_v4  ;;  %s7812_s26 = sld [smem:[#allocation49_spill]] }
  0xb3   :  { %7735 = vst [vmem:[#allocation30_spill] sm:$0xff] %v6085_v39  ;;  %v7667_v46 = vsub.s32 0, %v6085_v39 }
  0xb5   :  { %v187_v0 = vld [vmem:[%s7725_s20] sm:$0xff]  ;;  %v188_v1 = vld [vmem:[%s7725_s20 + $0x8] sm:$0xff]  ;;  %v230_v8 = vld [vmem:[%s7726_s15 + $0x10] sm:$0xff] }
  0xb6   :  { %v228_v2 = vld [vmem:[%s7726_s15] sm:$0xff]  ;;  %v5040_v3 = vpack.c.bf16 %v188_v1, %v187_v0  ;;  %v192_v6 = vld [vmem:[%s7727_s2 + $0x8] sm:$0xff]  ;;  %v231_v9 = vld [vmem:[%s7726_s15 + $0x18] sm:$0xff] }
  0xb7   :  { %4611 = vmatprep.mubr.msk.f32.mxu0 %vm234_vm0, %v228_v2  ;;  %v191_v5 = vld [vmem:[%s7727_s2] sm:$0xff]  ;;  %v229_v7 = vld [vmem:[%s7726_s15 + $0x8] sm:$0xff] }
  0xb8   :  { %5041 = vmatprep.subr.bf16.mxu0 %v5040_v3  ;;  %4622 = vmatprep.mubr.msk.f32.mxu1 %vm354_vm2, %v191_v5  ;;  %v232_v10 = vld [vmem:[%s7726_s15 + $0x20] sm:$0xff]  ;;  %v233_v11 = vld [vmem:[%s7726_s15 + $0x28] sm:$0xff] }
  0xb9   :  { %5043 = vmatpush3.bf16.msra.mxu0 %v5040_v3  ;;  %4623 = vmatmul.mubr.msk.f32.vlgmr.msra.gmra.mrb[0].mxu1 %vm354_vm2, %v192_v6  ;;  %v189_v20 = vld [vmem:[%s7732_s1] sm:$0xff]  ;;  %v190_v28 = vld [vmem:[%s7732_s1 + $0x8] sm:$0xff] }
  0xba   :  { %v1143_v27 = vmul.f32 %v189_v20, %v189_v20  ;;  %v1144_v33 = vmul.f32 %v190_v28, %v190_v28  ;;  %v397_v42 = vld [vmem:[%s7736_s4] sm:$0x1] }
  0xbb   :  { %v398_v45 = vmul.f32 0.2, %v397_v42 }
  0xbc   :  { %4612 = vmatmul.mubr.msk.f32.vlgmr.msra.gmra.mrb[0].mxu0 %vm234_vm0, %v229_v7  ;;  %v1145_v32 = vsel %vm354_vm2, %v1143_v27, 0.0  ;;  %v1148_v35 = vsel %vm354_vm2, %v1144_v33, 0.0 }
  0xbd   :  { %4614 = vmatprep.mubr.msk.f32.mxu0 %vm234_vm0, %v230_v8  ;;  %v6093_v49 = vrot.slane %v398_v45, %v7667_v46 }
  0xc0   :  { %4615 = vmatmul.mubr.msk.f32.gmra.mrb[2].mxu0 %vm234_vm0, %v231_v9 }
  0xc1   :  { %4617 = vmatprep.mubr.msk.f32.mxu0 %vm234_vm0, %v232_v10 }
  0xc4   :  { %4618 = vmatmul.mubr.msk.f32.gmra.mrb[4].mxu0 %vm234_vm0, %v233_v11 }
 0x18f   :  { %v6046_v12 = vpop.f32.mrb[0].mxu0 }
 0x190   :  { %7728 = vst [vmem:[#allocation24_spill] sm:$0xff] %v6046_v12  ;;  %v6048_v13 = vpop.f32.mrb[1].mxu0  ;;  %v349_v15 = vmul.f32 %v6046_v12, %v6046_v12 }
 0x191   :  { %7729 = vst [vmem:[#allocation25_spill] sm:$0xff] %v6048_v13  ;;  %v348_v14 = vmul.f32 %v6048_v13, %v6048_v13 }
 0x192   :  { %v358_v23 = vsel %vm354_vm2, %v349_v15, 0.0 }
 0x193   :  { %v6054_v16 = vpop.f32.mrb[2].mxu0  ;;  %v355_v17 = vsel %vm354_vm2, %v348_v14, 0.0 }
 0x194   :  { %7730 = vst [vmem:[#allocation26_spill] sm:$0xff] %v6054_v16  ;;  %356 = vadd.xlane.f32.xlu0 %v355_v17  ;;  %v6057_v18 = vpop.f32.mrb[3].mxu0  ;;  %v351_v21 = vmul.f32 %v6054_v16, %v6054_v16  ;;  %v7748_v16 = vmov 683565275  }
 0x195   :  { %7731 = vst [vmem:[#allocation27_spill] sm:$0xff] %v6057_v18  ;;  %v350_v19 = vmul.f32 %v6057_v18, %v6057_v18 }
 0x196   :  { %v364_v30 = vsel %vm354_vm2, %v351_v21, 0.0 }
 0x197   :  { %v6066_v22 = vpop.f32.mrb[4].mxu0  ;;  %v361_v24 = vsel %vm354_vm2, %v350_v19, 0.0 }
 0x198   :  { %7733 = vst [vmem:[#allocation28_spill] sm:$0xff] %v6066_v22  ;;  %359 = vadd.xlane.f32.xlu0 %v358_v23  ;;  %362 = vadd.xlane.f32.xlu1 %v361_v24  ;;  %v6070_v25 = vpop.f32.mrb[5].mxu0  ;;  %v353_v29 = vmul.f32 %v6066_v22, %v6066_v22  ;;  %v6150_v23 = vpop.f32.mrb[0].mxu1 }
 0x199   :  { %7734 = vst [vmem:[#allocation29_spill] sm:$0xff] %v6070_v25  ;;  %v352_v26 = vmul.f32 %v6070_v25, %v6070_v25  ;;  %v6157_v28 = vpop.f32.mrb[1].mxu1 }
 0x19a   :  { %v370_v34 = vsel %vm354_vm2, %v353_v29, 0.0 }
 0x19b   :  { %v367_v31 = vsel %vm354_vm2, %v352_v26, 0.0 }
 0x19c   :  { %365 = vadd.xlane.f32.xlu1 %v364_v30  ;;  %368 = vadd.xlane.f32.xlu0 %v367_v31 }
 0x1a0   :  { %371 = vadd.xlane.f32.xlu1 %v370_v34  ;;  %1146 = vadd.xlane.f32.xlu0 %v1145_v32 }
 0x1a4   :  { %1149 = vadd.xlane.f32.xlu1 %v1148_v35 }
 0x221   :  { %v357_v37 = vpop.xlane.xlu0 %356 }
 0x222   :  { %v373_v38 = vmax.f32 %v357_v37, 1e-12 }
 0x224   :  { %5407 = vrsqrt.f32 %v373_v38 }
 0x225   :  { %v360_v40 = vpop.xlane.xlu0 %359  ;;  %v363_v41 = vpop.xlane.xlu1 %362 }
 0x226   :  { %v374_v43 = vmax.f32 %v360_v40, 1e-12  ;;  %v375_v44 = vmax.f32 %v363_v41, 1e-12  ;;  %v7685_v41 = vmov 683565275  }
 0x228   :  { %5409 = vrsqrt.f32 %v374_v43 }
 0x229   :  { %5411 = vrsqrt.f32 %v375_v44  ;;  %v366_v47 = vpop.xlane.xlu1 %365  ;;  %v6097_v51 = vpop.xlane.xlu0 %368 }
 0x22a   :  { %v376_v48 = vmax.f32 %v366_v47, 1e-12  ;;  %v7672_v0 = vmax.f32 %v6097_v51, 1e-12  ;;  %v7677_v47 = vmov 2131351028  }
 0x22c   :  { %5413 = vrsqrt.f32 %v376_v48 }
 0x22d   :  { %v6100_v53 = vpop.xlane.xlu1 %371  ;;  %v6117_v62 = vpop.xlane.xlu0 %1146  ;;  %5415 = vrsqrt.f32 %v7672_v0 }
 0x22e   :  { %v6095_v50 = vpop.eup %5407  ;;  %v7671_v4 = vmax.f32 %v6100_v53, 1e-12  ;;  %v7669_v7 = vmax.f32 %v6117_v62, 1e-12 }
 0x22f   :  { %v385_v52 = vmul.f32 %v6095_v50, %v373_v38 }
 0x230   :  { %5417 = vrsqrt.f32 %v7671_v4 }
 0x231   :  { %v6103_v54 = vmul.f32 %v6093_v49, %v385_v52  ;;  %v6111_v59 = vmul.f32 0.2, %v385_v52  ;;  %v6120_v1 = vpop.xlane.xlu1 %1149  ;;  %5419 = vrsqrt.f32 %v7669_v7 }
 0x232   :  { %v6105_v55 = vpop.eup %5409  ;;  %v7668_v11 = vmax.f32 %v6120_v1, 1e-12 }
 0x233   :  { %v6107_v56 = vpop.eup %5411  ;;  %v7670_v57 = vand.u32 2147483647, %v6103_v54  ;;  %v414_v58 = vand.u32 2139095040, %v6103_v54  ;;  %v386_v60 = vmul.f32 %v6105_v55, %v374_v43  ;;  %v1047_v8 = vmul.f32 %v6111_v59, %v6111_v59 }
 0x234   :  { %7737 = vst [vmem:[#allocation31_spill] sm:$0xff] %v6107_v56  ;;  %v6115_v61 = vmul.f32 %v6107_v56, %v375_v44  ;;  %5421 = vrsqrt.f32 %v7668_v11  ;;  %v7679_v43 = vmov 2475754826  }
 0x235   :  { %v415_v63 = vshrl.u32 %v414_v58, 23  ;;  %v418_v2 = vand.u32 8388607, %v7670_v57  ;;  %v6125_v3 = vmul.f32 %v6093_v49, %v386_v60  ;;  %v6138_v15 = vmul.f32 0.2, %v386_v60 }
 0x236   :  { %v6130_v6 = vmul.f32 %v6093_v49, %v6115_v61  ;;  %v6142_v17 = vpop.eup %5413  ;;  %v6160_v29 = vmul.f32 %v1047_v8, %v6111_v59  ;;  %v7683_v60 = vmov 920167782  }
 0x237   :  { %v4216_v5 = vadd.s32 4294967169, %v415_v63  ;;  %v7673_v9 = vand.u32 2147483647, %v6125_v3  ;;  %v518_v10 = vand.u32 2139095040, %v6125_v3  ;;  %7738 = vst [vmem:[#allocation32_spill] sm:$0xff] %v6142_v17  ;;  %v419_v19 = vor.u32 8388608, %v418_v2 }
 0x238   :  { %v622_v24 = vand.u32 2139095040, %v6130_v6  ;;  %v6164_v32 = vmul.f32 %v6138_v15, %v6138_v15  ;;  %v6167_v33 = vmul.f32 %v6142_v17, %v376_v48  ;;  %v7674_v37 = vand.u32 2147483647, %v6130_v6 }
 0x239   :  { %v421_v14 = vadd.s32 1, %v4216_v5  ;;  %v519_v20 = vshrl.u32 %v518_v10, 23  ;;  %v6146_v21 = vand.u32 8388607, %v7673_v9  ;;  %v6169_v34 = vshll.u32 %v419_v19, 8 }
 0x23a   :  { %v623_v38 = vshrl.u32 %v622_v24, 23  ;;  %v7675_v48 = vmov 2102212464   ;;  %v7691_v19 = vmov 1326507024  }
 0x23b   :  { %vm422_vm3 = vcmp.gt.s32.totalorder %v421_v14, 0  ;;  %v4220_v27 = vadd.s32 4294967169, %v519_v20  ;;  %v523_v35 = vor.u32 8388608, %v6146_v21  ;;  %v6184_v21 = vpop.eup %5415 }
 0x23c   :  { %v423_v26 = vsel %vm422_vm3, %v421_v14, 0  ;;  %7739 = vst [vmem:[#allocation33_spill] sm:$0xff] %v6184_v21 }
 0x23d   :  { %v424_v30 = vshrl.u32 %v423_v26, 5  ;;  %v425_v31 = vand.u32 31, %v423_v26  ;;  %v525_v45 = vadd.s32 1, %v4220_v27 }
 0x23f   :  { %v426_v40 = vsub.s32 32, %v425_v31  ;;  %v428_v42 = vshll.u32 %v7685_v41, %v425_v31  ;;  %v431_v44 = vshll.u32 %v7679_v43, %v425_v31  ;;  %v434_v52 = vshll.u32 %v7677_v47, %v425_v31 }
 0x240   :  { %v437_v58 = vshll.u32 %v7675_v48, %v425_v31  ;;  %v440_v63 = vshll.u32 %v7683_v60, %v425_v31  ;;  %vm443_vm4 = vcmp.lt.s32.totalorder %v424_v30, 1  ;;  %vm444_vm5 = vcmp.lt.s32.totalorder %v424_v30, 2  ;;  %v6186_v31 = vpop.eup %5417 }
 0x241   :  { %v429_v2 = vshrl.u32 %v7679_v43, %v426_v40  ;;  %v432_v5 = vshrl.u32 %v7677_v47, %v426_v40  ;;  %v435_v8 = vshrl.u32 %v7675_v48, %v426_v40  ;;  %v427_v10 = vshrl.u32 %v7685_v41, %v426_v40  ;;  %7740 = vst [vmem:[#allocation34_spill] sm:$0xff] %v6186_v31  ;;  %v6188_v7 = vpop.eup %5419 }
 0x242   :  { %v438_v14 = vshrl.u32 %v7683_v60, %v426_v40  ;;  %v441_v20 = vshrl.u32 %v7691_v19, %v426_v40  ;;  %vm445_vm6 = vcmp.lt.s32.totalorder %v424_v30, 3  ;;  %vm526_vm7 = vcmp.gt.s32.totalorder %v525_v45, 0  ;;  %7741 = vst [vmem:[#allocation35_spill] sm:$0xff] %v6188_v7  ;;  %v6193_v9 = vpop.eup %5421 }
 0x243   :  { %v430_v24 = vor.u32 %v429_v2, %v428_v42  ;;  %v433_v26 = vor.u32 %v432_v5, %v431_v44  ;;  %v436_v27 = vor.u32 %v435_v8, %v434_v52  ;;  %vm446_vm8 = vcmp.lt.s32.totalorder %v424_v30, 4  ;;  %7742 = vst [vmem:[#allocation36_spill] sm:$0xff] %v6193_v9 }
 0x244   :  { %v439_v36 = vor.u32 %v438_v14, %v437_v58  ;;  %v442_v46 = vor.u32 %v441_v20, %v440_v63  ;;  %v527_v11 = vsel %vm526_vm7, %v525_v45, 0  ;;  %v6201_v14 = vshll.u32 %v523_v35, 8 }
 0x245   :  { %v447_v57 = vsel %vm443_vm4, %v427_v10, %v430_v24  ;;  %v448_v4 = vsel %vm446_vm8, %v436_v27, 2102212464  ;;  %v451_v40 = vsel %vm443_vm4, %v430_v24, %v433_v26  ;;  %v455_v0 = vsel %vm443_vm4, %v433_v26, %v436_v27 }
 0x246   :  { %v449_v42 = vsel %vm445_vm6, %v433_v26, %v448_v4  ;;  %v452_v44 = vsel %vm446_vm8, %v439_v36, 920167782  ;;  %v456_v52 = vsel %vm446_vm8, %v442_v46, 1326507024  ;;  %v528_v2 = vshrl.u32 %v527_v11, 5 }
 0x247   :  { %v450_v58 = vsel %vm444_vm5, %v447_v57, %v449_v42  ;;  %v453_v45 = vsel %vm445_vm6, %v436_v27, %v452_v44  ;;  %v457_v63 = vsel %vm445_vm6, %v439_v36, %v456_v52  ;;  %v529_v5 = vand.u32 31, %v527_v11 }
 0x248   :  { %v454_v8 = vsel %vm444_vm5, %v451_v40, %v453_v45  ;;  %v458_v10 = vsel %vm444_vm5, %v455_v0, %v457_v63  ;;  %v6205_v20 = vand.u32 8388607, %v7674_v37  ;;  %v466_v36 = vmul.u32 %v6169_v34, %v450_v58 }
 0x249   :  { %v6208_v46 = vmul.u32.u64.low %v6169_v34, %v458_v10  ;;  %v6209_v4 = vmul.u32.u64.high %v6169_v34, %v458_v10, %v6208_v46  ;;  %v6212_v57 = vmul.u32.u64.low %v6169_v34, %v454_v8  ;;  %v6213_v24 = vmul.u32.u64.high %v6169_v34, %v454_v8, %v6212_v57 }
 0x24a   :  { %v530_v11 = vsub.s32 32, %v529_v5  ;;  %vm547_vm9 = vcmp.lt.s32.totalorder %v528_v2, 1  ;;  %v4224_v30 = vadd.s32 4294967169, %v623_v38  ;;  %v532_v0 = vshll.u32 %v7685_v41, %v529_v5 }
 0x24b   :  { %v535_v35 = vshll.u32 %v7679_v43, %v529_v5  ;;  %v538_v26 = vshll.u32 %v7677_v47, %v529_v5  ;;  %v541_v27 = vshll.u32 %v7675_v48, %v529_v5  ;;  %v544_v52 = vshll.u32 %v7683_v60, %v529_v5 }
 0x24c   :  { %v533_v40 = vshrl.u32 %v7679_v43, %v530_v11  ;;  %v536_v42 = vshrl.u32 %v7677_v47, %v530_v11  ;;  %v539_v44 = vshrl.u32 %v7675_v48, %v530_v11  ;;  %vm468_vm10 = vc.u32 %v6209_v4, %v6212_v57 }
 0x24d   :  { %v469_v34 = vadd.s32 1, %v6213_v24  ;;  %v542_v38 = vshrl.u32 %v7683_v60, %v530_v11  ;;  %vm548_vm11 = vcmp.lt.s32.totalorder %v528_v2, 2  ;;  %v545_v8 = vshrl.u32 %v7691_v19, %v530_v11 }
 0x24e   :  { %v534_v58 = vor.u32 %v533_v40, %v532_v0  ;;  %v537_v45 = vor.u32 %v536_v42, %v535_v35  ;;  %v540_v63 = vor.u32 %v539_v44, %v538_v26  ;;  %vm550_vm12 = vcmp.lt.s32.totalorder %v528_v2, 4 }
 0x24f   :  { %v470_v10 = vsel %vm468_vm10, %v469_v34, %v6213_v24  ;;  %v543_v46 = vor.u32 %v542_v38, %v541_v27  ;;  %v629_v37 = vadd.s32 1, %v4224_v30  ;;  %v531_v5 = vshrl.u32 %v7685_v41, %v530_v11 }
 0x250   :  { %v471_v48 = vadd.s32 %v470_v10, %v466_v36  ;;  %v546_v47 = vor.u32 %v545_v8, %v544_v52  ;;  %v552_v43 = vsel %vm550_vm12, %v540_v63, 2102212464  ;;  %vm549_vm13 = vcmp.lt.s32.totalorder %v528_v2, 3 }
 0x251   :  { %v555_v39 = vsel %vm547_vm9, %v534_v58, %v537_v45  ;;  %v556_v60 = vsel %vm550_vm12, %v543_v46, 920167782  ;;  %v559_v0 = vsel %vm547_vm9, %v537_v45, %v540_v63  ;;  %v551_v26 = vsel %vm547_vm9, %v531_v5, %v534_v58 }
 0x252   :  { %v472_v35 = vadd.s32 536870912, %v471_v48  ;;  %v557_v40 = vsel %vm549_vm13, %v540_v63, %v556_v60  ;;  %v560_v42 = vsel %vm550_vm12, %v546_v47, 1326507024  ;;  %v553_v24 = vsel %vm549_vm13, %v537_v45, %v552_v43 }
 0x253   :  { %v558_v27 = vsel %vm548_vm11, %v555_v39, %v557_v40  ;;  %v561_v30 = vsel %vm549_vm13, %v543_v46, %v560_v42  ;;  %vm630_vm14 = vcmp.gt.s32.totalorder %v629_v37, 0  ;;  %v6247_v47 = vmul.f32 0.2, %v6115_v61 }
 0x254   :  { %v6234_v36 = vshrl.u32 %v472_v35, 30  ;;  %v562_v11 = vsel %vm548_vm11, %v559_v0, %v561_v30  ;;  %v6238_v44 = vmul.u32.u64.low %v6201_v14, %v558_v27  ;;  %v6239_v52 = vmul.u32.u64.high %v6201_v14, %v558_v27, %v6238_v44 }
 0x255   :  { %v6243_v34 = vmul.u32.u64.low %v6201_v14, %v562_v11  ;;  %v6244_v38 = vmul.u32.u64.high %v6201_v14, %v562_v11, %v6243_v34  ;;  %v631_v43 = vsel %vm630_vm14, %v629_v37, 0  ;;  %v554_v60 = vsel %vm548_vm11, %v551_v26, %v553_v24 }
 0x256   :  { %v474_v39 = vshll.u32 %v6234_v36, 30  ;;  %v633_v58 = vand.u32 31, %v631_v43  ;;  %v6253_v45 = vmul.f32 %v6160_v29, %v6160_v29  ;;  %v6257_v63 = vmul.f32 %v6164_v32, %v6138_v15 }
 0x257   :  { %v627_v8 = vor.u32 8388608, %v6205_v20  ;;  %v6261_v10 = vmul.f32 0.2, %v6167_v33  ;;  %v6265_v61 = vmul.f32 %v6093_v49, %v6167_v33  ;;  %v467_v37 = vadd.s32 %v6212_v57, %v6209_v4 }
 0x258   :  { %v6268_v2 = vsub.s32 %v471_v48, %v474_v39  ;;  %v573_v29 = vadd.s32 1, %v6239_v52  ;;  %v634_v46 = vsub.s32 32, %v633_v58  ;;  %v570_v5 = vmul.u32 %v6201_v14, %v554_v60 }
 0x259   :  { %7743 = vst [vmem:[#allocation37_spill] sm:$0xff] %v6261_v10  ;;  %vm572_vm15 = vc.u32 %v6244_v38, %v6238_v44  ;;  %v6274_v32 = vshrl.u32 %v631_v43, 5  ;;  %v636_v20 = vshll.u32 %v7685_v41, %v633_v58  ;;  %v7744_v35 = vmov 2475754826  }
 0x25a   :  { %v477_v0 = vsub.s32 0, %v6268_v2  ;;  %v574_v33 = vsel %vm572_vm15, %v573_v29, %v6239_v52  ;;  %v637_v4 = vshrl.u32 %v7744_v35, %v634_v46  ;;  %v639_v48 = vshll.u32 %v7744_v35, %v633_v58 }
 0x25b   :  { %v575_v57 = vadd.s32 %v574_v33, %v570_v5  ;;  %v7745_v26 = vmov 2131351028   ;;  %v7746_v42 = vmov 2102212464   ;;  %v7747_v34 = vmov 920167782  }
 0x25c   :  { %v640_v40 = vshrl.u32 %v7745_v26, %v634_v46  ;;  %v642_v14 = vshll.u32 %v7745_v26, %v633_v58  ;;  %v643_v24 = vshrl.u32 %v7746_v42, %v634_v46  ;;  %v4217_v27 = vmin.u32 %v477_v0, %v6268_v2 }
 0x25d   :  { %v638_v30 = vor.u32 %v637_v4, %v636_v20  ;;  %v645_v11 = vshll.u32 %v7746_v42, %v633_v58  ;;  %v646_v43 = vshrl.u32 %v7747_v34, %v634_v46  ;;  %v576_v39 = vadd.s32 536870912, %v575_v57 }
 0x25e   :  { %v641_v52 = vor.u32 %v640_v40, %v639_v48  ;;  %v644_v60 = vor.u32 %v643_v24, %v642_v14  ;;  %v649_v29 = vshrl.u32 %v7691_v19, %v634_v46  ;;  %v479_v41 = vclz %v4217_v27 }
 0x25f   :  { %v647_v5 = vor.u32 %v646_v43, %v645_v11  ;;  %v648_v33 = vshll.u32 %v7747_v34, %v633_v58  ;;  %v6289_v22 = vshll.u32 %v627_v8, 8  ;;  %v577_v25 = vshrl.u32 %v576_v39, 30 }
 0x260   :  { %v635_v18 = vshrl.u32 %v7748_v16, %v634_v46  ;;  %vm651_vm3 = vcmp.lt.s32.totalorder %v6274_v32, 1  ;;  %v4218_v0 = vadd.s32 4294967294, %v479_v41  ;;  %vm654_vm4 = vcmp.lt.s32.totalorder %v6274_v32, 4 }
 0x261   :  { %v650_v4 = vor.u32 %v649_v29, %v648_v33  ;;  %v659_v48 = vsel %vm651_vm3, %v638_v30, %v641_v52  ;;  %v578_v40 = vshll.u32 %v577_v25, 30  ;;  %vm653_vm5 = vcmp.lt.s32.totalorder %v6274_v32, 3 }
 0x262   :  { %v656_v58 = vsel %vm654_vm4, %v644_v60, 2102212464  ;;  %v660_v8 = vsel %vm654_vm4, %v647_v5, 920167782  ;;  %vm4219_vm6 = vcmp.lt.s32.totalorder %v4218_v0, 0  ;;  %vm652_vm7 = vcmp.lt.s32.totalorder %v6274_v32, 2 }
 0x263   :  { %v661_v41 = vsel %vm653_vm5, %v644_v60, %v660_v8  ;;  %v726_v46 = vand.u32 2139095040, %v6265_v61  ;;  %v482_v14 = vsel %vm4219_vm6, 0, %v4218_v0  ;;  %vm517_vm8 = vcmp.lt.s32.totalorder %v6125_v3, 0 }
 0x264   :  { %v6307_v24 = vsub.s32 %v575_v57, %v578_v40  ;;  %v655_v27 = vsel %vm651_vm3, %v635_v18, %v638_v30  ;;  %v662_v11 = vsel %vm652_vm7, %v659_v48, %v661_v41  ;;  %v483_v43 = vsub.s32 32, %v482_v14 }
 0x265   :  { %v487_v39 = vsub.s32 4294967266, %v482_v14  ;;  %v657_v29 = vsel %vm653_vm5, %v641_v52, %v656_v58  ;;  %v663_v33 = vsel %vm651_vm3, %v641_v52, %v644_v60  ;;  %v664_v57 = vsel %vm654_vm4, %v650_v4, 1326507024 }
 0x266   :  { %v581_v0 = vsub.s32 0, %v6307_v24  ;;  %v6321_v40 = vmul.u32.u64.low %v6289_v22, %v662_v11  ;;  %v6322_v8 = vmul.u32.u64.high %v6289_v22, %v662_v11, %v6321_v40  ;;  %v485_v18 = vshrl.u32 %v467_v37, %v483_v43 }
 0x267   :  { %v488_v30 = vadd.s32 127, %v487_v39  ;;  %v601_v48 = vsub.s32 4, %v577_v25  ;;  %v665_v41 = vsel %vm653_vm5, %v647_v5, %v664_v57  ;;  %v484_v58 = vshll.u32 %v6268_v2, %v482_v14 }
 0x268   :  { %v7749_v52 = vand.u32 2147483647, %v6125_v3  ;;  %v4221_v4 = vmin.u32 %v581_v0, %v6307_v24  ;;  %v666_v11 = vsel %vm652_vm7, %v663_v33, %v665_v41  ;;  %v727_v19 = vshrl.u32 %v726_v46, 23 }
 0x269   :  { %v489_v37 = vshll.u32 %v488_v30, 23  ;;  %v658_v43 = vsel %vm652_vm7, %v655_v27, %v657_v29  ;;  %v6340_v5 = vmul.u32.u64.low %v6289_v22, %v666_v11  ;;  %v6341_v39 = vmul.u32.u64.high %v6289_v22, %v666_v11, %v6340_v5 }
 0x26a   :  { %vm6330_vm9 = vcmp.le.f32.partialorder %v7749_v52, 0.7853982  ;;  %v486_v2 = vor.u32 %v485_v18, %v484_v58  ;;  %v583_v14 = vclz %v4221_v4  ;;  %v677_v57 = vadd.s32 1, %v6322_v8 }
 0x26b   :  { %v4228_v52 = vadd.s32 4294967169, %v727_v19  ;;  %v490_v20 = vor.u32 4788187, %v489_v37  ;;  %v6346_v0 = vmul.f32 %v6247_v47, %v6247_v47  ;;  %v6350_v46 = vmul.f32 %v6261_v10, %v6261_v10 }
 0x26c   :  { %v7754_v32 = vmax.f32 %v6097_v51, 1e-12  ;;  %v571_v29 = vadd.s32 %v6238_v44, %v6244_v38  ;;  %v4222_v33 = vadd.s32 4294967294, %v583_v14  ;;  %v7755_v18 = vand.u32 2147483647, %v6265_v61 }
 0x26d   :  { %7752 = vst [vmem:[#allocation38_spill] sm:$0xff] %v6346_v0  ;;  %7753 = vst [vmem:[#allocation39_spill] sm:$0xff] %v6350_v46  ;;  %v733_v30 = vadd.s32 1, %v4228_v52  ;;  %v491_v41 = vand.u32 2147483647, %v490_v20  ;;  %v6361_v58 = vsel %vm517_vm8, %v601_v48, %v577_v25  ;;  %v674_v4 = vmul.u32 %v6289_v22, %v658_v43 }
 0x26e   :  { %v389_v27 = vmul.f32 %v6184_v21, %v7754_v32  ;;  %v730_v19 = vand.u32 8388607, %v7755_v18  ;;  %vm676_vm10 = vc.u32 %v6341_v39, %v6321_v40  ;;  %v493_v51 = vcvt.s32.f32 %v486_v2 }
 0x26f   :  { %vm4223_vm11 = vcmp.lt.s32.totalorder %v4222_v33, 0  ;;  %v678_v11 = vsel %vm676_vm10, %v677_v57, %v6322_v8  ;;  %vm734_vm12 = vcmp.gt.s32.totalorder %v733_v30, 0  ;;  %vm413_vm13 = vcmp.lt.s32.totalorder %v6103_v54, 0 }
 0x270   :  { %v586_v44 = vsel %vm4223_vm11, 0, %v4222_v33  ;;  %v679_v38 = vadd.s32 %v678_v11, %v674_v4  ;;  %v735_v37 = vsel %vm734_vm12, %v733_v30, 0  ;;  %v6368_v5 = vmul.f32 %v6093_v49, %v389_v27 }
 0x271   :  { %v494_v20 = vmul.f32 %v493_v51, %v491_v41  ;;  %v587_v14 = vsub.s32 32, %v586_v44  ;;  %v591_v25 = vsub.s32 4294967266, %v586_v44  ;;  %v731_v48 = vor.u32 8388608, %v730_v19 }
 0x272   :  { %v680_v43 = vadd.s32 536870912, %v679_v38  ;;  %v6374_v2 = vshrl.u32 %v735_v37, 5  ;;  %v737_v8 = vand.u32 31, %v735_v37  ;;  %v588_v57 = vshll.u32 %v6307_v24, %v586_v44 }
 0x273   :  { %v589_v52 = vshrl.u32 %v571_v29, %v587_v14  ;;  %v592_v32 = vadd.s32 127, %v591_v25  ;;  %v6377_v33 = vmul.f32 0.2, %v389_v27  ;;  %v7757_v41 = vmax.f32 %v6100_v53, 1e-12 }
 0x274   :  { %v6379_v18 = vshrl.u32 %v680_v43, 30  ;;  %v738_v30 = vsub.s32 32, %v737_v8  ;;  %v495_v51 = vxor.u32 2147483648, %v494_v20  ;;  %v6387_v37 = vshll.u32 %v731_v48, 8 }
 0x275   :  { %7756 = vst [vmem:[#allocation40_spill] sm:$0xff] %v6377_v33  ;;  %v6385_v4 = vmul.f32 %v6186_v31, %v7757_v41  ;;  %v590_v11 = vor.u32 %v589_v52, %v588_v57  ;;  %v593_v22 = vshll.u32 %v592_v32, 23  ;;  %v740_v27 = vshll.u32 %v7748_v16, %v737_v8 }
 0x276   :  { %v682_v24 = vshll.u32 %v6379_v18, 30  ;;  %v741_v29 = vshrl.u32 %v7744_v35, %v738_v30  ;;  %vm755_vm14 = vcmp.lt.s32.totalorder %v6374_v2, 1  ;;  %v7758_v44 = vand.u32 2147483647, %v6103_v54 }
 0x277   :  { %v594_v14 = vor.u32 4788187, %v593_v22  ;;  %v597_v25 = vcvt.s32.f32 %v590_v11  ;;  %v743_v43 = vshll.u32 %v7744_v35, %v737_v8  ;;  %v744_v48 = vshrl.u32 %v7745_v26, %v738_v30 }
 0x278   :  { %vm6395_vm15 = vcmp.le.f32.partialorder %v7758_v44, 0.7853982  ;;  %v6401_v57 = vsub.s32 %v679_v38, %v682_v24  ;;  %v742_v52 = vor.u32 %v741_v29, %v740_v27  ;;  %v746_v32 = vshll.u32 %v7745_v26, %v737_v8 }
 0x279   :  { %v747_v41 = vshrl.u32 %v7746_v42, %v738_v30  ;;  %v595_v19 = vand.u32 2147483647, %v594_v14  ;;  %v745_v12 = vor.u32 %v744_v48, %v743_v43  ;;  %v749_v44 = vshll.u32 %v7746_v42, %v737_v8 }
 0x27a   :  { %v750_v13 = vshrl.u32 %v7747_v34, %v738_v30  ;;  %v685_v22 = vsub.s32 0, %v6401_v57  ;;  %v752_v31 = vshll.u32 %v7747_v34, %v737_v8  ;;  %v7761_v21 = vmov 1326507024  }
 0x27b   :  { %v748_v11 = vor.u32 %v747_v41, %v746_v32  ;;  %v753_v17 = vshrl.u32 %v7761_v21, %v738_v30  ;;  %v496_v38 = vsel %vm413_vm13, %v495_v51, %v494_v20  ;;  %v598_v24 = vmul.f32 %v597_v25, %v595_v19 }
 0x27c   :  { %v751_v27 = vor.u32 %v750_v13, %v749_v44  ;;  %vm758_vm3 = vcmp.lt.s32.totalorder %v6374_v2, 4  ;;  %v4225_v29 = vmin.u32 %v685_v22, %v6401_v57  ;;  %v739_v14 = vshrl.u32 %v7748_v16, %v738_v30 }
 0x27d   :  { %v754_v43 = vor.u32 %v753_v17, %v752_v31  ;;  %v760_v48 = vsel %vm758_vm3, %v748_v11, 2102212464  ;;  %v599_v32 = vxor.u32 2147483648, %v598_v24  ;;  %vm757_vm4 = vcmp.lt.s32.totalorder %v6374_v2, 3 }
 0x27e   :  { %v763_v8 = vsel %vm755_vm14, %v742_v52, %v745_v12  ;;  %v764_v20 = vsel %vm758_vm3, %v751_v27, 920167782  ;;  %v687_v13 = vclz %v4225_v29  ;;  %vm756_vm5 = vcmp.lt.s32.totalorder %v6374_v2, 2 }
 0x27f   :  { %v765_v19 = vsel %vm757_vm4, %v748_v11, %v764_v20  ;;  %v767_v30 = vsel %vm755_vm14, %v745_v12, %v748_v11  ;;  %v759_v17 = vsel %vm755_vm14, %v739_v14, %v742_v52  ;;  %v761_v31 = vsel %vm757_vm4, %v745_v12, %v760_v48 }
 0x280   :  { %v766_v51 = vsel %vm756_vm5, %v763_v8, %v765_v19  ;;  %v768_v25 = vsel %vm758_vm3, %v754_v43, 1326507024  ;;  %v499_v41 = vsel %vm6395_vm15, %v6103_v54, %v496_v38  ;;  %v600_v44 = vsel %vm517_vm8, %v599_v32, %v598_v24 }
 0x281   :  { %v4226_v22 = vadd.s32 4294967294, %v687_v13  ;;  %v769_v29 = vsel %vm757_vm4, %v751_v27, %v768_v25  ;;  %v675_v11 = vadd.s32 %v6321_v40, %v6341_v39  ;;  %v762_v2 = vsel %vm756_vm5, %v759_v17, %v761_v31 }
 0x282   :  { %v770_v20 = vsel %vm756_vm5, %v767_v30, %v769_v29  ;;  %v6437_v52 = vmul.u32.u64.low %v6387_v37, %v766_v51  ;;  %v6438_v12 = vmul.u32.u64.high %v6387_v37, %v766_v51, %v6437_v52  ;;  %5423 = vcosq.f32 %v499_v41 }
 0x283   :  { %vm4227_vm6 = vcmp.lt.s32.totalorder %v4226_v22, 0  ;;  %v6441_v14 = vmul.u32.u64.low %v6387_v37, %v770_v20  ;;  %v6442_v43 = vmul.u32.u64.high %v6387_v37, %v770_v20, %v6441_v14  ;;  %v603_v38 = vsel %vm6330_vm9, %v6125_v3, %v600_v44 }
 0x284   :  { %v690_v24 = vsel %vm4227_vm6, 0, %v4226_v22  ;;  %v830_v27 = vand.u32 2139095040, %v6368_v5  ;;  %5425 = vsinq.f32 %v499_v41  ;;  %v7762_v48 = vand.u32 2147483647, %v6368_v5 }
 0x285   :  { %v691_v40 = vsub.s32 32, %v690_v24  ;;  %v695_v39 = vsub.s32 4294967266, %v690_v24  ;;  %v778_v8 = vmul.u32 %v6387_v37, %v762_v2  ;;  %v781_v13 = vadd.s32 1, %v6438_v12 }
 0x286   :  { %v834_v32 = vand.u32 8388607, %v7762_v48  ;;  %v831_v19 = vshrl.u32 %v830_v27, 23  ;;  %v6454_v30 = vmul.f32 %v6093_v49, %v6385_v4  ;;  %5427 = vcosq.f32 %v603_v38 }
 0x287   :  { %v693_v17 = vshrl.u32 %v675_v11, %v691_v40  ;;  %v696_v31 = vadd.s32 127, %v695_v39  ;;  %vm780_vm7 = vc.u32 %v6442_v43, %v6437_v52  ;;  %v692_v51 = vshll.u32 %v6401_v57, %v690_v24 }
 0x288   :  { %7763 = vst [vmem:[#allocation41_spill] sm:$0xff] %v6454_v30  ;;  %v782_v25 = vsel %vm780_vm7, %v781_v13, %v6438_v12  ;;  %v4232_v41 = vadd.s32 4294967169, %v831_v19  ;;  %v7701_v44 = vand.u32 2147483647, %v6454_v30  ;;  %v835_v29 = vor.u32 8388608, %v834_v32 }
 0x289   :  { %v697_v37 = vshll.u32 %v696_v31, 23  ;;  %v783_v22 = vadd.s32 %v782_v25, %v778_v8  ;;  %v6461_v20 = vmul.f32 0.2, %v6385_v4  ;;  %v694_v49 = vor.u32 %v693_v17, %v692_v51  ;;  %v6483_v13 = vld [vmem:[%s7643_s8] ss:$0 sm:$0xff] }
 0x28a   :  { %v837_v2 = vadd.s32 1, %v4232_v41  ;;  %v934_v11 = vand.u32 2139095040, %v6454_v30  ;;  %v938_v14 = vand.u32 8388607, %v7701_v44  ;;  %5429 = vsinq.f32 %v603_v38 }
 0x28b   :  { %7764 = vst [vmem:[#allocation42_spill] sm:$0xff] %v6461_v20  ;;  %v698_v57 = vor.u32 4788187, %v697_v37  ;;  %v784_v24 = vadd.s32 536870912, %v783_v22  ;;  %v6468_v12 = vmul.f32 %v6377_v33, %v6377_v33  ;;  %v7766_v4 = vmax.f32 %v6117_v62, 1e-12 }
 0x28c   :  { %vm838_vm8 = vcmp.gt.s32.totalorder %v837_v2, 0  ;;  %v935_v27 = vshrl.u32 %v934_v11, 23  ;;  %v939_v40 = vor.u32 8388608, %v938_v14  ;;  %v6476_v32 = vadd.s32 %v6437_v52, %v6442_v43  ;;  %v6485_v19 = vpop.eup %5423 }
 0x28d   :  { %7765 = vst [vmem:[#allocation43_spill] sm:$0xff] %v6468_v12  ;;  %v6473_v39 = vmul.f32 %v6188_v7, %v7766_v4  ;;  %v699_v48 = vand.u32 2147483647, %v698_v57  ;;  %v6478_v8 = vshrl.u32 %v784_v24, 30  ;;  %v839_v38 = vsel %vm838_vm8, %v837_v2, 0 }
 0x28e   :  { %v701_v17 = vcvt.s32.f32 %v694_v49  ;;  %v841_v31 = vand.u32 31, %v839_v38  ;;  %v6487_v62 = vshll.u32 %v835_v29, 8  ;;  %v6491_v51 = vmul.f32 %v6461_v20, %v6461_v20  ;;  %v6493_v52 = vpop.eup %5425 }
 0x28f   :  { %7767 = vst [vmem:[#allocation44_spill] sm:$0xff] %v6478_v8  ;;  %v786_v43 = vshll.u32 %v6478_v8, 30  ;;  %v840_v25 = vshrl.u32 %v839_v38, 5  ;;  %v4236_v41 = vadd.s32 4294967169, %v935_v27  ;;  %v7769_v37 = vmax.f32 %v6120_v1, 1e-12 }
 0x290   :  { %7768 = vst [vmem:[#allocation45_spill] sm:$0xff] %v6491_v51  ;;  %v702_v11 = vmul.f32 %v701_v17, %v699_v48  ;;  %v842_v49 = vsub.s32 32, %v841_v31  ;;  %v6501_v14 = vshll.u32 %v939_v40, 8  ;;  %v6505_v57 = vpop.eup %5427  ;;  %vm621_vm10 = vcmp.lt.s32.totalorder %v6130_v6, 0 }
 0x291   :  { %v6499_v2 = vmul.f32 %v6193_v9, %v7769_v37  ;;  %v6508_v24 = vsub.s32 %v783_v22, %v786_v43  ;;  %v844_v27 = vshll.u32 %v7748_v16, %v841_v31  ;;  %v847_v1 = vshll.u32 %v7744_v35, %v841_v31 }
 0x292   :  { %v850_v4 = vshll.u32 %v7745_v26, %v841_v31  ;;  %v845_v48 = vshrl.u32 %v7744_v35, %v842_v49  ;;  %v848_v40 = vshrl.u32 %v7745_v26, %v842_v49  ;;  %v851_v38 = vshrl.u32 %v7746_v42, %v842_v49 }
 0x293   :  { %v853_v17 = vshll.u32 %v7746_v42, %v841_v31  ;;  %v789_v37 = vsub.s32 0, %v6508_v24  ;;  %v854_v44 = vshrl.u32 %v7747_v34, %v842_v49  ;;  %v856_v22 = vshll.u32 %v7747_v34, %v841_v31 }
 0x294   :  { %v857_v43 = vshrl.u32 %v7761_v21, %v842_v49  ;;  %v7770_v29 = vand.u32 2147483647, %v6130_v6  ;;  %v846_v7 = vor.u32 %v845_v48, %v844_v27  ;;  %v849_v51 = vor.u32 %v848_v40, %v847_v1  ;;  %v6529_v33 = vpop.eup %5429 }
 0x295   :  { %v852_v20 = vor.u32 %v851_v38, %v850_v4  ;;  %v4229_v56 = vmin.u32 %v789_v37, %v6508_v24  ;;  %v843_v31 = vshrl.u32 %v7748_v16, %v842_v49  ;;  %v855_v46 = vor.u32 %v854_v44, %v853_v17 }
 0x296   :  { %vm6523_vm11 = vcmp.le.f32.partialorder %v7770_v29, 0.7853982  ;;  %v858_v10 = vor.u32 %v857_v43, %v856_v22  ;;  %v703_v30 = vxor.u32 2147483648, %v702_v11  ;;  %vm859_vm12 = vcmp.lt.s32.totalorder %v840_v25, 1 }
 0x297   :  { %vm860_vm14 = vcmp.lt.s32.totalorder %v840_v25, 2  ;;  %vm861_vm3 = vcmp.lt.s32.totalorder %v840_v25, 3  ;;  %v791_v29 = vclz %v4229_v56  ;;  %vm862_vm4 = vcmp.lt.s32.totalorder %v840_v25, 4 }
 0x298   :  { %v863_v27 = vsel %vm859_vm12, %v843_v31, %v846_v7  ;;  %v867_v1 = vsel %vm859_vm12, %v846_v7, %v849_v51  ;;  %v864_v4 = vsel %vm862_vm4, %v852_v20, 2102212464  ;;  %v868_v48 = vsel %vm862_vm4, %v855_v46, 920167782 }
 0x299   :  { %v871_v40 = vsel %vm859_vm12, %v849_v51, %v852_v20  ;;  %v872_v38 = vsel %vm862_vm4, %v858_v10, 1326507024  ;;  %v4230_v12 = vadd.s32 4294967294, %v791_v29  ;;  %v865_v8 = vsel %vm861_vm3, %v849_v51, %v864_v4 }
 0x29a   :  { %v869_v0 = vsel %vm861_vm3, %v852_v20, %v868_v48  ;;  %v873_v37 = vsel %vm861_vm3, %v855_v46, %v872_v38  ;;  %v704_v44 = vsel %vm621_vm10, %v703_v30, %v702_v11  ;;  %v941_v22 = vadd.s32 1, %v4236_v41 }
 0x29b   :  { %v870_v49 = vsel %vm860_vm14, %v867_v1, %v869_v0  ;;  %v874_v17 = vsel %vm860_vm14, %v871_v40, %v873_v37  ;;  %vm4231_vm5 = vcmp.lt.s32.totalorder %v4230_v12, 0  ;;  %v866_v56 = vsel %vm860_vm14, %v863_v27, %v865_v8 }
 0x29c   :  { %v6539_v7 = vmul.u32.u64.low %v6487_v62, %v874_v17  ;;  %v6540_v43 = vmul.u32.u64.high %v6487_v62, %v874_v17, %v6539_v7  ;;  %v794_v10 = vsel %vm4231_vm5, 0, %v4230_v12  ;;  %vm942_vm6 = vcmp.gt.s32.totalorder %v941_v22, 0 }
 0x29d   :  { %v6543_v51 = vmul.u32.u64.low %v6487_v62, %v870_v49  ;;  %v6544_v20 = vmul.u32.u64.high %v6487_v62, %v870_v49, %v6543_v51  ;;  %v6550_v0 = vsel %vm6523_vm11, %v6130_v6, %v704_v44  ;;  %v795_v46 = vsub.s32 32, %v794_v10 }
 0x29e   :  { %v799_v30 = vsub.s32 4294967266, %v794_v10  ;;  %v943_v25 = vsel %vm942_vm6, %v941_v22, 0  ;;  %v796_v8 = vshll.u32 %v6508_v24, %v794_v10  ;;  %v882_v41 = vmul.u32 %v6487_v62, %v866_v56 }
 0x29f   :  { %v944_v11 = vshrl.u32 %v943_v25, 5  ;;  %v945_v12 = vand.u32 31, %v943_v25  ;;  %v797_v31 = vshrl.u32 %v6476_v32, %v795_v46  ;;  %vm884_vm7 = vc.u32 %v6540_v43, %v6543_v51 }
 0x2a0   :  { %v800_v29 = vadd.s32 127, %v799_v30  ;;  %v7773_v27 = vsub.f32 %v6473_v39, %v6483_v13  ;;  %v885_v4 = vadd.s32 1, %v6544_v20  ;;  %vm725_vm8 = vcmp.lt.s32.totalorder %v6265_v61, 0 }
 0x2a1   :  { %v946_v48 = vsub.s32 32, %v945_v12  ;;  %v948_v24 = vshll.u32 %v7748_v16, %v945_v12  ;;  %v951_v62 = vshll.u32 %v7744_v35, %v945_v12  ;;  %v798_v40 = vor.u32 %v797_v31, %v796_v8 }
 0x2a2   :  { %v6560_v1 = vmul.f32 80.0, %v7773_v27  ;;  %v801_v38 = vshll.u32 %v800_v29, 23  ;;  %v954_v32 = vshll.u32 %v7745_v26, %v945_v12  ;;  %v957_v37 = vshll.u32 %v7746_v42, %v945_v12 }
 0x2a3   :  { %v886_v44 = vsel %vm884_vm7, %v885_v4, %v6544_v20  ;;  %v947_v49 = vshrl.u32 %v7748_v16, %v946_v48  ;;  %v949_v39 = vshrl.u32 %v7744_v35, %v946_v48  ;;  %v952_v17 = vshrl.u32 %v7745_v26, %v946_v48 }
 0x2a4   :  { %v802_v22 = vor.u32 4788187, %v801_v38  ;;  %v805_v56 = vcvt.s32.f32 %v798_v40  ;;  %v887_v7 = vadd.s32 %v886_v44, %v882_v41  ;;  %v955_v10 = vshrl.u32 %v7746_v42, %v946_v48 }
 0x2a5   :  { %v950_v46 = vor.u32 %v949_v39, %v948_v24  ;;  %v953_v30 = vor.u32 %v952_v17, %v951_v62  ;;  %v958_v25 = vshrl.u32 %v7747_v34, %v946_v48  ;;  %v960_v8 = vshll.u32 %v7747_v34, %v945_v12 }
 0x2a6   :  { %v803_v20 = vand.u32 2147483647, %v802_v22  ;;  %v888_v31 = vadd.s32 536870912, %v887_v7  ;;  %v956_v16 = vor.u32 %v955_v10, %v954_v32  ;;  %v961_v35 = vshrl.u32 %v7761_v21, %v946_v48  ;;  %v1285_v10 = vld [vmem:[#allocation8] sm:$0xff] }
 0x2a7   :  { %v7774_v26 = vand.u32 2147483647, %v6265_v61  ;;  %v959_v41 = vor.u32 %v958_v25, %v957_v37  ;;  %vm963_vm14 = vcmp.lt.s32.totalorder %v944_v11, 1  ;;  %vm964_vm3 = vcmp.lt.s32.totalorder %v944_v11, 2 }
 0x2a8   :  { %vm965_vm4 = vcmp.lt.s32.totalorder %v944_v11, 3  ;;  %v806_v42 = vmul.f32 %v805_v56, %v803_v20  ;;  %v6582_v27 = vshrl.u32 %v888_v31, 30  ;;  %v962_v4 = vor.u32 %v961_v35, %v960_v8 }
 0x2a9   :  { %vm6578_vm12 = vcmp.le.f32.partialorder %v7774_v26, 0.7853982  ;;  %vm966_vm5 = vcmp.lt.s32.totalorder %v944_v11, 4  ;;  %v967_v34 = vsel %vm963_vm14, %v947_v49, %v950_v46  ;;  %v971_v21 = vsel %vm963_vm14, %v950_v46, %v953_v30  ;;  %v1286_v46 = vld [vmem:[#allocation8 + $0x8] sm:$0xff] }
 0x2aa   :  { %v968_v12 = vsel %vm966_vm5, %v956_v16, 2102212464  ;;  %v972_v48 = vsel %vm966_vm5, %v959_v41, 920167782  ;;  %v807_v24 = vxor.u32 2147483648, %v806_v42  ;;  %v890_v62 = vshll.u32 %v6582_v27, 30 }
 0x2ab   :  { %v969_v40 = vsel %vm965_vm4, %v953_v30, %v968_v12  ;;  %v973_v38 = vsel %vm965_vm4, %v956_v16, %v972_v48  ;;  %v975_v37 = vsel %vm963_vm14, %v953_v30, %v956_v16  ;;  %v976_v44 = vsel %vm966_vm5, %v962_v4, 1326507024 }
 0x2ac   :  { %v974_v32 = vsel %vm964_vm3, %v971_v21, %v973_v38  ;;  %v7777_v39 = vsub.f32 %v6499_v2, %v6483_v13  ;;  %5431 = vcosq.f32 %v6550_v0  ;;  %v6595_v17 = vsub.s32 %v887_v7, %v890_v62 }
 0x2ad   :  { %v970_v22 = vsel %vm964_vm3, %v967_v34, %v969_v40  ;;  %v977_v56 = vsel %vm965_vm4, %v959_v41, %v976_v44  ;;  %v808_v25 = vsel %vm725_vm8, %v807_v24, %v806_v42  ;;  %5433 = vsinq.f32 %v6550_v0 }
 0x2ae   :  { %v1167_v49 = vmul.f32 80.0, %v7777_v39  ;;  %v978_v30 = vsel %vm964_vm3, %v975_v37, %v977_v56  ;;  %v6603_v8 = vmul.u32.u64.low %v6501_v14, %v974_v32  ;;  %v6604_v20 = vmul.u32.u64.high %v6501_v14, %v974_v32, %v6603_v8 }
 0x2af   :  { %v893_v13 = vsub.s32 0, %v6595_v17  ;;  %v6610_v2 = vmul.u32.u64.low %v6501_v14, %v978_v30  ;;  %v6611_v7 = vmul.u32.u64.high %v6501_v14, %v978_v30, %v6610_v2  ;;  %v883_v31 = vadd.s32 %v6543_v51, %v6540_v43 }
 0x2b0   :  { %v1168_v16 = vmul.f32 -0.5, %v6560_v1  ;;  %v1169_v11 = vmul.f32 -0.5, %v1167_v49  ;;  %v5044_v35 = vpack.c.bf16 %v1286_v46, %v1285_v10  ;;  %v6619_v26 = vsel %vm6578_vm12, %v6265_v61, %v808_v25 }
 0x2b1   :  { %v4233_v0 = vmin.u32 %v893_v13, %v6595_v17  ;;  %v986_v41 = vmul.u32 %v6501_v14, %v970_v22  ;;  %v497_v42 = vsub.s32 4, %v6234_v36  ;;  %v989_v4 = vadd.s32 1, %v6604_v20 }
 0x2b2   :  { %v1170_v34 = vmul.f32 %v1168_v16, %v6560_v1  ;;  %v1171_v43 = vmul.f32 %v1169_v11, %v1167_v49  ;;  %5045 = vmatprep.subr.bf16.mxu1 %v5044_v35  ;;  %v1065_v51 = vmul.f32 %v6253_v45, %v6111_v59  ;;  %vm988_vm6 = vc.u32 %v6611_v7, %v6603_v8 }
 0x2b3   :  { %v895_v12 = vclz %v4233_v0  ;;  %v498_v21 = vsel %vm413_vm13, %v497_v42, %v6234_v36  ;;  %v508_v14 = vxor.u32 2147483648, %v6493_v52  ;;  %5047 = vmatpush3.bf16.msra.mxu1 %v5044_v35  ;;  %v990_v48 = vsel %vm988_vm6, %v989_v4, %v6604_v20 }
 0x2b4   :  { %v1172_v24 = vmul.f32 1.442695, %v1170_v34  ;;  %v1174_v1 = vmul.f32 1.442695, %v1171_v43  ;;  %v500_v62 = vsel %vm6395_vm15, 0, %v498_v21  ;;  %v991_v38 = vadd.s32 %v990_v48, %v986_v41 }
 0x2b5   :  { %v4234_v40 = vadd.s32 4294967294, %v895_v12  ;;  %vm503_vm7 = vweird.f32 %v6103_v54  ;;  %v504_v32 = vadd.s32 3, %v500_v62  ;;  %v1071_v37 = vmul.f32 %v1065_v51, %v6111_v59 }
 0x2b6   :  { %5435 = vpow2.f32 %v1172_v24  ;;  %v511_v36 = vxor.u32 2147483648, %v6485_v19  ;;  %v1077_v44 = vmul.f32 28.0, %v6253_v45  ;;  %v1089_v39 = vmul.f32 48.0, %v1065_v51  ;;  %v6641_v49 = vpop.eup %5431 }
 0x2b7   :  { %vm4235_vm13 = vcmp.lt.s32.totalorder %v4234_v40, 0  ;;  %v992_v22 = vadd.s32 536870912, %v991_v38  ;;  %5437 = vpow2.f32 %v1174_v1  ;;  %v505_v53 = vand.u32 3, %v504_v32  ;;  %v6644_v25 = vpop.eup %5433 }
 0x2b8   :  { %v898_v56 = vsel %vm4235_vm13, 0, %v4234_v40  ;;  %v1083_v10 = vsub.f32 1.0, %v1077_v44  ;;  %v1101_v46 = vmul.f32 21.0, %v1071_v37  ;;  %vm1113_vm15 = vcmp.lt.f32.partialorder %v6111_v59, 1.0 }
 0x2b9   :  { %v899_v30 = vsub.s32 32, %v898_v56  ;;  %v900_v20 = vshll.u32 %v6595_v17, %v898_v56  ;;  %v903_v13 = vsub.s32 4294967266, %v898_v56  ;;  %v6647_v2 = vshrl.u32 %v992_v22, 30 }
 0x2ba   :  { %vm506_vm14 = vcmp.lt.s32.totalorder %v505_v53, 2  ;;  %vm507_vm3 = vcmp.eq.s32.totalorder %v505_v53, 0  ;;  %vm510_vm4 = vcmp.eq.s32.totalorder %v505_v53, 2  ;;  %v1095_v45 = vadd.f32 %v1089_v39, %v1083_v10 }
 0x2bb   :  { %vm1268_vm5 = vcmask 64512   ;;  %v901_v16 = vshrl.u32 %v883_v31, %v899_v30  ;;  %v904_v11 = vadd.s32 127, %v903_v13  ;;  %v994_v35 = vshll.u32 %v6647_v2, 30 }
 0x2bc   :  { %v509_v0 = vsel %vm507_vm3, %v6485_v19, %v508_v14  ;;  %v512_v41 = vsel %vm510_vm4, %v511_v36, %v6493_v52  ;;  %v1107_v42 = vsub.f32 %v1095_v45, %v1101_v46  ;;  %vm607_vm6 = vweird.f32 %v6125_v3 }
 0x2bd   :  { %v7778_v17 = vsel %vm6330_vm9, 0, %v6361_v58  ;;  %v902_v34 = vor.u32 %v901_v16, %v900_v20  ;;  %v905_v43 = vshll.u32 %v904_v11, 23  ;;  %v6657_v51 = vsub.s32 %v991_v38, %v994_v35 }
 0x2be   :  { %v608_v4 = vadd.s32 3, %v7778_v17  ;;  %v513_v31 = vsel %vm506_vm14, %v509_v0, %v512_v41  ;;  %vm829_vm13 = vcmp.lt.s32.totalorder %v6368_v5, 0  ;;  %v1119_v52 = vsel %vm1113_vm15, %v1107_v42, 0.0 }
 0x2bf   :  { %v514_v19 = vsel %vm503_vm7, nan, %v513_v31  ;;  %v612_v60 = vxor.u32 2147483648, %v6529_v33  ;;  %v7779_v58 = vand.u32 2147483647, %v6368_v5  ;;  %v906_v14 = vor.u32 4788187, %v905_v43 }
 0x2c0   :  { %v609_v12 = vand.u32 3, %v608_v4  ;;  %v909_v48 = vcvt.s32.f32 %v902_v34  ;;  %v997_v24 = vsub.s32 0, %v6657_v51  ;;  %v1035_v1 = vmul.f32 0.6324555, %v514_v19  ;;  %v5436_v62 = vpop.eup %5435 }
 0x2c1   :  { %vm6668_vm9 = vcmp.le.f32.partialorder %v7779_v58, 0.7853982  ;;  %v615_v54 = vxor.u32 2147483648, %v6505_v57  ;;  %v5438_v59 = vpop.eup %5437  ;;  %v907_v40 = vand.u32 2147483647, %v906_v14  ;;  %v1262_v32 = vmul.f32 %v5436_v62, %v6157_v28  ;;  %v7783_v62 = vld [vmem:[#allocation44_spill] sm:$0xff] }
 0x2c2   :  { %vm610_vm14 = vcmp.lt.s32.totalorder %v609_v12, 2  ;;  %vm611_vm7 = vcmp.eq.s32.totalorder %v609_v12, 0  ;;  %vm614_vm3 = vcmp.eq.s32.totalorder %v609_v12, 2  ;;  %v4237_v38 = vmin.u32 %v997_v24, %v6657_v51 }
 0x2c3   :  { %v1041_v37 = vmul.f32 %v6095_v50, %v1035_v1  ;;  %v1263_v36 = vmul.f32 %v5438_v59, %v6150_v23  ;;  %v613_v44 = vsel %vm611_vm7, %v6505_v57, %v612_v60  ;;  %v616_v39 = vsel %vm614_vm3, %v615_v54, %v6529_v33  ;;  %1277 = vrot.lane.b32.xlu0 %v1262_v32, %s5749_s27  ;;  %v7784_v59 = vld [vmem:[#allocation41_spill] sm:$0xff] }
 0x2c4   :  { %v1060_v22 = vmul.f32 %v6257_v63, %v6257_v63  ;;  %v910_v53 = vmul.f32 %v909_v48, %v907_v40  ;;  %v999_v56 = vclz %v4237_v38  ;;  %v617_v46 = vsel %vm610_vm14, %v613_v44, %v616_v39 }
 0x2c5   :  { %v1125_v10 = vmul.f32 %v1119_v52, %v1041_v37  ;;  %5439 = vcosq.f32 %v6619_v26  ;;  %1279 = vrot.lane.b32.xlu1 %v1263_v36, %s5749_s27  ;;  %v618_v23 = vsel %vm607_vm6, nan, %v617_v46  ;;  %v705_v11 = vsub.s32 4, %v6379_v18 }
 0x2c6   :  { %v1066_v28 = vmul.f32 %v1060_v22, %v6138_v15  ;;  %v1078_v33 = vmul.f32 28.0, %v1060_v22  ;;  %v911_v57 = vxor.u32 2147483648, %v910_v53  ;;  %v4238_v30 = vadd.s32 4294967294, %v999_v56 }
 0x2c7   :  { %v1269_v63 = vsel %vm1268_vm5, %v1125_v10, 0.0  ;;  %v1036_v20 = vmul.f32 0.6324555, %v618_v23  ;;  %5441 = vsinq.f32 %v6619_v26  ;;  %v987_v35 = vadd.s32 %v6603_v8, %v6611_v7 }
 0x2c8   :  { %4629 = vmatprep.mubr.msk.f32.mxu1 %vm234_vm0, %v1269_v63  ;;  %v1072_v13 = vmul.f32 %v1066_v28, %v6138_v15  ;;  %v1084_v45 = vsub.f32 1.0, %v1078_v33  ;;  %v1090_v16 = vmul.f32 48.0, %v1066_v28  ;;  %v912_v3 = vsel %vm829_vm13, %v911_v57, %v910_v53 }
 0x2c9   :  { %vm4239_vm15 = vcmp.lt.s32.totalorder %v4238_v30, 0  ;;  %v915_v0 = vsel %vm6668_vm9, %v6368_v5, %v912_v3  ;;  %v1042_v43 = vmul.f32 %v6105_v55, %v1036_v20  ;;  %vm1114_vm4 = vcmp.lt.f32.partialorder %v6138_v15, 1.0  ;;  %v7782_v15 = vld [vmem:[#allocation38_spill] sm:$0xff] }
 0x2ca   :  { %v1002_v41 = vsel %vm4239_vm15, 0, %v4238_v30  ;;  %v1096_v42 = vadd.f32 %v1090_v16, %v1084_v45  ;;  %v1102_v17 = vmul.f32 21.0, %v1072_v13  ;;  %5443 = vcosq.f32 %v915_v0 }
 0x2cb   :  { %v1003_v4 = vsub.s32 32, %v1002_v41  ;;  %v1007_v34 = vsub.s32 4294967266, %v1002_v41  ;;  %v1004_v26 = vshll.u32 %v6657_v51, %v1002_v41  ;;  %v706_v8 = vsel %vm621_vm10, %v705_v11, %v6379_v18 }
 0x2cc   :  { %v1108_v31 = vsub.f32 %v1096_v42, %v1102_v17  ;;  %v708_v52 = vsel %vm6523_vm11, 0, %v706_v8  ;;  %v716_v12 = vxor.u32 2147483648, %v6644_v25  ;;  %v719_v14 = vxor.u32 2147483648, %v6641_v49 }
 0x2cd   :  { %v1005_v7 = vshrl.u32 %v987_v35, %v1003_v4  ;;  %v1008_v19 = vadd.s32 127, %v1007_v34  ;;  %v712_v58 = vadd.s32 3, %v708_v52  ;;  %v1055_v48 = vmul.f32 %v7782_v15, %v6247_v47  ;;  %v7788_v35 = vld [vmem:[#allocation37_spill] sm:$0xff]  ;;  %v7790_v34 = vld [vmem:[#allocation31_spill] sm:$0xff] }
 0x2ce   :  { %v1120_v60 = vsel %vm1114_vm4, %v1108_v31, 0.0  ;;  %v809_v54 = vsub.s32 4, %v7783_v62  ;;  %5445 = vsinq.f32 %v915_v0  ;;  %vm933_vm10 = vcmp.lt.s32.totalorder %v7784_v59, 0 }
 0x2cf   :  { %v1006_v51 = vor.u32 %v1005_v7, %v1004_v26  ;;  %v1009_v24 = vshll.u32 %v1008_v19, 23  ;;  %v1126_v1 = vmul.f32 %v1120_v60, %v1042_v43  ;;  %v5440_v18 = vpop.eup %5439  ;;  %vm711_vm11 = vweird.f32 %v6130_v6 }
 0x2d0   :  { %v713_v9 = vand.u32 3, %v712_v58  ;;  %v1061_v40 = vmul.f32 %v1055_v48, %v1055_v48  ;;  %v7785_v38 = vand.u32 2147483647, %v7784_v59  ;;  %v810_v39 = vsel %vm725_vm8, %v809_v54, %v7783_v62 }
 0x2d1   :  { %v1010_v37 = vor.u32 4788187, %v1009_v24  ;;  %v1013_v36 = vcvt.s32.f32 %v1006_v51  ;;  %v1270_v44 = vsel %vm1268_vm5, %v1126_v1, 0.0  ;;  %vm1115_vm15 = vcmp.lt.f32.partialorder %v6247_v47, 1.0  ;;  %v5442_v53 = vpop.eup %5441 }
 0x2d2   :  { %vm6718_vm6 = vcmp.le.f32.partialorder %v7785_v38, 0.7853982  ;;  %4630 = vmatmul.mubr.msk.f32.vlgmr.msra.gmra.mrb[2].mxu1 %vm234_vm0, %v1270_v44  ;;  %vm714_vm14 = vcmp.lt.s32.totalorder %v713_v9, 2  ;;  %vm715_vm7 = vcmp.eq.s32.totalorder %v713_v9, 0  ;;  %vm718_vm3 = vcmp.eq.s32.totalorder %v713_v9, 2 }
 0x2d3   :  { %v1067_v22 = vmul.f32 %v1061_v40, %v6247_v47  ;;  %v1011_v56 = vand.u32 2147483647, %v1010_v37  ;;  %v717_v10 = vsel %vm715_vm7, %v6641_v49, %v716_v12  ;;  %v720_v46 = vsel %vm718_vm3, %v719_v14, %v6644_v25  ;;  %v7789_v25 = vld [vmem:[#allocation39_spill] sm:$0xff] }
 0x2d4   :  { %v1079_v23 = vmul.f32 28.0, %v1061_v40  ;;  %v721_v28 = vsel %vm714_vm14, %v717_v10, %v720_v46  ;;  %v812_v30 = vsel %vm6578_vm12, 0, %v810_v39  ;;  %v5444_v16 = vpop.eup %5443  ;;  %v820_v49 = vxor.u32 2147483648, %v5442_v53  ;;  %v7792_v39 = vld [vmem:[#allocation40_spill] sm:$0xff]  ;;  %v7794_v46 = vld [vmem:[#allocation42_spill] sm:$0xff] }
 0x2d5   :  { %v1073_v33 = vmul.f32 %v1067_v22, %v6247_v47  ;;  %v1091_v57 = vmul.f32 48.0, %v1067_v22  ;;  %v1014_v63 = vmul.f32 %v1013_v36, %v1011_v56  ;;  %v722_v20 = vsel %vm711_vm11, nan, %v721_v28  ;;  %v7793_v22 = vld [vmem:[#allocation43_spill] sm:$0xff] }
 0x2d6   :  { %v1085_v13 = vsub.f32 1.0, %v1079_v23  ;;  %v816_v45 = vadd.s32 3, %v812_v30  ;;  %v1037_v11 = vmul.f32 0.6324555, %v722_v20  ;;  %v1056_v0 = vmul.f32 %v7789_v25, %v7788_v35  ;;  %v7795_v23 = vld [vmem:[#allocation45_spill] sm:$0xff] }
 0x2d7   :  { %v1103_v3 = vmul.f32 21.0, %v1073_v33  ;;  %v1015_v41 = vxor.u32 2147483648, %v1014_v63  ;;  %v823_v4 = vxor.u32 2147483648, %v5440_v18  ;;  %vm815_vm8 = vweird.f32 %v6265_v61  ;;  %v7791_v61 = vld [vmem:[#allocation32_spill] sm:$0xff] }
 0x2d8   :  { %v1097_v42 = vadd.f32 %v1091_v57, %v1085_v13  ;;  %v817_v17 = vand.u32 3, %v816_v45  ;;  %v1043_v29 = vmul.f32 %v7790_v34, %v1037_v11  ;;  %v1062_v43 = vmul.f32 %v1056_v0, %v1056_v0  ;;  %v5446_v8 = vpop.eup %5445 }
 0x2d9   :  { %v913_v6 = vsub.s32 4, %v6582_v27  ;;  %v1016_v26 = vsel %vm933_vm10, %v1015_v41, %v1014_v63  ;;  %v924_v37 = vxor.u32 2147483648, %v5446_v8  ;;  %v927_v44 = vxor.u32 2147483648, %v5444_v16 }
 0x2da   :  { %v1109_v31 = vsub.f32 %v1097_v42, %v1103_v3  ;;  %vm818_vm12 = vcmp.lt.s32.totalorder %v817_v17, 2  ;;  %vm819_vm4 = vcmp.eq.s32.totalorder %v817_v17, 0  ;;  %v1019_v7 = vsel %vm6718_vm6, %v7784_v59, %v1016_v26 }
 0x2db   :  { %v821_v19 = vsel %vm819_vm4, %v5440_v18, %v820_v49  ;;  %vm822_vm11 = vcmp.eq.s32.totalorder %v817_v17, 2  ;;  %v1068_v52 = vmul.f32 %v1062_v43, %v7788_v35  ;;  %5447 = vcosq.f32 %v1019_v7 }
 0x2dc   :  { %v1121_v12 = vsel %vm1115_vm15, %v1109_v31, 0.0  ;;  %v824_v60 = vsel %vm822_vm11, %v823_v4, %v5442_v53  ;;  %v1080_v58 = vmul.f32 28.0, %v1062_v43  ;;  %5449 = vsinq.f32 %v1019_v7 }
 0x2dd   :  { %v1127_v14 = vmul.f32 %v1121_v12, %v1043_v29  ;;  %v825_v15 = vsel %vm818_vm12, %v821_v19, %v824_v60  ;;  %v1074_v48 = vmul.f32 %v1068_v52, %v7788_v35  ;;  %v1092_v1 = vmul.f32 48.0, %v1068_v52 }
 0x2de   :  { %v826_v51 = vsel %vm815_vm8, nan, %v825_v15  ;;  %v1086_v24 = vsub.f32 1.0, %v1080_v58  ;;  %v914_v62 = vsel %vm829_vm13, %v913_v6, %v6582_v27  ;;  %v1057_v53 = vmul.f32 %v7793_v22, %v7792_v39 }
 0x2df   :  { %v1271_v54 = vsel %vm1268_vm5, %v1127_v14, 0.0  ;;  %v1038_v47 = vmul.f32 0.6324555, %v826_v51  ;;  %v1104_v18 = vmul.f32 21.0, %v1074_v48  ;;  %v916_v9 = vsel %vm6668_vm9, 0, %v914_v62 }
 0x2e0   :  { %4632 = vmatprep.mubr.msk.f32.mxu1 %vm234_vm0, %v1271_v54  ;;  %v1098_v40 = vadd.f32 %v1092_v1, %v1086_v24  ;;  %v920_v38 = vadd.s32 3, %v916_v9  ;;  %v1017_v27 = vsub.s32 4, %v6647_v2  ;;  %v1058_v28 = vmul.f32 %v7795_v23, %v7794_v46  ;;  %v7797_v9 = vld [vmem:[#allocation34_spill] sm:$0xff]  ;;  %v1479_v23 = vld [vmem:[%s7649_s14] sm:$0xff] }
 0x2e1   :  { %v1044_v36 = vmul.f32 %v7791_v61, %v1038_v47  ;;  %vm1116_vm13 = vcmp.lt.f32.partialorder %v7788_v35, 1.0  ;;  %vm919_vm9 = vweird.f32 %v6368_v5  ;;  %v1063_v21 = vmul.f32 %v1057_v53, %v1057_v53  ;;  %v7796_v5 = vld [vmem:[#allocation33_spill] sm:$0xff] }
 0x2e2   :  { %v1110_v56 = vsub.f32 %v1098_v40, %v1104_v18  ;;  %v921_v10 = vand.u32 3, %v920_v38  ;;  %v1018_v33 = vsel %vm933_vm10, %v1017_v27, %v6647_v2  ;;  %v1064_v35 = vmul.f32 %v1058_v28, %v1058_v28  ;;  %v1480_v53 = vld [vmem:[%s7649_s14 + $0x8] sm:$0xff]  ;;  %v1483_v28 = vld [vmem:[%s7649_s14 + $0x20] sm:$0xff] }
 0x2e3   :  { %v1069_v13 = vmul.f32 %v1063_v21, %v7792_v39  ;;  %v1081_v3 = vmul.f32 28.0, %v1063_v21  ;;  %v1020_v49 = vsel %vm6718_vm6, 0, %v1018_v33  ;;  %vm1117_vm10 = vcmp.lt.f32.partialorder %v7792_v39, 1.0  ;;  %v1484_v27 = vld [vmem:[%s7649_s14 + $0x28] sm:$0xff] }
 0x2e4   :  { %v1122_v57 = vsel %vm1116_vm13, %v1110_v56, 0.0  ;;  %vm922_vm14 = vcmp.lt.s32.totalorder %v921_v10, 2  ;;  %vm923_vm7 = vcmp.eq.s32.totalorder %v921_v10, 0  ;;  %vm926_vm3 = vcmp.eq.s32.totalorder %v921_v10, 2  ;;  %v1482_v56 = vld [vmem:[%s7649_s14 + $0x18] sm:$0xff] }
 0x2e5   :  { %v1128_v30 = vmul.f32 %v1122_v57, %v1044_v36  ;;  %v925_v63 = vsel %vm923_vm7, %v5444_v16, %v924_v37  ;;  %v928_v20 = vsel %vm926_vm3, %v927_v44, %v5446_v8  ;;  %v5448_v45 = vpop.eup %5447  ;;  %v1075_v41 = vmul.f32 %v1069_v13, %v7792_v39 }
 0x2e6   :  { %v929_v11 = vsel %vm922_vm14, %v925_v63, %v928_v20  ;;  %v5450_v25 = vpop.eup %5449  ;;  %v1093_v42 = vmul.f32 48.0, %v1069_v13  ;;  %v1087_v17 = vsub.f32 1.0, %v1081_v3  ;;  %v1024_v4 = vadd.s32 3, %v1020_v49  ;;  %v1485_v63 = vld [vmem:[%s7649_s14 + $0x30] sm:$0xff]  ;;  %v1488_v20 = vld [vmem:[%s7649_s14 + $0x48] sm:$0xff]  ;;  %v1494_v3 = vld [vmem:[%s7649_s14 + $0x78] sm:$0xff] }
 0x2e7   :  { %v1272_v0 = vsel %vm1268_vm5, %v1128_v30, 0.0  ;;  %v930_v2 = vsel %vm919_vm9, nan, %v929_v11  ;;  %v1028_v29 = vxor.u32 2147483648, %v5450_v25  ;;  %v1105_v43 = vmul.f32 21.0, %v1075_v41  ;;  %v1481_v30 = vld [vmem:[%s7649_s14 + $0x10] sm:$0xff]  ;;  %v1490_v11 = vld [vmem:[%s7649_s14 + $0x58] sm:$0xff] }
 0x2e8   :  { %4633 = vmatmul.mubr.msk.f32.gmra.mrb[4].mxu1 %vm234_vm0, %v1272_v0  ;;  %v1039_v16 = vmul.f32 0.6324555, %v930_v2  ;;  %v1031_v6 = vxor.u32 2147483648, %v5448_v45  ;;  %v1070_v32 = vmul.f32 %v1064_v35, %v7794_v46  ;;  %v1082_v26 = vmul.f32 28.0, %v1064_v35  ;;  %v1491_v0 = vld [vmem:[%s7649_s14 + $0x60] sm:$0xff]  ;;  %v1489_v2 = vld [vmem:[%s7649_s14 + $0x50] sm:$0xff] }
 0x2e9   :  { %v1099_v31 = vadd.f32 %v1093_v42, %v1087_v17  ;;  %v1025_v8 = vand.u32 3, %v1024_v4  ;;  %vm1023_vm12 = vweird.f32 %v7784_v59  ;;  %vm1118_vm4 = vcmp.lt.f32.partialorder %v7794_v46, 1.0  ;;  %v1493_v42 = vld [vmem:[%s7649_s14 + $0x70] sm:$0xff]  ;;  %v1500_v17 = vld [vmem:[%s7649_s14 + $0xa8] sm:$0xff] }
 0x2ea   :  { %v1045_v7 = vmul.f32 %v7796_v5, %v1039_v16  ;;  %v1076_v19 = vmul.f32 %v1070_v32, %v7794_v46  ;;  %v1088_v52 = vsub.f32 1.0, %v1082_v26  ;;  %v1094_v12 = vmul.f32 48.0, %v1070_v32  ;;  %v1486_v46 = vld [vmem:[%s7649_s14 + $0x38] sm:$0xff]  ;;  %v1496_v16 = vld [vmem:[%s7649_s14 + $0x88] sm:$0xff]  ;;  %v1495_v32 = vld [vmem:[%s7649_s14 + $0x80] sm:$0xff] }
 0x2eb   :  { %v1111_v60 = vsub.f32 %v1099_v31, %v1105_v43  ;;  %vm1026_vm6 = vcmp.lt.s32.totalorder %v1025_v8, 2  ;;  %vm1027_vm15 = vcmp.eq.s32.totalorder %v1025_v8, 0  ;;  %vm1030_vm8 = vcmp.eq.s32.totalorder %v1025_v8, 2  ;;  %v1498_v43 = vld [vmem:[%s7649_s14 + $0x98] sm:$0xff]  ;;  %v1499_v31 = vld [vmem:[%s7649_s14 + $0xa0] sm:$0xff]  ;;  %v1497_v8 = vld [vmem:[%s7649_s14 + $0x90] sm:$0xff] }
 0x2ec   :  { %v1029_v58 = vsel %vm1027_vm15, %v5448_v45, %v1028_v29  ;;  %v1032_v14 = vsel %vm1030_vm8, %v1031_v6, %v5450_v25  ;;  %v1100_v15 = vadd.f32 %v1094_v12, %v1088_v52  ;;  %v1106_v48 = vmul.f32 21.0, %v1076_v19  ;;  %v1492_v45 = vld [vmem:[%s7649_s14 + $0x68] sm:$0xff]  ;;  %v1487_v25 = vld [vmem:[%s7649_s14 + $0x40] sm:$0xff]  ;;  %v1502_v6 = vld [vmem:[%s7649_s14 + $0xb8] sm:$0xff] }
 0x2ed   :  { %v1123_v51 = vsel %vm1117_vm10, %v1111_v60, 0.0  ;;  %v1033_v24 = vsel %vm1026_vm6, %v1029_v58, %v1032_v14  ;;  %v5048_v10 = vpack.c.bf16 %v1484_v27, %v1480_v53  ;;  %v5762_v21 = vmov 0.0   ;;  %v1504_v52 = vld [vmem:[%s7649_s14 + $0xc8] sm:$0xff]  ;;  %v1506_v60 = vld [vmem:[%s7649_s14 + $0xd8] sm:$0xff] }
 0x2ee   :  { %v1129_v1 = vmul.f32 %v1123_v51, %v1045_v7  ;;  %v1034_v62 = vsel %vm1023_vm12, nan, %v1033_v24  ;;  %v1112_v54 = vsub.f32 %v1100_v15, %v1106_v48  ;;  %1622 = vmatprep.mubr.f32.mxu0 %v5762_v21  ;;  %v5064_v33 = vpack.c.bf16 %v1486_v46, %v1482_v56  ;;  %v1501_v7 = vld [vmem:[%s7649_s14 + $0xb0] sm:$0xff]  ;;  %v1508_v12 = vld [vmem:[%s7649_s14 + $0xe8] sm:$0xff]  ;;  %v1510_v15 = vld [vmem:[%s7649_s14 + $0xf8] sm:$0xff] }
 0x2ef   :  { %v1040_v47 = vmul.f32 0.6324555, %v1034_v62  ;;  %v5050_v57 = vpack.c.bf16 %v1483_v28, %v1479_v23  ;;  %5049 = vmatprep.subr.bf16.mxu0 %v5048_v10  ;;  %v5066_v13 = vpack.c.bf16 %v1485_v63, %v1481_v30  ;;  %v5052_v49 = vpack.c.bf16 %v1492_v45, %v1488_v20  ;;  %v1503_v48 = vld [vmem:[%s7649_s14 + $0xc0] sm:$0xff]  ;;  %v1509_v62 = vld [vmem:[%s7649_s14 + $0xf0] sm:$0xff] }
 0x2f0   :  { %v1273_v18 = vsel %vm1268_vm5, %v1129_v1, 0.0  ;;  %v1124_v38 = vsel %vm1118_vm4, %v1112_v54, 0.0  ;;  %5065 = vmatprep.subr.bf16.mxu1 %v5064_v33  ;;  %v5068_v35 = vpack.c.bf16 %v1494_v3, %v1490_v11  ;;  %v5054_v41 = vpack.c.bf16 %v1491_v0, %v1487_v25  ;;  %v1507_v51 = vld [vmem:[%s7649_s14 + $0xe0] sm:$0xff]  ;;  %v1505_v1 = vld [vmem:[%s7649_s14 + $0xd0] sm:$0xff] }
 0x2f1   :  { %4635 = vmatprep.mubr.msk.f32.mxu1 %vm234_vm0, %v1273_v18  ;;  %v1046_v40 = vmul.f32 %v7797_v9, %v1040_v47  ;;  %5051 = vmatpush1.bf16.msra.mxu0 %v5050_v57  ;;  %v5070_v4 = vpack.c.bf16 %v1493_v42, %v1489_v2  ;;  %v5056_v29 = vpack.c.bf16 %v1500_v17, %v1496_v16  ;;  %v6891_v18 = vld [vmem:[#allocation10] ss:$0 sm:$0xff]  ;;  %vm2477_vm11 = vcmask 392192  }
 0x2f2   :  { %5067 = vmatpush1.bf16.msra.mxu1 %v5066_v13  ;;  %5053 = vmatprep.subr.bf16.mxu0 %v5052_v49  ;;  %v5072_v26 = vpack.c.bf16 %v1502_v6, %v1498_v43  ;;  %v5058_v19 = vpack.c.bf16 %v1499_v31, %v1495_v32  ;;  %v5074_v58 = vpack.c.bf16 %v1501_v7, %v1497_v8  ;;  %vm2939_vm9 = vcmask 654336  }
 0x2f3   :  { %v1130_v37 = vmul.f32 %v1124_v38, %v1046_v40  ;;  %5069 = vmatprep.subr.bf16.mxu1 %v5068_v35  ;;  %v5060_v14 = vpack.c.bf16 %v1508_v12, %v1504_v52  ;;  %v5076_v24 = vpack.c.bf16 %v1510_v15, %v1506_v60  ;;  %v5062_v54 = vpack.c.bf16 %v1507_v51, %v1503_v48 }
 0x2f4   :  { %v5078_v47 = vpack.c.bf16 %v1509_v62, %v1505_v1 }
 0x2f5   :  { %v1274_v36 = vsel %vm1268_vm5, %v1130_v37, 0.0  ;;  %5055 = vmatpush1.bf16.msra.mxu0 %v5054_v41 }
 0x2f6   :  { %4636 = vmatmul.mubr.msk.f32.gmra.mrb[6].mxu1 %vm234_vm0, %v1274_v36  ;;  %5057 = vmatprep.subr.bf16.mxu0 %v5056_v29 }
 0x2f7   :  { %5071 = vmatpush1.bf16.msra.mxu1 %v5070_v4 }
 0x2f8   :  { %5073 = vmatprep.subr.bf16.mxu1 %v5072_v26 }
 0x2f9   :  { %5059 = vmatpush1.bf16.msra.mxu0 %v5058_v19 }
 0x2fa   :  { %5061 = vmatprep.subr.bf16.mxu0 %v5060_v14 }
 0x2fb   :  { %5075 = vmatpush1.bf16.msra.mxu1 %v5074_v58 }
 0x2fc   :  { %5077 = vmatprep.subr.bf16.mxu1 %v5076_v24 }
 0x2fd   :  { %5063 = vmatpush1.bf16.msra.mxu0 %v5062_v54 }
 0x2ff   :  { %5079 = vmatpush1.bf16.msra.mxu1 %v5078_v47 }
 0x335   :  { %v1278_v59 = vpop.permute.xlu0 %1277 }
 0x336   :  { %v1283_v44 = vsel %vm1268_vm5, 0.0, %v1278_v59 }
 0x337   :  { %v1280_v39 = vpop.permute.xlu1 %1279  ;;  %4638 = vmatprep.mubr.msk.f32.mxu1 %vm234_vm0, %v1283_v44 }
 0x338   :  { %v1284_v22 = vsel %vm1268_vm5, 0.0, %v1280_v39  ;;  %v1768_v39 = vld [vmem:[#allocation7] sm:$0x7]  ;;  %vm1533_vm5 = vcmask 523264  }
 0x339   :  { %4639 = vmatmul.mubr.msk.f32.gmra.mrb[8].mxu1 %vm234_vm0, %v1284_v22  ;;  %4641 = vmatprep.subr.msk.mxu0 %vm1183_vm1, %v1768_v39 }
 0x33a   :  { %1727 = vmatprep.mubr.f32.mxu1 %v5762_v21 }
 0x3a5   :  { %v4631_v40 = vpop.f32.mrb[2].mxu1 }
 0x3a6   :  { %v1390_v38 = vadd.f32 %v4631_v40, %v6891_v18  ;;  %v1384_v37 = vpop.f32.mrb[3].mxu1  ;;  %v5507_v40 = vld [vmem:[%s7727_s2] sm:$0xff] }
 0x3a7   :  { %v1385_v36 = vadd.f32 %v6891_v18, %v1384_v37  ;;  %v1850_v37 = vld [vmem:[%s7646_s11 + $0x8] sm:$0xff] }
 0x3a8   :  { %v4254_v59 = vmul.f32 -1.442695, %v1390_v38 }
 0x3a9   :  { %v4253_v44 = vmul.f32 -1.442695, %v1385_v36 }
 0x3aa   :  { %5451 = vpow2.f32 %v4254_v59 }
 0x3ab   :  { %5453 = vpow2.f32 %v4253_v44  ;;  %v1852_v44 = vld [vmem:[%s7646_s11 + $0x18] sm:$0xff] }
 0x3b4   :  { %v5452_v22 = vpop.eup %5451 }
 0x3b5   :  { %v5454_v53 = vpop.eup %5453  ;;  %v1448_v27 = vadd.f32 1.0, %v5452_v22  ;;  %v1853_v22 = vld [vmem:[%s7646_s11 + $0x20] sm:$0xff] }
 0x3b6   :  { %v1447_v56 = vadd.f32 1.0, %v5454_v53  ;;  %v1854_v53 = vld [vmem:[%s7646_s11 + $0x28] sm:$0xff] }
 0x3b8   :  { %5455 = vrcp.f32 %v1447_v56  ;;  %v1855_v56 = vld [vmem:[%s7646_s11 + $0x30] sm:$0xff] }
 0x3b9   :  { %5457 = vrcp.f32 %v1448_v27  ;;  %v5088_v27 = vpack.c.bf16 %v1854_v53, %v1853_v22  ;;  %v213_v22 = vld [vmem:[#allocation16 + $0x18] sm:$0xff] }
 0x3bb   :  { %v4634_v10 = vpop.f32.mrb[4].mxu1 }
 0x3bc   :  { %v1400_v46 = vadd.f32 %v4634_v10, %v6891_v18  ;;  %v1394_v23 = vpop.f32.mrb[5].mxu1  ;;  %v1856_v10 = vld [vmem:[%s7646_s11 + $0x38] sm:$0xff] }
 0x3bd   :  { %v1395_v28 = vadd.f32 %v6891_v18, %v1394_v23  ;;  %v6965_v23 = vld [vmem:[#allocation14] sm:$0x7] }
 0x3be   :  { %v4256_v33 = vmul.f32 -1.442695, %v1400_v46 }
 0x3bf   :  { %v4255_v57 = vmul.f32 -1.442695, %v1395_v28 }
 0x3c0   :  { %5459 = vpow2.f32 %v4256_v33 }
 0x3c1   :  { %5461 = vpow2.f32 %v4255_v57 }
 0x3c2   :  { %v5456_v30 = vpop.eup %5455 }
 0x3c3   :  { %v1471_v63 = vmul.f32 %v5456_v30, %v1385_v36  ;;  %v5458_v20 = vpop.eup %5457  ;;  %v1851_v36 = vld [vmem:[%s7646_s11 + $0x10] sm:$0xff] }
 0x3c4   :  { %v1472_v13 = vmul.f32 %v5458_v20, %v1390_v38  ;;  %v5508_v38 = vld [vmem:[%s7727_s2 + $0x8] sm:$0xff] }
 0x3c5   :  { %4261 = vmatmul.mubr.msk.f32.vlgmr.msra.gmra.mrb[6].mxu0 %vm1533_vm5, %v1471_v63  ;;  %4269 = vmatmul.mubr.msk.f32.vlgmr.msra.gmra.mrb[10].mxu1 %vm1533_vm5, %v1471_v63 }
 0x3c6   :  { %1627 = vmatprep.mubr.f32.mxu0 %v5762_v21  ;;  %1732 = vmatprep.mubr.f32.mxu1 %v5762_v21 }
 0x3c7   :  { %4642 = vmatpush3.msk.msra.mxu0 %vm1183_vm1, %v1768_v39  ;;  %v5084_v39 = vpack.c.bf16 %v1852_v44, %v1851_v36  ;;  %v211_v44 = vld [vmem:[#allocation16 + $0x8] sm:$0xff] }
 0x3c9   :  { %v4637_v11 = vpop.f32.mrb[6].mxu1  ;;  %4262 = vmatmul.mubr.msk.f32.gmra.mrb[8].mxu0 %vm1533_vm5, %v1472_v13  ;;  %4270 = vmatmul.mubr.msk.f32.gmra.mrb[12].mxu1 %vm1533_vm5, %v1472_v13 }
 0x3ca   :  { %v5460_v45 = vpop.eup %5459  ;;  %v1410_v35 = vadd.f32 %v4637_v11, %v6891_v18  ;;  %v1404_v25 = vpop.f32.mrb[7].mxu1  ;;  %1632 = vmatprep.mubr.f32.mxu0 %v5762_v21  ;;  %1737 = vmatprep.mubr.f32.mxu1 %v5762_v21 }
 0x3cb   :  { %v5462_v3 = vpop.eup %5461  ;;  %v1450_v49 = vadd.f32 1.0, %v5460_v45  ;;  %v1405_v2 = vadd.f32 %v6891_v18, %v1404_v25 }
 0x3cc   :  { %v1449_v0 = vadd.f32 1.0, %v5462_v3  ;;  %v4258_v41 = vmul.f32 -1.442695, %v1410_v35 }
 0x3cd   :  { %5463 = vrcp.f32 %v1450_v49  ;;  %v4257_v42 = vmul.f32 -1.442695, %v1405_v2 }
 0x3ce   :  { %5465 = vrcp.f32 %v1449_v0 }
 0x3cf   :  { %5467 = vpow2.f32 %v4258_v41 }
 0x3d0   :  { %5469 = vpow2.f32 %v4257_v42 }
 0x3d7   :  { %v5464_v16 = vpop.eup %5463 }
 0x3d8   :  { %v5466_v17 = vpop.eup %5465  ;;  %v1474_v26 = vmul.f32 %v5464_v16, %v1400_v46  ;;  %v5092_v46 = vpack.c.bf16 %v1856_v10, %v1855_v56  ;;  %v215_v56 = vld [vmem:[#allocation16 + $0x28] sm:$0xff] }
 0x3d9   :  { %v5468_v4 = vpop.eup %5467  ;;  %v1473_v29 = vmul.f32 %v5466_v17, %v1395_v28 }
 0x3da   :  { %v5470_v43 = vpop.eup %5469  ;;  %v1452_v6 = vadd.f32 1.0, %v5468_v4 }
 0x3db   :  { %v1451_v32 = vadd.f32 1.0, %v5470_v43  ;;  %4263 = vmatmul.mubr.msk.f32.gmra.mrb[10].mxu0 %vm1533_vm5, %v1473_v29  ;;  %4271 = vmatmul.mubr.msk.f32.gmra.mrb[14].mxu1 %vm1533_vm5, %v1473_v29 }
 0x3dc   :  { %1637 = vmatprep.mubr.f32.mxu0 %v5762_v21  ;;  %1742 = vmatprep.mubr.f32.mxu1 %v5762_v21 }
 0x3dd   :  { %5471 = vrcp.f32 %v1451_v32 }
 0x3de   :  { %5473 = vrcp.f32 %v1452_v6 }
 0x3df   :  { %4264 = vmatmul.mubr.msk.f32.gmra.mrb[12].mxu0 %vm1533_vm5, %v1474_v26  ;;  %4272 = vmatmul.mubr.msk.f32.gmra.mrb[16].mxu1 %vm1533_vm5, %v1474_v26 }
 0x3e0   :  { %1642 = vmatprep.mubr.f32.mxu0 %v5762_v21  ;;  %1747 = vmatprep.mubr.f32.mxu1 %v5762_v21 }
 0x3e7   :  { %v5472_v31 = vpop.eup %5471 }
 0x3e8   :  { %v1475_v8 = vmul.f32 %v5472_v31, %v1405_v2  ;;  %v5474_v7 = vpop.eup %5473 }
 0x3e9   :  { %v1476_v19 = vmul.f32 %v5474_v7, %v1410_v35 }
 0x3ea   :  { %4265 = vmatmul.mubr.msk.f32.gmra.mrb[14].mxu0 %vm1533_vm5, %v1475_v8  ;;  %4273 = vmatmul.mubr.msk.f32.gmra.mrb[18].mxu1 %vm1533_vm5, %v1475_v8 }
 0x3eb   :  { %1647 = vmatprep.mubr.f32.mxu0 %v5762_v21  ;;  %1752 = vmatprep.mubr.f32.mxu1 %v5762_v21 }
 0x3ee   :  { %4266 = vmatmul.mubr.msk.f32.gmra.mrb[16].mxu0 %vm1533_vm5, %v1476_v19  ;;  %4274 = vmatmul.mubr.msk.f32.gmra.mrb[20].mxu1 %vm1533_vm5, %v1476_v19 }
 0x3ef   :  { %1652 = vmatprep.mubr.f32.mxu0 %v5762_v21  ;;  %1757 = vmatprep.mubr.f32.mxu1 %v5762_v21 }
 0x40c   :  { %v4640_v52 = vpop.f32.mrb[8].mxu1 }
 0x40d   :  { %v1420_v12 = vadd.f32 %v4640_v52, %v6891_v18  ;;  %v1414_v60 = vpop.f32.mrb[9].mxu1 }
 0x40e   :  { %v1415_v58 = vadd.f32 %v6891_v18, %v1414_v60 }
 0x40f   :  { %v4260_v14 = vmul.f32 -1.442695, %v1420_v12 }
 0x410   :  { %v4259_v15 = vmul.f32 -1.442695, %v1415_v58 }
 0x411   :  { %5475 = vpow2.f32 %v4260_v14 }
 0x412   :  { %5477 = vpow2.f32 %v4259_v15 }
 0x41b   :  { %v5476_v48 = vpop.eup %5475 }
 0x41c   :  { %v5478_v51 = vpop.eup %5477  ;;  %v1454_v24 = vadd.f32 1.0, %v5476_v48 }
 0x41d   :  { %v1453_v1 = vadd.f32 1.0, %v5478_v51  ;;  %v7800_v51 = vld [vmem:[#allocation24_spill] sm:$0xff] }
 0x41f   :  { %5479 = vrcp.f32 %v1453_v1 }
 0x420   :  { %5481 = vrcp.f32 %v1454_v24  ;;  %v1132_v24 = vmul.f32 %v6105_v55, %v7800_v51  ;;  %v208_v51 = vld [vmem:[%s7654_s19 + $0x38] sm:$0xff] }
 0x429   :  { %v5480_v62 = vpop.eup %5479 }
 0x42a   :  { %v1477_v54 = vmul.f32 %v5480_v62, %v1415_v58  ;;  %v5482_v47 = vpop.eup %5481  ;;  %v7799_v58 = vld [vmem:[#allocation25_spill] sm:$0xff]  ;;  %v7801_v62 = vld [vmem:[#allocation27_spill] sm:$0xff] }
 0x42b   :  { %v1478_v18 = vmul.f32 %v5482_v47, %v1420_v12  ;;  %v1131_v14 = vmul.f32 %v6095_v50, %v7799_v58  ;;  %v1138_v47 = vmul.f32 1.7320508, %v1132_v24  ;;  %v7802_v50 = vld [vmem:[#allocation26_spill] sm:$0xff] }
 0x42c   :  { %4267 = vmatmul.mubr.msk.f32.gmra.mrb[18].mxu0 %vm1533_vm5, %v1477_v54  ;;  %4275 = vmatmul.mubr.msk.f32.gmra.mrb[22].mxu1 %vm1533_vm5, %v1477_v54  ;;  %v1133_v54 = vmul.f32 %v7790_v34, %v7801_v62  ;;  %v7096_v58 = vld [vmem:[%s7805_s29 + $0x18] sm:$0xff]  ;;  %v7124_v62 = vld [vmem:[%s7805_s29 + $0x28] sm:$0xff] }
 0x42d   :  { %1657 = vmatprep.mubr.f32.mxu0 %v5762_v21  ;;  %1762 = vmatprep.mubr.f32.mxu1 %v5762_v21  ;;  %v1849_v21 = vld [vmem:[%s7646_s11] sm:$0xff]  ;;  %v1137_v1 = vmul.f32 1.7320508, %v1131_v14 }
 0x42e   :  { %v5080_v59 = vpack.c.bf16 %v1850_v37, %v1849_v21  ;;  %v7804_v21 = vld [vmem:[#allocation28_spill] sm:$0xff] }
 0x42f   :  { %v1136_v37 = vmul.f32 %v7797_v9, %v7804_v21  ;;  %v212_v9 = vld [vmem:[#allocation16 + $0x10] sm:$0xff] }
 0x430   :  { %4268 = vmatmul.mubr.msk.f32.gmra.mrb[20].mxu0 %vm1533_vm5, %v1478_v18  ;;  %4276 = vmatmul.mubr.msk.f32.gmra.mrb[24].mxu1 %vm1533_vm5, %v1478_v18  ;;  %v1134_v18 = vmul.f32 %v7791_v61, %v7802_v50  ;;  %v7026_v61 = vld [vmem:[%s7805_s29] sm:$0xff]  ;;  %v7032_v53 = vpack.c.bf16 %v213_v22, %v212_v9  ;;  %v217_v50 = vld [vmem:[#allocation16 + $0x38] sm:$0xff] }
 0x431   :  { %4643 = vmatprep.mubr.msk.f32.mxu0 %vm354_vm2, %v5507_v40  ;;  %5081 = vmatprep.subr.bf16.mxu1 %v5080_v59  ;;  %v1139_v40 = vmul.f32 1.7320508, %v1133_v54  ;;  %v7102_v14 = vld [vmem:[%s7805_s29 + $0x20] sm:$0xff] }
 0x432   :  { %5083 = vmatpush3.bf16.msra.mxu1 %v5080_v59  ;;  %v1140_v34 = vmul.f32 1.7320508, %v1134_v18  ;;  %v1142_v59 = vmul.f32 1.7320508, %v1136_v37 }
 0x433   :  { %5085 = vmatprep.subr.bf16.mxu1 %v5084_v39 }
 0x434   :  { %4644 = vmatmul.mubr.msk.f32.vlgmr.msra.gmra.mrb[22].mxu0 %vm354_vm2, %v5508_v38  ;;  %v7803_v38 = vld [vmem:[#allocation29_spill] sm:$0xff] }
 0x435   :  { %v1135_v55 = vmul.f32 %v7796_v5, %v7803_v38  ;;  %4669 = vmatprep.mubr.msk.f32.mxu0 %vm234_vm0, %v7026_v61  ;;  %v210_v5 = vld [vmem:[#allocation16] sm:$0xff] }
 0x436   :  { %5087 = vmatpush3.bf16.msra.mxu1 %v5084_v39  ;;  %v7030_v39 = vpack.c.bf16 %v211_v44, %v210_v5 }
 0x437   :  { %5089 = vmatprep.subr.bf16.mxu1 %v5088_v27  ;;  %v1141_v36 = vmul.f32 1.7320508, %v1135_v55 }
 0x43a   :  { %5091 = vmatpush3.bf16.msra.mxu1 %v5088_v27  ;;  %v214_v27 = vld [vmem:[#allocation16 + $0x20] sm:$0xff] }
 0x43b   :  { %5093 = vmatprep.subr.bf16.mxu1 %v5092_v46  ;;  %v7037_v10 = vpack.c.bf16 %v215_v56, %v214_v27 }
 0x43e   :  { %5095 = vmatpush3.bf16.msra.mxu1 %v5092_v46  ;;  %v201_v46 = vld [vmem:[%s7654_s19] sm:$0xff] }
 0x43f   :  { %4678 = vmatprep.subr.msk.mxu1 %vm1183_vm1, %v6965_v23 }
 0x498   :  { %v6969_v28 = vpop.f32.mrb[6].mxu0  ;;  %v6971_v33 = vpop.f32.mrb[10].mxu1 }
 0x499   :  { %v1626_v57 = vpop.f32.mrb[7].mxu0  ;;  %v1731_v30 = vpop.f32.mrb[11].mxu1 }
 0x49a   :  { %v202_v57 = vld [vmem:[%s7654_s19 + $0x8] sm:$0xff] }
 0x49c   :  { %v6973_v63 = vpop.f32.mrb[8].mxu0  ;;  %v6975_v20 = vpop.f32.mrb[12].mxu1 }
 0x49d   :  { %v1631_v13 = vpop.f32.mrb[9].mxu0  ;;  %v1736_v45 = vpop.f32.mrb[13].mxu1 }
 0x4ae   :  { %v6977_v11 = vpop.f32.mrb[10].mxu0  ;;  %v6979_v3 = vpop.f32.mrb[14].mxu1 }
 0x4af   :  { %v1636_v49 = vpop.f32.mrb[11].mxu0  ;;  %v1741_v35 = vpop.f32.mrb[15].mxu1 }
 0x4b0   :  { %v7054_v49 = vpack.c.bf16 %v202_v57, %v201_v46  ;;  %v203_v35 = vld [vmem:[%s7654_s19 + $0x10] sm:$0xff] }
 0x4b2   :  { %v6981_v25 = vpop.f32.mrb[12].mxu0  ;;  %v6983_v0 = vpop.f32.mrb[16].mxu1 }
 0x4b3   :  { %v1641_v2 = vpop.f32.mrb[13].mxu0  ;;  %v1746_v41 = vpop.f32.mrb[17].mxu1 }
 0x4b4   :  { %v204_v2 = vld [vmem:[%s7654_s19 + $0x18] sm:$0xff] }
 0x4bd   :  { %v6985_v42 = vpop.f32.mrb[14].mxu0  ;;  %v6987_v16 = vpop.f32.mrb[18].mxu1 }
 0x4be   :  { %v1646_v17 = vpop.f32.mrb[15].mxu0  ;;  %v1751_v4 = vpop.f32.mrb[19].mxu1 }
 0x4bf   :  { %v7069_v4 = vld [vmem:[%s7805_s29 + $0x8] sm:$0xff] }
 0x4c1   :  { %v6989_v29 = vpop.f32.mrb[16].mxu0  ;;  %v6991_v43 = vpop.f32.mrb[20].mxu1 }
 0x4c2   :  { %v1651_v6 = vpop.f32.mrb[17].mxu0  ;;  %v1756_v32 = vpop.f32.mrb[21].mxu1 }
 0x4c3   :  { %v7074_v6 = vld [vmem:[%s7805_s29 + $0x10] sm:$0xff]  ;;  %v7077_v32 = vpack.c.bf16 %v204_v2, %v203_v35 }
 0x4ff   :  { %v1654_v26 = vpop.f32.mrb[18].mxu0  ;;  %v1759_v31 = vpop.f32.mrb[22].mxu1 }
 0x500   :  { %v6993_v8 = vpop.f32.mrb[19].mxu0  ;;  %v6995_v7 = vpop.f32.mrb[23].mxu1  ;;  %v205_v26 = vld [vmem:[%s7654_s19 + $0x20] sm:$0xff]  ;;  %v206_v31 = vld [vmem:[%s7654_s19 + $0x28] sm:$0xff] }
 0x501   :  { %7798 = vst [vmem:[#allocation38_spill] sm:$0xff] %v6995_v7 }
 0x503   :  { %v1659_v19 = vpop.f32.mrb[20].mxu0  ;;  %v1764_v52 = vpop.f32.mrb[24].mxu1 }
 0x504   :  { %v6997_v12 = vpop.f32.mrb[21].mxu0  ;;  %v6999_v60 = vpop.f32.mrb[25].mxu1 }
 0x507   :  { %v4645_v15 = vpop.f32.mrb[22].mxu0 }
 0x508   :  { %v1838_v48 = vpop.f32.mrb[23].mxu0 }
 0x509   :  { %4662 = vmatprep.mubr.msk.f32.mxu1 %vm1533_vm5, %v1838_v48  ;;  %v207_v48 = vld [vmem:[%s7654_s19 + $0x30] sm:$0xff]  ;;  %s5763_s19 = smov 64  }
 0x50a   :  { %4663 = vmatmul.mubr.msk.f32.vlgmr.msra.gmra.mrb[26].mxu1 %vm1533_vm5, %v4645_v15  ;;  %v7105_v15 = vpack.c.bf16 %v206_v31, %v205_v26  ;;  %v7128_v54 = vpack.c.bf16 %v208_v51, %v207_v48 }
 0x50b   :  { %4680 = vmatprep.mubr.msk.f32.mxu1 %vm354_vm2, %v1137_v1  ;;  %4679 = vmatpush3.msk.msra.mxu1 %vm1183_vm1, %v6965_v23 }
 0x50c   :  { %5117 = vmatprep.subr.bf16.mxu1 %v7030_v39 }
 0x50e   :  { %4681 = vmatmul.mubr.msk.f32.vlgmr.msra.gmra.mrb[28].mxu1 %vm354_vm2, %v1138_v47  ;;  %v216_v47 = vld [vmem:[#allocation16 + $0x30] sm:$0xff] }
 0x50f   :  { %4683 = vmatprep.mubr.msk.f32.mxu1 %vm354_vm2, %v1139_v40  ;;  %5119 = vmatpush3.bf16.msra.mxu1 %v7030_v39  ;;  %v7136_v18 = vpack.c.bf16 %v217_v50, %v216_v47 }
 0x510   :  { %5121 = vmatprep.subr.bf16.mxu1 %v7032_v53 }
 0x512   :  { %4684 = vmatmul.mubr.msk.f32.gmra.mrb[30].mxu1 %vm354_vm2, %v1140_v34 }
 0x513   :  { %4686 = vmatprep.mubr.msk.f32.mxu1 %vm354_vm2, %v1141_v36  ;;  %5123 = vmatpush3.bf16.msra.mxu1 %v7032_v53 }
 0x514   :  { %5125 = vmatprep.subr.bf16.mxu1 %v7037_v10 }
 0x516   :  { %4687 = vmatmul.mubr.msk.f32.gmra.mrb[32].mxu1 %vm354_vm2, %v1142_v59 }
 0x517   :  { %5127 = vmatpush3.bf16.msra.mxu1 %v7037_v10 }
 0x518   :  { %5129 = vmatprep.subr.bf16.mxu1 %v7136_v18 }
 0x51b   :  { %5131 = vmatpush3.bf16.msra.mxu1 %v7136_v18 }
 0x5dd   :  { %v7048_v30 = vpop.f32.mrb[26].mxu1 }
 0x5de   :  { %v7050_v13 = vpop.f32.mrb[27].mxu1 }
 0x5df   :  { %v5096_v45 = vpack.c.bf16 %v7048_v30, %v7050_v13 }
 0x5e1   :  { %5097 = vmatprep.subr.bf16.mxu0 %v5096_v45  ;;  %v7062_v41 = vpop.f32.mrb[28].mxu1 }
 0x5e2   :  { %5099 = vmatpush3.bf16.msra.mxu0 %v5096_v45  ;;  %v7064_v17 = vpop.f32.mrb[29].mxu1 }
 0x5e3   :  { %5101 = vmatprep.subr.bf16.mxu0 %v7054_v49 }
 0x5e5   :  { %4670 = vmatmul.mubr.msk.f32.vlgmr.msra.gmra.mrb[24].mxu0 %vm234_vm0, %v7069_v4  ;;  %v7087_v19 = vpop.f32.mrb[30].mxu1 }
 0x5e6   :  { %v7089_v52 = vpop.f32.mrb[31].mxu1  ;;  %4672 = vmatprep.mubr.msk.f32.mxu0 %vm234_vm0, %v7074_v6  ;;  %5103 = vmatpush3.bf16.msra.mxu0 %v7054_v49 }
 0x5e7   :  { %5105 = vmatprep.subr.bf16.mxu0 %v7077_v32 }
 0x5e9   :  { %4673 = vmatmul.mubr.msk.f32.gmra.mrb[26].mxu0 %vm234_vm0, %v7096_v58  ;;  %v7115_v24 = vpop.f32.mrb[32].mxu1 }
 0x5ea   :  { %v7117_v1 = vpop.f32.mrb[33].mxu1  ;;  %4675 = vmatprep.mubr.msk.f32.mxu0 %vm234_vm0, %v7102_v14  ;;  %5107 = vmatpush3.bf16.msra.mxu0 %v7077_v32 }
 0x5eb   :  { %5109 = vmatprep.subr.bf16.mxu0 %v7105_v15 }
 0x5ed   :  { %4676 = vmatmul.mubr.msk.f32.gmra.mrb[28].mxu0 %vm234_vm0, %v7124_v62 }
 0x5ee   :  { %5111 = vmatpush3.bf16.msra.mxu0 %v7105_v15 }
 0x5ef   :  { %5113 = vmatprep.subr.bf16.mxu0 %v7128_v54 }
 0x5f2   :  { %5115 = vmatpush3.bf16.msra.mxu0 %v7128_v54 }
 0x5f3   :  { %5145 = vmatprep.subr.bf16.mxu0 %v7054_v49 }
 0x6b8   :  { %v7140_v40 = vpop.f32.mrb[24].mxu0 }
 0x6b9   :  { %v2287_v38 = vmul.f32 %v7062_v41, %v7140_v40  ;;  %v7144_v55 = vpop.f32.mrb[25].mxu0 }
 0x6ba   :  { %v2286_v34 = vmul.f32 %v7064_v17, %v7144_v55  ;;  %4705 = vmatprep.mubr.msk.f32.mxu0 %vm1533_vm5, %v7144_v55 }
 0x6bb   :  { %4706 = vmatmul.mubr.msk.f32.vlgmr.msra.gmra.mrb[30].mxu0 %vm1533_vm5, %v7140_v40 }
 0x6bc   :  { %5147 = vmatpush3.bf16.msra.mxu0 %v7054_v49  ;;  %v7153_v21 = vpop.f32.mrb[26].mxu0  ;;  %4730 = vmatprep.mubr.msk.f32.mxu1 %vm1533_vm5, %v2286_v34 }
 0x6bd   :  { %v2289_v37 = vmul.f32 %v7087_v19, %v7153_v21  ;;  %v7158_v36 = vpop.f32.mrb[27].mxu0  ;;  %4731 = vmatmul.mubr.msk.f32.vlgmr.msra.gmra.mrb[34].mxu1 %vm1533_vm5, %v2287_v38  ;;  %5149 = vmatprep.subr.bf16.mxu0 %v7077_v32 }
 0x6be   :  { %v2288_v59 = vmul.f32 %v7089_v52, %v7158_v36  ;;  %4708 = vmatprep.mubr.msk.f32.mxu0 %vm1533_vm5, %v7158_v36 }
 0x6bf   :  { %4709 = vmatmul.mubr.msk.f32.gmra.mrb[32].mxu0 %vm1533_vm5, %v7153_v21 }
 0x6c0   :  { %5151 = vmatpush3.bf16.msra.mxu0 %v7077_v32  ;;  %v7169_v5 = vpop.f32.mrb[28].mxu0  ;;  %4733 = vmatprep.mubr.msk.f32.mxu1 %vm1533_vm5, %v2288_v59 }
 0x6c1   :  { %v2291_v44 = vmul.f32 %v7115_v24, %v7169_v5  ;;  %v7174_v9 = vpop.f32.mrb[29].mxu0  ;;  %4734 = vmatmul.mubr.msk.f32.gmra.mrb[36].mxu1 %vm1533_vm5, %v2289_v37  ;;  %5153 = vmatprep.subr.bf16.mxu0 %v7105_v15 }
 0x6c2   :  { %v2290_v22 = vmul.f32 %v7117_v1, %v7174_v9  ;;  %4711 = vmatprep.mubr.msk.f32.mxu0 %vm1533_vm5, %v7174_v9 }
 0x6c3   :  { %4712 = vmatmul.mubr.msk.f32.gmra.mrb[34].mxu0 %vm1533_vm5, %v7169_v5 }
 0x6c4   :  { %5155 = vmatpush3.bf16.msra.mxu0 %v7105_v15  ;;  %4736 = vmatprep.mubr.msk.f32.mxu1 %vm1533_vm5, %v2290_v22 }
 0x6c5   :  { %4775 = vmatprep.mubr.msk.f32.mxu0 %vm1533_vm5, %v7050_v13  ;;  %4737 = vmatmul.mubr.msk.f32.gmra.mrb[38].mxu1 %vm1533_vm5, %v2291_v44 }
 0x6c6   :  { %5157 = vmatprep.subr.bf16.mxu0 %v7128_v54 }
 0x6c8   :  { %5159 = vmatpush3.bf16.msra.mxu0 %v7128_v54 }
 0x6cb   :  { %4776 = vmatmul.mubr.msk.f32.vlgmr.msra.gmra.mrb[36].mxu0 %vm1533_vm5, %v7048_v30 }
 0x78e   :  { %v4707_v27 = vpop.f32.mrb[30].mxu0 }
 0x78f   :  { %v2281_v56 = vmul.f32 %v4707_v27, %v7062_v41  ;;  %v2251_v46 = vpop.f32.mrb[31].mxu0 }
 0x790   :  { %v2280_v57 = vmul.f32 %v2251_v46, %v7064_v17  ;;  %v4732_v45 = vpop.f32.mrb[34].mxu1 }
 0x791   :  { %v2406_v35 = vadd.f32 %v4732_v45, %v2281_v56  ;;  %v2376_v2 = vpop.f32.mrb[35].mxu1 }
 0x792   :  { %v2405_v26 = vadd.f32 %v2376_v2, %v2280_v57  ;;  %v4710_v31 = vpop.f32.mrb[32].mxu0 }
 0x793   :  { %v2283_v48 = vmul.f32 %v4710_v31, %v7087_v19  ;;  %2425 = vrot.lane.b32.xlu1 %v2406_v35, %s5763_s19  ;;  %v2261_v51 = vpop.f32.mrb[33].mxu0  ;;  %v7806_v31 = vld [vmem:[#allocation30_spill] sm:$0xff] }
 0x794   :  { %v2282_v47 = vmul.f32 %v2261_v51, %v7089_v52  ;;  %v4735_v50 = vpop.f32.mrb[36].mxu1 }
 0x795   :  { %v2408_v38 = vadd.f32 %v4735_v50, %v2283_v48  ;;  %v2386_v34 = vpop.f32.mrb[37].mxu1  ;;  %v7807_v48 = vsub.s32 0, %v7806_v31 }
 0x796   :  { %v2407_v37 = vadd.f32 %v2386_v34, %v2282_v47  ;;  %v4713_v59 = vpop.f32.mrb[34].mxu0 }
 0x797   :  { %v2285_v44 = vmul.f32 %v4713_v59, %v7115_v24  ;;  %2423 = vrot.lane.b32.xlu1 %v2405_v26, %s5763_s19  ;;  %v2271_v22 = vpop.f32.mrb[35].mxu0  ;;  %v7209_v26 = vld [vmem:[#allocation11] sm:$0xf] }
 0x798   :  { %v2284_v27 = vmul.f32 %v2271_v22, %v7117_v1  ;;  %v4738_v56 = vpop.f32.mrb[38].mxu1  ;;  %2427 = vrot.lane.b32.xlu0 %v2407_v37, %s5763_s19  ;;  %v1516_v51 = vrot.slane %v7209_v26, %v7807_v48 }
 0x799   :  { %v2410_v46 = vadd.f32 %v4738_v56, %v2285_v44  ;;  %v2396_v57 = vpop.f32.mrb[39].mxu1  ;;  %v7220_v56 = vld [vmem:[#allocation2] sm:$0xff] }
 0x79a   :  { %v2409_v45 = vadd.f32 %v2396_v57, %v2284_v27  ;;  %v1630_v47 = vadd.f32 %v6973_v63, %v1516_v51  ;;  %v1635_v22 = vadd.f32 %v6977_v11, %v1516_v51  ;;  %v1640_v27 = vadd.f32 %v6981_v25, %v1516_v51  ;;  %4751 = vmatprep.mubr.msk.f32.mxu1 %vm2477_vm11, %v7220_v56 }
 0x79b   :  { %2429 = vrot.lane.b32.xlu1 %v2408_v38, %s5763_s19  ;;  %v1625_v38 = vadd.f32 %v6969_v28, %v1516_v51  ;;  %v1650_v48 = vadd.f32 %v6989_v29, %v1516_v51 }
 0x79c   :  { %2431 = vrot.lane.b32.xlu0 %v2409_v45, %s5763_s19  ;;  %v1645_v45 = vadd.f32 %v6985_v42, %v1516_v51  ;;  %v2414_v51 = vmul.f32 %v7153_v21, %v1640_v27 }
 0x79e   :  { %v7204_v35 = vpop.f32.mrb[36].mxu0 }
 0x79f   :  { %v7206_v2 = vpop.f32.mrb[37].mxu0  ;;  %2433 = vrot.lane.b32.xlu1 %v2410_v46, %s5763_s19 }
 0x805   :  { %v2426_v50 = vpop.permute.xlu1 %2425 }
 0x806   :  { %v2442_v34 = vmul.f32 %v2426_v50, %v1630_v47 }
 0x808   :  { %2455 = vrot.lane.b32.xlu1 %v2442_v34, %s5763_s19 }
 0x809   :  { %v2424_v37 = vpop.permute.xlu1 %2423 }
 0x80a   :  { %v2441_v59 = vmul.f32 %v2424_v37, %v1625_v38  ;;  %v2428_v44 = vpop.permute.xlu0 %2427  ;;  %v2412_v37 = vmul.f32 %v7140_v40, %v1630_v47  ;;  %v2415_v40 = vmul.f32 %v7174_v9, %v1645_v45  ;;  %v7809_v9 = vld [vmem:[#allocation36_spill] sm:$0xff] }
 0x80b   :  { %v2443_v63 = vmul.f32 %v2428_v44, %v1635_v22 }
 0x80c   :  { %2453 = vrot.lane.b32.xlu0 %v2441_v59, %s5763_s19  ;;  %v2411_v59 = vmul.f32 %v7144_v55, %v1625_v38 }
 0x80d   :  { %v2430_v46 = vpop.permute.xlu1 %2429 }
 0x80e   :  { %v2444_v28 = vmul.f32 %v2430_v46, %v1640_v27  ;;  %v2432_v57 = vpop.permute.xlu0 %2431 }
 0x80f   :  { %v2445_v25 = vmul.f32 %v2432_v57, %v1645_v45 }
 0x810   :  { %2459 = vrot.lane.b32.xlu1 %v2444_v28, %s5763_s19  ;;  %2457 = vrot.lane.b32.xlu0 %v2443_v63, %s5763_s19  ;;  %v2413_v63 = vmul.f32 %v7158_v36, %v1635_v22  ;;  %v5509_v36 = vld [vmem:[%s7732_s1] sm:$0xff] }
 0x811   :  { %v2434_v11 = vpop.permute.xlu1 %2433  ;;  %v7808_v22 = vld [vmem:[#allocation35_spill] sm:$0xff] }
 0x812   :  { %v2446_v50 = vmul.f32 %v2434_v11, %v1650_v48  ;;  %v1264_v27 = vmul.f32 %v5509_v36, %v7808_v22  ;;  %v1519_v36 = vsub.s32 1, %v7806_v31  ;;  %v2840_v22 = vld [vmem:[#allocation13 + $0x30] sm:$0xff] }
 0x814   :  { %2463 = vrot.lane.b32.xlu1 %v2446_v50, %s5763_s19  ;;  %2461 = vrot.lane.b32.xlu0 %v2445_v25, %s5763_s19  ;;  %v2416_v50 = vmul.f32 %v7169_v5, %v1650_v48  ;;  %v5510_v5 = vld [vmem:[%s7732_s1 + $0x8] sm:$0xff]  ;;  %v1266_v48 = vmul.f32 1.7320508, %v1264_v27 }
 0x815   :  { %v1265_v45 = vmul.f32 %v5510_v5, %v7809_v9  ;;  %v2841_v27 = vld [vmem:[#allocation13 + $0x38] sm:$0xff]  ;;  %v1520_v9 = vrot.slane %v7209_v26, %v1519_v36 }
 0x816   :  { %v5188_v5 = vpack.c.bf16 %v2841_v27, %v2840_v22  ;;  %v4324_v22 = vld [vmem:[%s7646_s11 + $0x50] sm:$0xff]  ;;  %v4325_v27 = vld [vmem:[%s7646_s11 + $0x58] sm:$0xff] }
 0x87a   :  { %v2456_v34 = vpop.permute.xlu1 %2455 }
 0x87b   :  { %v2472_v42 = vadd.f32 %v2456_v34, %v2412_v37  ;;  %v1267_v37 = vmul.f32 1.7320508, %v1265_v45  ;;  %v1661_v45 = vadd.f32 %v6997_v12, %v1520_v9 }
 0x87e   :  { %v2454_v44 = vpop.permute.xlu0 %2453 }
 0x87f   :  { %v2471_v46 = vadd.f32 %v2454_v44, %v2411_v59 }
 0x881   :  { %v5132_v29 = vpack.c.bf16 %v2472_v42, %v2471_v46 }
 0x882   :  { %v2460_v28 = vpop.permute.xlu1 %2459  ;;  %v2458_v57 = vpop.permute.xlu0 %2457 }
 0x883   :  { %v2474_v11 = vadd.f32 %v2460_v28, %v2414_v51  ;;  %v2473_v7 = vadd.f32 %v2458_v57, %v2413_v63  ;;  %5133 = vmatprep.subr.bf16.mxu1 %v5132_v29  ;;  %v2834_v28 = vld [vmem:[#allocation13] sm:$0xff]  ;;  %v2835_v57 = vld [vmem:[#allocation13 + $0x8] sm:$0xff] }
 0x884   :  { %5135 = vmatpush3.bf16.msra.mxu1 %v5132_v29 }
 0x885   :  { %v5136_v25 = vpack.c.bf16 %v2474_v11, %v2473_v7  ;;  %v7240_v7 = vld [vmem:[#allocation2 + $0x8] sm:$0xff]  ;;  %v2836_v11 = vld [vmem:[#allocation13 + $0x10] sm:$0xff] }
 0x886   :  { %v2464_v55 = vpop.permute.xlu1 %2463  ;;  %v2462_v47 = vpop.permute.xlu0 %2461 }
 0x887   :  { %v2476_v38 = vadd.f32 %v2464_v55, %v2416_v50  ;;  %v2475_v34 = vadd.f32 %v2462_v47, %v2415_v40  ;;  %5137 = vmatprep.subr.bf16.mxu1 %v5136_v25  ;;  %v2837_v50 = vld [vmem:[#allocation13 + $0x18] sm:$0xff]  ;;  %v2838_v55 = vld [vmem:[#allocation13 + $0x20] sm:$0xff]  ;;  %v2839_v47 = vld [vmem:[#allocation13 + $0x28] sm:$0xff] }
 0x888   :  { %5139 = vmatpush3.bf16.msra.mxu1 %v5136_v25  ;;  %v5176_v25 = vpack.c.bf16 %v2835_v57, %v2834_v28  ;;  %v5180_v40 = vpack.c.bf16 %v2837_v50, %v2836_v11 }
 0x889   :  { %v5140_v21 = vpack.c.bf16 %v2476_v38, %v2475_v34 }
 0x88a   :  { %5177 = vmatprep.subr.bf16.mxu0 %v5176_v25 }
 0x88b   :  { %5141 = vmatprep.subr.bf16.mxu1 %v5140_v21  ;;  %5179 = vmatpush3.bf16.msra.mxu0 %v5176_v25 }
 0x88c   :  { %5143 = vmatpush3.bf16.msra.mxu1 %v5140_v21  ;;  %5181 = vmatprep.subr.bf16.mxu0 %v5180_v40 }
 0x88d   :  { %4754 = vmatprep.subr.msk.mxu1 %vm1183_vm1, %v6965_v23 }
 0x88f   :  { %4752 = vmatmul.mubr.msk.f32.vlgmr.msra.gmra.mrb[40].mxu1 %vm2477_vm11, %v7240_v7  ;;  %5183 = vmatpush3.bf16.msra.mxu0 %v5180_v40 }
 0x890   :  { %4755 = vmatpush3.msk.msra.mxu1 %vm1183_vm1, %v6965_v23  ;;  %4756 = vmatprep.mubr.msk.f32.mxu1 %vm354_vm2, %v1266_v48  ;;  %v1656_v48 = vadd.f32 %v6993_v8, %v1520_v9  ;;  %v5216_v9 = vpack.c.bf16 %v4325_v27, %v4324_v22 }
 0x891   :  { %5161 = vmatprep.subr.bf16.mxu1 %v7030_v39 }
 0x892   :  { %v2810_v57 = vmul.f32 %v7050_v13, %v1656_v48 }
 0x893   :  { %4757 = vmatmul.mubr.msk.f32.vlgmr.msra.gmra.mrb[42].mxu1 %vm354_vm2, %v1267_v37 }
 0x894   :  { %5163 = vmatpush3.bf16.msra.mxu1 %v7030_v39 }
 0x895   :  { %5165 = vmatprep.subr.bf16.mxu1 %v7032_v53 }
 0x898   :  { %5167 = vmatpush3.bf16.msra.mxu1 %v7032_v53 }
 0x899   :  { %5169 = vmatprep.subr.bf16.mxu1 %v7037_v10 }
 0x89c   :  { %5171 = vmatpush3.bf16.msra.mxu1 %v7037_v10 }
 0x89d   :  { %5173 = vmatprep.subr.bf16.mxu1 %v7136_v18 }
 0x8a0   :  { %5175 = vmatpush3.bf16.msra.mxu1 %v7136_v18 }
 0x962   :  { %v4753_v23 = vpop.f32.mrb[40].mxu1 }
 0x963   :  { %v2550_v59 = vpop.f32.mrb[41].mxu1  ;;  %v2560_v11 = vmul.f32 0.25, %v4753_v23 }
 0x964   :  { %v2559_v40 = vmul.f32 0.25, %v2550_v59  ;;  %v221_v59 = vld [vmem:[%s7657_s22 + $0x18] sm:$0xff] }
 0x966   :  { %v7262_v44 = vpop.f32.mrb[42].mxu1 }
 0x967   :  { %v2726_v42 = vmul.f32 %v7262_v44, %v7048_v30  ;;  %v7266_v46 = vpop.f32.mrb[43].mxu1  ;;  %v2724_v29 = vmul.f32 %v7204_v35, %v7262_v44  ;;  %v5184_v35 = vpack.c.bf16 %v2839_v47, %v2838_v55  ;;  %v218_v47 = vld [vmem:[%s7657_s22] sm:$0xff] }
 0x968   :  { %v2725_v51 = vmul.f32 %v7266_v46, %v7050_v13  ;;  %v2723_v63 = vmul.f32 %v7206_v2, %v7266_v46  ;;  %v220_v13 = vld [vmem:[%s7657_s22 + $0x10] sm:$0xff] }
 0x969   :  { %5185 = vmatprep.subr.bf16.mxu0 %v5184_v35 }
 0x96a   :  { %4794 = vmatprep.mubr.msk.f32.mxu1 %vm1533_vm5, %v2725_v51  ;;  %5187 = vmatpush3.bf16.msra.mxu0 %v5184_v35  ;;  %v7302_v35 = vpack.c.bf16 %v221_v59, %v220_v13 }
 0x96b   :  { %4795 = vmatmul.mubr.msk.f32.vlgmr.msra.gmra.mrb[44].mxu1 %vm1533_vm5, %v2726_v42  ;;  %5189 = vmatprep.subr.bf16.mxu0 %v5188_v5 }
 0x96e   :  { %5191 = vmatpush3.bf16.msra.mxu0 %v5188_v5 }
 0xa3e   :  { %v4796_v38 = vpop.f32.mrb[44].mxu1 }
 0xa3f   :  { %v2809_v34 = vadd.f32 %v4796_v38, %v2724_v29  ;;  %v2799_v21 = vpop.f32.mrb[45].mxu1  ;;  %v222_v38 = vld [vmem:[%s7657_s22 + $0x20] sm:$0xff] }
 0xa40   :  { %v2808_v2 = vadd.f32 %v2799_v21, %v2723_v63  ;;  %v2811_v63 = vmul.f32 %v7048_v30, %v1661_v45  ;;  %v219_v30 = vld [vmem:[%s7657_s22 + $0x8] sm:$0xff]  ;;  %v4322_v21 = vld [vmem:[%s7646_s11 + $0x40] sm:$0xff] }
 0xa41   :  { %2816 = vrot.lane.b32.xlu1 %v2809_v34, %s5763_s19  ;;  %v7297_v23 = vpack.c.bf16 %v219_v30, %v218_v47  ;;  %v223_v34 = vld [vmem:[%s7657_s22 + $0x28] sm:$0xff]  ;;  %v7810_v30 = vlaneseq }
 0xa42   :  { %2814 = vrot.lane.b32.xlu0 %v2808_v2, %s5763_s19  ;;  %v4323_v2 = vld [vmem:[%s7646_s11 + $0x48] sm:$0xff]  ;;  %v7325_v5 = vpack.c.bf16 %v223_v34, %v222_v38 }
 0xa43   :  { %5193 = vmatprep.subr.bf16.mxu1 %v7297_v23  ;;  %v5212_v36 = vpack.c.bf16 %v4323_v2, %v4322_v21  ;;  %v7358_v13 = vand.u32 127, %v7810_v30 }
 0xa44   :  { %5195 = vmatpush3.bf16.msra.mxu1 %v7297_v23 }
 0xa45   :  { %5197 = vmatprep.subr.bf16.mxu1 %v7302_v35  ;;  %5213 = vmatprep.subr.bf16.mxu0 %v5212_v36  ;;  %vm3021_vm13 = vcmp.lt.s32.totalorder %v7358_v13, 8  ;;  %vm3024_vm14 = vcmp.lt.s32.totalorder %v7358_v13, 16 }
 0xa48   :  { %5199 = vmatpush3.bf16.msra.mxu1 %v7302_v35 }
 0xa49   :  { %5201 = vmatprep.subr.bf16.mxu1 %v7325_v5 }
 0xa4c   :  { %5203 = vmatpush3.bf16.msra.mxu1 %v7325_v5 }
 0xab3   :  { %v2817_v37 = vpop.permute.xlu1 %2816 }
 0xab4   :  { %v2821_v42 = vmul.f32 %v2817_v37, %v1661_v45  ;;  %v2815_v29 = vpop.permute.xlu0 %2814  ;;  %v4326_v45 = vld [vmem:[%s7646_s11 + $0x60] sm:$0xff]  ;;  %v224_v37 = vld [vmem:[%s7657_s22 + $0x30] sm:$0xff] }
 0xab5   :  { %v2820_v51 = vmul.f32 %v2815_v29, %v1656_v48  ;;  %v4327_v48 = vld [vmem:[%s7646_s11 + $0x68] sm:$0xff] }
 0xab6   :  { %2826 = vrot.lane.b32.xlu1 %v2821_v42, %s5763_s19  ;;  %v225_v42 = vld [vmem:[%s7657_s22 + $0x38] sm:$0xff]  ;;  %v5220_v29 = vpack.c.bf16 %v4327_v48, %v4326_v45 }
 0xab7   :  { %2824 = vrot.lane.b32.xlu0 %v2820_v51, %s5763_s19  ;;  %v7341_v51 = vpack.c.bf16 %v225_v42, %v224_v37  ;;  %v4329_v45 = vld [vmem:[%s7646_s11 + $0x78] sm:$0xff] }
 0xab9   :  { %5205 = vmatprep.subr.bf16.mxu1 %v7341_v51 }
 0xaba   :  { %5207 = vmatpush3.bf16.msra.mxu1 %v7341_v51 }
 0xb28   :  { %v2827_v28 = vpop.permute.xlu1 %2826 }
 0xb29   :  { %v2831_v25 = vadd.f32 %v2827_v28, %v2811_v63  ;;  %v2825_v50 = vpop.permute.xlu0 %2824  ;;  %v226_v63 = vld [vmem:[%s7657_s22 + $0x40] sm:$0xff]  ;;  %v227_v28 = vld [vmem:[%s7657_s22 + $0x48] sm:$0xff] }
 0xb2a   :  { %v2830_v12 = vadd.f32 %v2825_v50, %v2810_v57  ;;  %v7351_v57 = vpack.c.bf16 %v227_v28, %v226_v63 }
 0xb2b   :  { %v2833_v55 = vadd.f32 %v2831_v25, %v2560_v11 }
 0xb2c   :  { %v2832_v8 = vadd.f32 %v2830_v12, %v2559_v40  ;;  %5209 = vmatprep.subr.bf16.mxu1 %v7351_v57 }
 0xb2d   :  { %5211 = vmatpush3.bf16.msra.mxu1 %v7351_v57 }
 0xb2e   :  { %4813 = vmatprep.mubr.msk.f32.mxu0 %vm1533_vm5, %v2832_v8  ;;  %5233 = vmatprep.subr.bf16.mxu1 %v7054_v49 }
 0xb2f   :  { %4814 = vmatmul.mubr.msk.f32.vlgmr.msra.gmra.mrb[38].mxu0 %vm1533_vm5, %v2833_v55 }
 0xb30   :  { %5215 = vmatpush3.bf16.msra.mxu0 %v5212_v36 }
 0xb31   :  { %5217 = vmatprep.subr.bf16.mxu0 %v5216_v9 }
 0xb34   :  { %5219 = vmatpush3.bf16.msra.mxu0 %v5216_v9  ;;  %v4328_v9 = vld [vmem:[%s7646_s11 + $0x70] sm:$0xff] }
 0xb35   :  { %5221 = vmatprep.subr.bf16.mxu0 %v5220_v29  ;;  %v5224_v48 = vpack.c.bf16 %v4329_v45, %v4328_v9 }
 0xb38   :  { %5223 = vmatpush3.bf16.msra.mxu0 %v5220_v29 }
 0xb39   :  { %5225 = vmatprep.subr.bf16.mxu0 %v5224_v48 }
 0xb3c   :  { %5227 = vmatpush3.bf16.msra.mxu0 %v5224_v48 }
 0xc02   :  { %v4815_v11 = vpop.f32.mrb[38].mxu0 }
 0xc03   :  { %v4319_v25 = vmul.f32 -1.442695, %v4815_v11  ;;  %v2914_v50 = vpop.f32.mrb[39].mxu0 }
 0xc04   :  { %v4318_v40 = vmul.f32 -1.442695, %v2914_v50 }
 0xc05   :  { %5483 = vpow2.f32 %v4319_v25 }
 0xc06   :  { %5485 = vpow2.f32 %v4318_v40 }
 0xc0f   :  { %v5484_v12 = vpop.eup %5483 }
 0xc10   :  { %v5486_v55 = vpop.eup %5485  ;;  %v2932_v8 = vadd.f32 1.0, %v5484_v12 }
 0xc11   :  { %v2931_v47 = vadd.f32 1.0, %v5486_v55 }
 0xc12   :  { %5487 = vrcp.f32 %v2932_v8 }
 0xc13   :  { %5489 = vrcp.f32 %v2931_v47 }
 0xc14   :  { %5491 = vtanh.f32 %v4815_v11 }
 0xc15   :  { %5493 = vtanh.f32 %v2914_v50 }
 0xc1c   :  { %v5488_v59 = vpop.eup %5487 }
 0xc1d   :  { %v5490_v38 = vpop.eup %5489  ;;  %v2938_v34 = vmul.f32 %v5488_v59, %v4815_v11 }
 0xc1e   :  { %v5492_v21 = vpop.eup %5491  ;;  %v2937_v2 = vmul.f32 %v5490_v38, %v2914_v50 }
 0xc1f   :  { %v5494_v36 = vpop.eup %5493  ;;  %v3023_v22 = vsel %vm3021_vm13, %v5492_v21, %v2938_v34 }
 0xc20   :  { %4836 = vmatprep.mubr.msk.f32.mxu1 %vm2939_vm9, %v2937_v2  ;;  %v3022_v27 = vsel %vm3021_vm13, %v5494_v36, %v2937_v2 }
 0xc21   :  { %4837 = vmatmul.mubr.msk.f32.vlgmr.msra.gmra.mrb[46].mxu1 %vm2939_vm9, %v2938_v34 }
 0xc22   :  { %5235 = vmatpush3.bf16.msra.mxu1 %v7054_v49 }
 0xc23   :  { %5237 = vmatprep.subr.bf16.mxu1 %v7077_v32 }
 0xc26   :  { %5239 = vmatpush3.bf16.msra.mxu1 %v7077_v32 }
 0xc27   :  { %5241 = vmatprep.subr.bf16.mxu1 %v7105_v15 }
 0xc2a   :  { %5243 = vmatpush3.bf16.msra.mxu1 %v7105_v15 }
 0xc2b   :  { %5245 = vmatprep.subr.bf16.mxu1 %v7128_v54 }
 0xc2e   :  { %5247 = vmatpush3.bf16.msra.mxu1 %v7128_v54 }
 0xcf4   :  { %v4838_v37 = vpop.f32.mrb[46].mxu1 }
 0xcf5   :  { %v3026_v42 = vmul.f32 %v4838_v37, %v4815_v11  ;;  %v3012_v29 = vpop.f32.mrb[47].mxu1 }
 0xcf6   :  { %v3025_v63 = vmul.f32 %v3012_v29, %v2914_v50 }
 0xcf7   :  { %v7383_v28 = vsel %vm3024_vm14, %v3023_v22, %v3026_v42 }
 0xcf8   :  { %v7387_v25 = vsel %vm3024_vm14, %v3022_v27, %v3025_v63 }
 0xcf9   :  { %4855 = vmatprep.mubr.msk.f32.mxu0 %vm1533_vm5, %v7387_v25 }
 0xcfa   :  { %4856 = vmatmul.mubr.msk.f32.vlgmr.msra.gmra.mrb[40].mxu0 %vm1533_vm5, %v7383_v28 }
 0xcfb   :  { %4862 = vmatprep.mubr.msk.f32.mxu0 %vm234_vm0, %v7026_v61 }
 0xdcd   :  { %v7395_v11 = vpop.f32.mrb[40].mxu0 }
 0xdce   :  { %v7399_v50 = vmul.f32 %v7395_v11, %v7262_v44  ;;  %v7401_v40 = vpop.f32.mrb[41].mxu0 }
 0xdcf   :  { %v7405_v12 = vmul.f32 %v7401_v40, %v7266_v46  ;;  %v5228_v55 = vpack.c.bf16 %v7395_v11, %v7401_v40 }
 0xdd1   :  { %5229 = vmatprep.subr.bf16.mxu0 %v5228_v55 }
 0xdd2   :  { %5231 = vmatpush3.bf16.msra.mxu0 %v5228_v55 }
 0xdd3   :  { %5249 = vmatprep.subr.bf16.mxu0 %v7030_v39 }
 0xdd5   :  { %4863 = vmatmul.mubr.msk.f32.vlgmr.msra.gmra.mrb[42].mxu0 %vm234_vm0, %v7069_v4 }
 0xdd6   :  { %4865 = vmatprep.mubr.msk.f32.mxu0 %vm234_vm0, %v7074_v6  ;;  %5251 = vmatpush3.bf16.msra.mxu0 %v7030_v39 }
 0xdd7   :  { %5253 = vmatprep.subr.bf16.mxu0 %v7032_v53 }
 0xdd9   :  { %4866 = vmatmul.mubr.msk.f32.gmra.mrb[44].mxu0 %vm234_vm0, %v7096_v58 }
 0xdda   :  { %4868 = vmatprep.mubr.msk.f32.mxu0 %vm234_vm0, %v7102_v14  ;;  %5255 = vmatpush3.bf16.msra.mxu0 %v7032_v53 }
 0xddb   :  { %5257 = vmatprep.subr.bf16.mxu0 %v7037_v10 }
 0xddd   :  { %4869 = vmatmul.mubr.msk.f32.gmra.mrb[46].mxu0 %vm234_vm0, %v7124_v62  ;;  %vm4173_vm0 = vcmask 48128  }
 0xdde   :  { %5259 = vmatpush3.bf16.msra.mxu0 %v7037_v10 }
 0xddf   :  { %5261 = vmatprep.subr.bf16.mxu0 %v7136_v18 }
 0xde2   :  { %5263 = vmatpush3.bf16.msra.mxu0 %v7136_v18 }
 0xde3   :  { %5277 = vmatprep.subr.bf16.mxu0 %v7054_v49 }
 0xea8   :  { %v7428_v61 = vpop.f32.mrb[42].mxu0 }
 0xea9   :  { %v3334_v4 = vmul.f32 %v7428_v61, %v7062_v41  ;;  %v7432_v6 = vpop.f32.mrb[43].mxu0 }
 0xeaa   :  { %v3333_v58 = vmul.f32 %v7432_v6, %v7064_v17  ;;  %4887 = vmatprep.mubr.msk.f32.mxu1 %vm1533_vm5, %v7432_v6 }
 0xeab   :  { %4888 = vmatmul.mubr.msk.f32.vlgmr.msra.gmra.mrb[48].mxu1 %vm1533_vm5, %v7428_v61 }
 0xeac   :  { %v7440_v14 = vpop.f32.mrb[44].mxu0  ;;  %4912 = vmatprep.mubr.msk.f32.mxu0 %vm1533_vm5, %v3333_v58 }
 0xead   :  { %v3336_v62 = vmul.f32 %v7440_v14, %v7087_v19  ;;  %v7445_v8 = vpop.f32.mrb[45].mxu0  ;;  %4913 = vmatmul.mubr.msk.f32.vlgmr.msra.gmra.mrb[48].mxu0 %vm1533_vm5, %v3334_v4 }
 0xeae   :  { %v3335_v47 = vmul.f32 %v7445_v8, %v7089_v52  ;;  %5279 = vmatpush3.bf16.msra.mxu0 %v7054_v49  ;;  %4890 = vmatprep.mubr.msk.f32.mxu1 %vm1533_vm5, %v7445_v8 }
 0xeaf   :  { %4891 = vmatmul.mubr.msk.f32.gmra.mrb[50].mxu1 %vm1533_vm5, %v7440_v14  ;;  %5281 = vmatprep.subr.bf16.mxu0 %v7077_v32 }
 0xeb0   :  { %v7456_v30 = vpop.f32.mrb[46].mxu0  ;;  %4915 = vmatprep.mubr.msk.f32.mxu0 %vm1533_vm5, %v3335_v47 }
 0xeb1   :  { %v3338_v59 = vmul.f32 %v7456_v30, %v7115_v24  ;;  %v7461_v38 = vpop.f32.mrb[47].mxu0  ;;  %4916 = vmatmul.mubr.msk.f32.gmra.mrb[50].mxu0 %vm1533_vm5, %v3336_v62 }
 0xeb2   :  { %v3337_v49 = vmul.f32 %v7461_v38, %v7117_v1  ;;  %5283 = vmatpush3.bf16.msra.mxu0 %v7077_v32  ;;  %4893 = vmatprep.mubr.msk.f32.mxu1 %vm1533_vm5, %v7461_v38 }
 0xeb3   :  { %4894 = vmatmul.mubr.msk.f32.gmra.mrb[52].mxu1 %vm1533_vm5, %v7456_v30  ;;  %5285 = vmatprep.subr.bf16.mxu0 %v7105_v15 }
 0xeb4   :  { %4918 = vmatprep.mubr.msk.f32.mxu0 %vm1533_vm5, %v3337_v49  ;;  %4933 = vmatprep.mubr.msk.f32.mxu1 %vm2477_vm11, %v7220_v56 }
 0xeb5   :  { %4919 = vmatmul.mubr.msk.f32.gmra.mrb[52].mxu0 %vm1533_vm5, %v3338_v59 }
 0xeb6   :  { %5287 = vmatpush3.bf16.msra.mxu0 %v7105_v15  ;;  %4952 = vmatprep.mubr.msk.f32.mxu0 %vm1533_vm5, %v7401_v40 }
 0xeb7   :  { %5289 = vmatprep.subr.bf16.mxu0 %v7128_v54 }
 0xeba   :  { %5291 = vmatpush3.bf16.msra.mxu0 %v7128_v54 }
 0xebd   :  { %4953 = vmatmul.mubr.msk.f32.vlgmr.msra.gmra.mrb[54].mxu0 %vm1533_vm5, %v7395_v11 }
 0xf7e   :  { %v4889_v32 = vpop.f32.mrb[48].mxu1 }
 0xf7f   :  { %v3328_v34 = vmul.f32 %v4889_v32, %v7062_v41  ;;  %v3298_v21 = vpop.f32.mrb[49].mxu1 }
 0xf80   :  { %v3327_v56 = vmul.f32 %v3298_v21, %v7064_v17  ;;  %v4914_v2 = vpop.f32.mrb[48].mxu0 }
 0xf81   :  { %v3453_v36 = vadd.f32 %v4914_v2, %v3328_v34  ;;  %v3423_v22 = vpop.f32.mrb[49].mxu0 }
 0xf82   :  { %v3452_v15 = vadd.f32 %v3423_v22, %v3327_v56  ;;  %v4892_v27 = vpop.f32.mrb[50].mxu1 }
 0xf83   :  { %v3330_v9 = vmul.f32 %v4892_v27, %v7087_v19  ;;  %v3308_v45 = vpop.f32.mrb[51].mxu1  ;;  %3472 = vrot.lane.b32.xlu1 %v3453_v36, %s5763_s19 }
 0xf84   :  { %v3329_v54 = vmul.f32 %v3308_v45, %v7089_v52  ;;  %3470 = vrot.lane.b32.xlu0 %v3452_v15, %s5763_s19  ;;  %v4917_v48 = vpop.f32.mrb[50].mxu0 }
 0xf85   :  { %v3455_v37 = vadd.f32 %v4917_v48, %v3330_v9  ;;  %v3433_v41 = vpop.f32.mrb[51].mxu0 }
 0xf86   :  { %v3454_v42 = vadd.f32 %v3433_v41, %v3329_v54  ;;  %v4895_v29 = vpop.f32.mrb[52].mxu1 }
 0xf87   :  { %v3332_v17 = vmul.f32 %v4895_v29, %v7115_v24  ;;  %3476 = vrot.lane.b32.xlu1 %v3455_v37, %s5763_s19  ;;  %v3318_v63 = vpop.f32.mrb[53].mxu1 }
 0xf88   :  { %v3331_v55 = vmul.f32 %v3318_v63, %v7117_v1  ;;  %3474 = vrot.lane.b32.xlu0 %v3454_v42, %s5763_s19  ;;  %v4920_v19 = vpop.f32.mrb[52].mxu0  ;;  %v1523_v1 = vsub.s32 2, %v7806_v31 }
 0xf89   :  { %v3457_v4 = vadd.f32 %v4920_v19, %v3332_v17  ;;  %v3443_v58 = vpop.f32.mrb[53].mxu0 }
 0xf8a   :  { %v3456_v52 = vadd.f32 %v3443_v58, %v3331_v55  ;;  %v1524_v49 = vrot.slane %v7209_v26, %v1523_v1 }
 0xf8b   :  { %3480 = vrot.lane.b32.xlu1 %v3457_v4, %s5763_s19 }
 0xf8c   :  { %3478 = vrot.lane.b32.xlu0 %v3456_v52, %s5763_s19  ;;  %v1735_v32 = vadd.f32 %v6975_v20, %v1524_v49  ;;  %v1730_v34 = vadd.f32 %v6971_v33, %v1524_v49  ;;  %v1745_v22 = vadd.f32 %v6983_v0, %v1524_v49  ;;  %v1755_v20 = vadd.f32 %v6991_v43, %v1524_v49 }
 0xf8d   :  { %v1750_v33 = vadd.f32 %v6987_v16, %v1524_v49 }
 0xf8e   :  { %v3458_v41 = vmul.f32 %v7432_v6, %v1730_v34  ;;  %v3461_v16 = vmul.f32 %v7440_v14, %v1745_v22  ;;  %v3463_v52 = vmul.f32 %v7456_v30, %v1755_v20 }
 0xf8f   :  { %v3462_v6 = vmul.f32 %v7461_v38, %v1750_v33 }
 0xf90   :  { %v4954_v62 = vpop.f32.mrb[54].mxu0 }
 0xf91   :  { %v7496_v47 = vmul.f32 %v4954_v62, %v7262_v44  ;;  %v3673_v24 = vpop.f32.mrb[55].mxu0  ;;  %v1740_v44 = vadd.f32 %v6979_v3, %v1524_v49  ;;  %v3459_v3 = vmul.f32 %v7428_v61, %v1735_v32 }
 0xf92   :  { %v7499_v59 = vmul.f32 %v3673_v24, %v7266_v46 }
 0xf93   :  { %v3460_v55 = vmul.f32 %v7445_v8, %v1740_v44  ;;  %v3799_v8 = vld [vmem:[#allocation13 + $0x68] sm:$0xff] }
 0xff5   :  { %v3473_v21 = vpop.permute.xlu1 %3472 }
 0xff6   :  { %v3489_v56 = vmul.f32 %v3473_v21, %v1735_v32  ;;  %v3471_v2 = vpop.permute.xlu0 %3470  ;;  %v1527_v32 = vsub.s32 3, %v7806_v31  ;;  %v3801_v21 = vld [vmem:[#allocation13 + $0x78] sm:$0xff] }
 0xff7   :  { %v3488_v36 = vmul.f32 %v3471_v2, %v1730_v34  ;;  %v3800_v34 = vld [vmem:[#allocation13 + $0x70] sm:$0xff] }
 0xff8   :  { %3502 = vrot.lane.b32.xlu1 %v3489_v56, %s5763_s19  ;;  %v5320_v56 = vpack.c.bf16 %v3801_v21, %v3800_v34  ;;  %v1528_v2 = vrot.slane %v7209_v26, %v1527_v32 }
 0xff9   :  { %v3477_v46 = vpop.permute.xlu1 %3476  ;;  %3500 = vrot.lane.b32.xlu0 %v3488_v36, %s5763_s19  ;;  %v7811_v36 = vld [vmem:[#allocation38_spill] sm:$0xff] }
 0xffa   :  { %v3491_v15 = vmul.f32 %v3477_v46, %v1745_v22  ;;  %v3475_v27 = vpop.permute.xlu0 %3474  ;;  %v1761_v22 = vadd.f32 %v7811_v36, %v1528_v2 }
 0xffb   :  { %v3490_v9 = vmul.f32 %v3475_v27, %v1740_v44 }
 0xffc   :  { %3506 = vrot.lane.b32.xlu1 %v3491_v15, %s5763_s19 }
 0xffd   :  { %v3481_v45 = vpop.permute.xlu1 %3480  ;;  %3504 = vrot.lane.b32.xlu0 %v3490_v9, %s5763_s19  ;;  %v3769_v9 = vmul.f32 %v7401_v40, %v1761_v22  ;;  %v5512_v40 = vld [vmem:[%s7727_s2 + $0x8] sm:$0xff] }
 0xffe   :  { %v3493_v0 = vmul.f32 %v3481_v45, %v1755_v20  ;;  %v3479_v54 = vpop.permute.xlu0 %3478 }
 0xfff   :  { %v3492_v48 = vmul.f32 %v3479_v54, %v1750_v33 }
0x1000   :  { %3510 = vrot.lane.b32.xlu1 %v3493_v0, %s5763_s19 }
0x1001   :  { %3508 = vrot.lane.b32.xlu0 %v3492_v48, %s5763_s19 }
0x106a   :  { %v3503_v37 = vpop.permute.xlu1 %3502 }
0x106b   :  { %v3519_v43 = vadd.f32 %v3503_v37, %v3459_v3  ;;  %v3501_v42 = vpop.permute.xlu0 %3500  ;;  %v4070_v3 = vld [vmem:[%s7653_s18] sm:$0xff]  ;;  %v4071_v37 = vld [vmem:[%s7653_s18 + $0x8] sm:$0xff] }
0x106c   :  { %v3518_v29 = vadd.f32 %v3501_v42, %v3458_v41  ;;  %v4072_v41 = vld [vmem:[%s7653_s18 + $0x10] sm:$0xff]  ;;  %v4073_v42 = vld [vmem:[%s7653_s18 + $0x18] sm:$0xff] }
0x106e   :  { %v5264_v17 = vpack.c.bf16 %v3519_v43, %v3518_v29  ;;  %v3507_v63 = vpop.permute.xlu1 %3506  ;;  %v5344_v43 = vpack.c.bf16 %v4071_v37, %v4070_v3  ;;  %v5348_v29 = vpack.c.bf16 %v4073_v42, %v4072_v41 }
0x106f   :  { %v3521_v19 = vadd.f32 %v3507_v63, %v3461_v16  ;;  %v3505_v4 = vpop.permute.xlu0 %3504 }
0x1070   :  { %v3520_v58 = vadd.f32 %v3505_v4, %v3460_v55  ;;  %5265 = vmatprep.subr.bf16.mxu1 %v5264_v17 }
0x1071   :  { %5267 = vmatpush3.bf16.msra.mxu1 %v5264_v17 }
0x1072   :  { %v5268_v61 = vpack.c.bf16 %v3521_v19, %v3520_v58  ;;  %v3511_v62 = vpop.permute.xlu1 %3510 }
0x1073   :  { %v3523_v24 = vadd.f32 %v3511_v62, %v3463_v52  ;;  %v3509_v1 = vpop.permute.xlu0 %3508 }
0x1074   :  { %v3522_v49 = vadd.f32 %v3509_v1, %v3462_v6  ;;  %5269 = vmatprep.subr.bf16.mxu1 %v5268_v61 }
0x1075   :  { %5271 = vmatpush3.bf16.msra.mxu1 %v5268_v61 }
0x1076   :  { %v5272_v14 = vpack.c.bf16 %v3523_v24, %v3522_v49 }
0x1078   :  { %5273 = vmatprep.subr.bf16.mxu1 %v5272_v14 }
0x1079   :  { %5275 = vmatpush3.bf16.msra.mxu1 %v5272_v14 }
0x107a   :  { %5293 = vmatprep.subr.bf16.mxu1 %v7030_v39 }
0x107c   :  { %4934 = vmatmul.mubr.msk.f32.vlgmr.msra.gmra.mrb[54].mxu1 %vm2477_vm11, %v7240_v7  ;;  %v3796_v7 = vld [vmem:[#allocation13 + $0x50] sm:$0xff] }
0x107d   :  { %5295 = vmatpush3.bf16.msra.mxu1 %v7030_v39  ;;  %4971 = vmatprep.mubr.msk.f32.mxu1 %vm1533_vm5, %v7405_v12  ;;  %v3798_v12 = vld [vmem:[#allocation13 + $0x60] sm:$0xff] }
0x107e   :  { %5297 = vmatprep.subr.bf16.mxu1 %v7032_v53 }
0x1081   :  { %5299 = vmatpush3.bf16.msra.mxu1 %v7032_v53 }
0x1082   :  { %5301 = vmatprep.subr.bf16.mxu1 %v7037_v10 }
0x1085   :  { %5303 = vmatpush3.bf16.msra.mxu1 %v7037_v10  ;;  %v3794_v10 = vld [vmem:[#allocation13 + $0x40] sm:$0xff] }
0x1086   :  { %5305 = vmatprep.subr.bf16.mxu1 %v7136_v18 }
0x1089   :  { %5307 = vmatpush3.bf16.msra.mxu1 %v7136_v18  ;;  %v3795_v18 = vld [vmem:[#allocation13 + $0x48] sm:$0xff] }
0x108a   :  { %5325 = vmatprep.subr.bf16.mxu1 %v7297_v23 }
0x108c   :  { %4972 = vmatmul.mubr.msk.f32.vlgmr.msra.gmra.mrb[56].mxu1 %vm1533_vm5, %v7399_v50  ;;  %v3797_v50 = vld [vmem:[#allocation13 + $0x58] sm:$0xff] }
0x108d   :  { %5327 = vmatpush3.bf16.msra.mxu1 %v7297_v23  ;;  %v5308_v23 = vpack.c.bf16 %v3795_v18, %v3794_v10  ;;  %v4074_v18 = vld [vmem:[%s7653_s18 + $0x20] sm:$0xff] }
0x108e   :  { %5329 = vmatprep.subr.bf16.mxu1 %v7302_v35 }
0x108f   :  { %5309 = vmatprep.subr.bf16.mxu0 %v5308_v23 }
0x1090   :  { %5311 = vmatpush3.bf16.msra.mxu0 %v5308_v23 }
0x1091   :  { %5331 = vmatpush3.bf16.msra.mxu1 %v7302_v35  ;;  %v5312_v35 = vpack.c.bf16 %v3797_v50, %v3796_v7  ;;  %v4075_v7 = vld [vmem:[%s7653_s18 + $0x28] sm:$0xff]  ;;  %v4076_v50 = vld [vmem:[%s7653_s18 + $0x30] sm:$0xff] }
0x1092   :  { %5333 = vmatprep.subr.bf16.mxu1 %v7325_v5  ;;  %v5352_v23 = vpack.c.bf16 %v4075_v7, %v4074_v18 }
0x1093   :  { %5313 = vmatprep.subr.bf16.mxu0 %v5312_v35 }
0x1094   :  { %5315 = vmatpush3.bf16.msra.mxu0 %v5312_v35  ;;  %v4077_v35 = vld [vmem:[%s7653_s18 + $0x38] sm:$0xff]  ;;  %s5765_s18 = smov [#allocation17]  }
0x1095   :  { %5335 = vmatpush3.bf16.msra.mxu1 %v7325_v5  ;;  %v5316_v5 = vpack.c.bf16 %v3799_v8, %v3798_v12  ;;  %v5356_v12 = vpack.c.bf16 %v4077_v35, %v4076_v50  ;;  %v4160_v8 = vld [vmem:[%s7812_s26 + $0x8] sm:$0xff]  ;;  %s4194_s11 = sshll.u32 %s5765_s18, 4  ;;  %s4195_s11 = int_to_ptr.vmem [resolvable:$true] %s4194_s11 }
0x1096   :  { %5337 = vmatprep.subr.bf16.mxu1 %v7341_v51  ;;  %s5711_s6 = scalar_lea.vmem %s4195_s11, 256  ;;  %p5716_p3 = scmp.lt.s32.totalorder %s4195_s11, %s4195_s11 }
0x1097   :  { %5317 = vmatprep.subr.bf16.mxu0 %v5316_v5  ;;  %p5712_p2 = scmp.ne.s32.totalorder %s4195_s11, %s5711_s6  ;;  %p5717_p4 = scmp.lt.s32.totalorder %s5711_s6, %s5711_s6 }
0x1098   :  { %5319 = vmatpush3.bf16.msra.mxu0 %v5316_v5  ;;  %v4159_v5 = vld [vmem:[%s7812_s26] sm:$0xff] }
0x1099   :  { %5339 = vmatpush3.bf16.msra.mxu1 %v7341_v51  ;;  %5321 = vmatprep.subr.bf16.mxu0 %v5320_v56  ;;  %p5718_p5 = por %p5717_p4, %p5716_p3 }
0x109a   :  { %5341 = vmatprep.subr.bf16.mxu1 %v7351_v57 }
0x109b   :  { %p5719_p6 = pnand %p5718_p5, %p5712_p2 }
0x109c   :  { %5323 = vmatpush3.bf16.msra.mxu0 %v5320_v56 }
0x109d   :  { %5343 = vmatpush3.bf16.msra.mxu1 %v7351_v57 }
0x114f   :  { %v4935_v39 = vpop.f32.mrb[54].mxu1 }
0x1150   :  { %v3590_v53 = vpop.f32.mrb[55].mxu1  ;;  %v3600_v20 = vmul.f32 0.25, %v4935_v39 }
0x1151   :  { %v3599_v0 = vmul.f32 0.25, %v3590_v53 }
0x115f   :  { %v4973_v30 = vpop.f32.mrb[56].mxu1 }
0x1160   :  { %v3768_v51 = vadd.f32 %v4973_v30, %v7496_v47  ;;  %v3758_v38 = vpop.f32.mrb[57].mxu1  ;;  %v4362_v47 = vld [vmem:[%s7652_s17 + $0x4] sm:$0x7]  ;;  %v5764_v30 = vmov 0  }
0x1161   :  { %v3767_v57 = vadd.f32 %v3758_v38, %v7499_v59  ;;  %5016 = vmatprep.subr.msk.mxu0 %vm1183_vm1, %v4362_v47  ;;  %v1766_v59 = vadd.f32 %v6999_v60, %v1528_v2  ;;  %5406 = vset.pattern.permute.xlu1 %v5764_v30 }
0x1162   :  { %3775 = vrot.lane.b32.xlu1 %v3768_v51, %s5763_s19  ;;  %5405 = vset.pattern.permute.xlu0 %v5764_v30 }
0x1163   :  { %3773 = vrot.lane.b32.xlu0 %v3767_v57, %s5763_s19  ;;  %v3770_v26 = vmul.f32 %v7395_v11, %v1766_v59  ;;  %v5511_v11 = vld [vmem:[%s7727_s2] sm:$0xff] }
0x11d4   :  { %v3776_v44 = vpop.permute.xlu1 %3775 }
0x11d5   :  { %v3780_v46 = vmul.f32 %v3776_v44, %v1766_v59  ;;  %v3774_v31 = vpop.permute.xlu0 %3773 }
0x11d6   :  { %v3779_v15 = vmul.f32 %v3774_v31, %v1761_v22 }
0x11d7   :  { %3785 = vrot.lane.b32.xlu1 %v3780_v46, %s5763_s19 }
0x11d8   :  { %3783 = vrot.lane.b32.xlu0 %v3779_v15, %s5763_s19 }
0x11db   :  { %4168 = vperm.xlu1 %5406, %v4160_v8  }
0x11dc   :  { %4163 = vperm.xlu0 %5405, %v4159_v5  }
0x1249   :  { %v3786_v27 = vpop.permute.xlu1 %3785 }
0x124a   :  { %v3790_v33 = vadd.f32 %v3786_v27, %v3770_v26  ;;  %v3784_v45 = vpop.permute.xlu0 %3783 }
0x124b   :  { %v3789_v60 = vadd.f32 %v3784_v45, %v3769_v9 }
0x124c   :  { %v3792_v54 = vadd.f32 %v3790_v33, %v3600_v20 }
0x124d   :  { %v3791_v48 = vadd.f32 %v3789_v60, %v3599_v0 }
0x124f   :  { %4990 = vmatprep.mubr.msk.f32.mxu0 %vm1533_vm5, %v3791_v48 }
0x1250   :  { %4991 = vmatmul.mubr.msk.f32.vlgmr.msra.gmra.mrb[56].mxu0 %vm1533_vm5, %v3792_v54 }
0x1251   :  { %5017 = vmatpush3.msk.msra.mxu0 %vm1183_vm1, %v4362_v47  ;;  %5018 = vmatprep.mubr.msk.f32.mxu0 %vm354_vm2, %v5511_v11 }
0x1252   :  { %5345 = vmatprep.subr.bf16.mxu0 %v5344_v43 }
0x1254   :  { %5019 = vmatmul.mubr.msk.f32.vlgmr.msra.gmra.mrb[58].mxu0 %vm354_vm2, %v5512_v40 }
0x1255   :  { %5347 = vmatpush3.bf16.msra.mxu0 %v5344_v43 }
0x1256   :  { %5349 = vmatprep.subr.bf16.mxu0 %v5348_v29 }
0x1259   :  { %5351 = vmatpush3.bf16.msra.mxu0 %v5348_v29 }
0x125a   :  { %5353 = vmatprep.subr.bf16.mxu0 %v5352_v23  ;;  %v4169_v36 = vpop.permute.xlu1 %4168 }
0x125b   :  { %v4164_v22 = vpop.permute.xlu0 %4163 }
0x125d   :  { %5355 = vmatpush3.bf16.msra.mxu0 %v5352_v23 }
0x125e   :  { %5357 = vmatprep.subr.bf16.mxu0 %v5356_v12 }
0x1261   :  { %5359 = vmatpush3.bf16.msra.mxu0 %v5356_v12 }
0x1323   :  { %v4992_v16 = vpop.f32.mrb[56].mxu0 }
0x1324   :  { %v4359_v17 = vmul.f32 -1.442695, %v4992_v16  ;;  %v3874_v63 = vpop.f32.mrb[57].mxu0 }
0x1325   :  { %v4358_v55 = vmul.f32 -1.442695, %v3874_v63 }
0x1326   :  { %5495 = vpow2.f32 %v4359_v17 }
0x1327   :  { %5497 = vpow2.f32 %v4358_v55  ;;  %v5020_v19 = vpop.f32.mrb[58].mxu0 }
0x1328   :  { %v4057_v4 = vpop.f32.mrb[59].mxu0  ;;  %v4067_v32 = vmul.f32 %v5020_v19, %v7383_v28 }
0x1329   :  { %v4066_v21 = vmul.f32 %v4057_v4, %v7387_v25 }
0x1330   :  { %v5496_v58 = vpop.eup %5495 }
0x1331   :  { %v5498_v52 = vpop.eup %5497  ;;  %v3892_v61 = vadd.f32 1.0, %v5496_v58 }
0x1332   :  { %v3891_v62 = vadd.f32 1.0, %v5498_v52 }
0x1333   :  { %5499 = vrcp.f32 %v3892_v61 }
0x1334   :  { %5501 = vrcp.f32 %v3891_v62 }
0x1335   :  { %5503 = vtanh.f32 %v4992_v16 }
0x1336   :  { %5505 = vtanh.f32 %v3874_v63 }
0x133d   :  { %v5500_v6 = vpop.eup %5499 }
0x133e   :  { %v5502_v24 = vpop.eup %5501  ;;  %v3898_v1 = vmul.f32 %v5500_v6, %v4992_v16 }
0x133f   :  { %v5504_v49 = vpop.eup %5503  ;;  %v3897_v14 = vmul.f32 %v5502_v24, %v3874_v63 }
0x1340   :  { %v5506_v39 = vpop.eup %5505  ;;  %v3981_v53 = vsel %vm3021_vm13, %v5504_v49, %v3898_v1 }
0x1341   :  { %5013 = vmatprep.mubr.msk.f32.mxu1 %vm2939_vm9, %v3897_v14  ;;  %v3980_v10 = vsel %vm3021_vm13, %v5506_v39, %v3897_v14 }
0x1342   :  { %5014 = vmatmul.mubr.msk.f32.vlgmr.msra.gmra.mrb[58].mxu1 %vm2939_vm9, %v3898_v1 }
0x1415   :  { %v5015_v51 = vpop.f32.mrb[58].mxu1 }
0x1416   :  { %v3983_v38 = vmul.f32 %v5015_v51, %v4992_v16  ;;  %v3971_v57 = vpop.f32.mrb[59].mxu1 }
0x1417   :  { %v3982_v34 = vmul.f32 %v3971_v57, %v3874_v63 }
0x1418   :  { %v3985_v56 = vsel %vm3024_vm14, %v3981_v53, %v3983_v38 }
0x1419   :  { %v4069_v2 = vadd.f32 %v4067_v32, %v3985_v56  ;;  %v3984_v47 = vsel %vm3024_vm14, %v3980_v10, %v3982_v34 }
0x141a   :  { %v4068_v59 = vadd.f32 %v4066_v21, %v3984_v47 }
0x141c   :  { %5037 = vmatprep.mubr.msk.f32.mxu0 %vm1533_vm5, %v4068_v59 }
0x141d   :  { %5038 = vmatmul.mubr.msk.f32.vlgmr.msra.gmra.mrb[60].mxu0 %vm1533_vm5, %v4069_v2 }
0x14f0   :  { %v5039_v44 = vpop.f32.mrb[60].mxu0 }
0x14f1   :  { %v4172_v28 = vmul.f32 %v5039_v44, %v4169_v36  ;;  %v4150_v46 = vpop.f32.mrb[61].mxu0 }
0x14f2   :  { %v4171_v31 = vmul.f32 %v4164_v22, %v4150_v46 }
0x14f3   :  { %v4175_v25 = vsel %vm4173_vm0, %v4172_v28, 0.0 }
0x14f4   :  { %v4174_v15 = vsel %vm4173_vm0, %v4171_v31, 0.0 }
0x14f5   :  { %v4176_v26 = vadd.f32 %v4175_v25, %v4174_v15 }
0x14f7   :  { %v4177_v27 = vrot.slane %v4176_v26, 4 }
0x14f9   :  { %v4178_v13 = vadd.f32 %v4177_v27, %v4176_v26 }
0x14fb   :  { %v4179_v9 = vrot.slane %v4178_v13, 2 }
0x14fd   :  { %v4180_v20 = vadd.f32 %v4179_v9, %v4178_v13 }
0x14ff   :  { %v4181_v33 = vrot.slane %v4180_v20, 1 }
0x1501   :  { %v4182_v45 = vadd.f32 %v4181_v33, %v4180_v20 }
0x1503   :  { %v4183_v0 = vsub.f32 %v4150_v46, %v4182_v45  ;;  %v4184_v60 = vsub.f32 %v5039_v44, %v4182_v45 }
0x1505   :  { %v4185_v54 = vsel %vm4173_vm0, %v4183_v0, 0.0  ;;  %v4186_v48 = vsel %vm4173_vm0, %v4184_v60, 0.0 }
0x1506   :  { %4187 = vst [vmem:[#allocation17] sm:$0xff] %v4185_v54  ;;  %4188 = vst [vmem:[#allocation17 + $0x8] sm:$0xff] %v4186_v48 }
0x1507   :  { %5722 = shalt.err (!%p5719_p6)
}
0x1508   :  { %s5723_s16 = scalar_lea.hbm %s7658_s23, 256 }
0x1509   :  { %p5724_p7 = scmp.ne.s32.totalorder %s7658_s23, %s5723_s16  ;;  %p5727_p8 = scmp.lt.u32.totalorder %s5723_s16, %s7658_s23 }
0x150b   :  { %p5729_p9 = pnand %p5727_p8, %p5724_p7 }
0x150d   :  { %5732 = shalt.err (!%p5729_p9)
}
0x150e   :  { %4200 = dma.vmem_to_hbm [thread:$0]  %s4195_s11, 256, %s7658_s23, [#allocation4], %s5748_s30, %s5748_s30, %s5749_s27  }
0x150f   :  { %5743 = dma.done.wait [#allocation4], 256  }
0x1510   :  { %5744 = vsyncadd [#allocation4], 4294967040 }
0x1511   :  { %4204 = vsyncpa [#allocation3], 1 }
0x1512   :  { %4205 = vsyncpa [#allocation6], 1 }
0x1513   :  { %4206 = vsyncpa [#allocation9], 1 }
0x1514   :  { %4207 = vsyncpa [#allocation12], 1 }
0x1515   :  { %4208 = vsyncpa [#allocation15], 1 }
0x1516   :  { %4209 = vsyncpa [#allocation4], 1 }

</bundles_post_ra>
